<compile_context>
chip_gen: v6e
topology: v6e:2x2x1
jax: 0.10.0
libtpu: 0.0.40
codegen_flags: <defaults>
</compile_context>

<pallas_src>
import functools

import jax
import jax.numpy as jnp
from jax import lax
from jax.experimental import pallas as pl
from jax.experimental.pallas import tpu as pltpu


def _round_up(x, m):
    return (x + m - 1) // m * m


def _vmem_limit_bytes():
    """Per-generation VMEM cap (~70% of physical: v7x 64MiB -> ~45MiB, v5e/v6e 128MiB -> ~90MiB)."""
    try:
        cap = pltpu.get_tpu_info().vmem_capacity_bytes
        return int(max(32 * 1024 * 1024, min(cap * 0.7, cap - 8 * 1024 * 1024)))
    except Exception:
        return 40 * 1024 * 1024      # safe on every generation


def _choose_cout_block(cout, s_out, max_block_bytes=8 * 1024 * 1024):
    """Channels per grid step: keep the f32 (tc, S_out) output block <= max_block_bytes."""
    if cout <= 16 or cout % 16 != 0:
        return cout
    tc = (max_block_bytes // (s_out * 4)) // 16 * 16
    tc = int(min(cout, max(16, tc)))
    while cout % tc != 0:
        tc -= 16
    return max(tc, 16)


def _single_conv_kernel(x_ref, w_ref, gamma_ref, beta_ref, mask_ref, o_ref, *,
                        tap_offsets, s_out, inv_count, eps):
    # x_ref:      (Cin_p, Lx)       bf16  zero-padded, flattened sample (resident per n)
    # w_ref:      (k^3, tc, Cin_p)  bf16  per-tap weight panels for this Cout block
    # gamma/beta: (tc, 1)           f32
    # mask_ref:   (1, s_out)        f32   1.0 at valid output positions, 0.0 at apron/tail
    # o_ref:      (tc, s_out)       f32
    xv = x_ref[...]                                            # single load of the sample

    # Conv3d (bias=False) as a tap-sum: each tap is a constant flat shift of x
    # (static slice -> cheap shifted load), contracted over Cin on the MXU with
    # f32 accumulation.  x is read from HBM exactly once per sample.
    off0 = tap_offsets[0]
    acc = jnp.dot(w_ref[0], xv[:, off0:off0 + s_out],
                  preferred_element_type=jnp.float32)
    for t in range(1, len(tap_offsets)):
        off = tap_offsets[t]
        acc = acc + jnp.dot(w_ref[t], xv[:, off:off + s_out],
                            preferred_element_type=jnp.float32)

    # InstanceNorm3d (biased variance, eps inside rsqrt) over the VALID
    # positions only, then affine + ReLU.  Apron/tail columns hold finite
    # garbage; they are excluded from the statistics and dropped by the wrapper.
    m = mask_ref[...]                                          # (1, s_out)
    mean = jnp.sum(acc * m, axis=1, keepdims=True) * inv_count
    centered = acc - mean
    var = jnp.sum(centered * centered * m, axis=1, keepdims=True) * inv_count
    xn = centered * lax.rsqrt(var + eps)
    o_ref[...] = jnp.maximum(gamma_ref[...] * xn + beta_ref[...], 0.0)


@functools.partial(jax.jit, static_argnames=("stride", "padding", "eps"))
def single_conv_forward(x, weight, gamma, beta, *, stride, padding, eps=1e-5):
    """x: (N, Cin, D, H, W); weight: (Cout, Cin, k, k, k); gamma/beta: (Cout,)."""
    N, Cin, D, H, W = x.shape
    Cout = weight.shape[0]
    k = weight.shape[2]
    s, p = stride, padding

    Dp, Hp, Wp = D + 2 * p, H + 2 * p, W + 2 * p
    Dout = (Dp - k) // s + 1
    Hout = (Hp - k) // s + 1
    Wout = (Wp - k) // s + 1
    HWp = Hp * Wp
    Lp = Dp * HWp

    # "Extended" flat output coordinates: o = d*HWp + h*Wp + w over the PADDED
    # spatial strides.  Valid conv outputs live at o = (d*s)*HWp+(h*s)*Wp+(w*s);
    # every conv tap then becomes a constant flat shift of x.  Apron / alignment
    # tail columns are garbage: masked out of the stats, discarded below.
    Dext = (Dout - 1) * s + 1
    S_out = _round_up(Dext * HWp, 128)                 # lane-dense, 128-aligned
    off_max = (k - 1) * (HWp + Wp + 1)
    Lx = _round_up(max(S_out + off_max, Lp), 128)

    Cin_p = _round_up(Cin, 8)                          # clean sublane extent (zeros are a no-op)
    k3 = k * k * k

    # x: cast to bf16 FIRST, then pad + flatten (fuses into one XLA pass; no 27x blowup).
    xb = x.astype(jnp.bfloat16)
    xb = jnp.pad(xb, ((0, 0), (0, Cin_p - Cin), (p, p), (p, p), (p, p)))
    x_flat = xb.reshape(N, Cin_p, Lp)
    x_flat = jnp.pad(x_flat, ((0, 0), (0, 0), (0, Lx - Lp)))

    # Weights as per-tap (Cout, Cin_p) panels; gamma/beta as (Cout, 1).
    w_taps = jnp.transpose(weight, (2, 3, 4, 0, 1)).reshape(k3, Cout, Cin)
    w_taps = jnp.pad(w_taps, ((0, 0), (0, 0), (0, Cin_p - Cin))).astype(jnp.bfloat16)
    gamma2 = gamma.reshape(Cout, 1).astype(jnp.float32)
    beta2 = beta.reshape(Cout, 1).astype(jnp.float32)

    # Validity mask over the extended flat coordinates (handles stride > 1 too).
    o = jnp.arange(S_out, dtype=jnp.int32)
    ow = o % Wp
    oh = (o // Wp) % Hp
    od = o // HWp
    valid = ((od % s == 0) & (od // s < Dout) &
             (oh % s == 0) & (oh // s < Hout) &
             (ow % s == 0) & (ow // s < Wout))
    mask = valid.astype(jnp.float32).reshape(1, S_out)

    tap_offsets = tuple(kd * HWp + kh * Wp + kw
                        for kd in range(k) for kh in range(k) for kw in range(k))

    tc = _choose_cout_block(Cout, S_out)
    cb = Cout // tc

    kernel = functools.partial(
        _single_conv_kernel,
        tap_offsets=tap_offsets, s_out=S_out,
        inv_count=1.0 / float(Dout * Hout * Wout), eps=eps)

    out = pl.pallas_call(
        kernel,
        out_shape=jax.ShapeDtypeStruct((N, Cout, S_out), jnp.float32),
        grid=(N, cb),
        in_specs=[
            pl.BlockSpec((None, Cin_p, Lx), lambda n, c: (n, 0, 0)),   # x (fetched once per n)
            pl.BlockSpec((k3, tc, Cin_p), lambda n, c: (0, c, 0)),     # tap weights
            pl.BlockSpec((tc, 1), lambda n, c: (c, 0)),                # gamma
            pl.BlockSpec((tc, 1), lambda n, c: (c, 0)),                # beta
            pl.BlockSpec((1, S_out), lambda n, c: (0, 0)),             # valid mask
        ],
        out_specs=pl.BlockSpec((None, tc, S_out), lambda n, c: (n, c, 0)),
        compiler_params=pltpu.CompilerParams(
            dimension_semantics=("parallel", "parallel"),
            vmem_limit_bytes=_vmem_limit_bytes()),
    )(x_flat, w_taps, gamma2, beta2, mask)

    # Extract valid positions: (N, Cout, S_out) -> NCDHW (cheap, ~1x output size).
    # TODO(synk): for stride > 1 this computes (and discards) ~s^3 extra positions.
    y = out[:, :, :Dext * HWp].reshape(N, Cout, Dext, Hp, Wp)
    y = y[:, :, ::s, :(Hout - 1) * s + 1:s, :(Wout - 1) * s + 1:s]
    return y


def _reference(x, weight, gamma, beta, *, stride, padding, eps=1e-5):
    """Pure-JAX reference mirroring Conv3d -> InstanceNorm3d(affine) -> ReLU."""
    y = lax.conv_general_dilated(
        x, weight,
        window_strides=(stride,) * 3,
        padding=[(padding, padding)] * 3,
        dimension_numbers=("NCDHW", "OIDHW", "NCDHW"))
    mean = jnp.mean(y, axis=(2, 3, 4), keepdims=True)
    var = jnp.mean((y - mean) ** 2, axis=(2, 3, 4), keepdims=True)
    yn = (y - mean) * lax.rsqrt(var + eps)
    g = gamma.reshape(1, -1, 1, 1, 1)
    b = beta.reshape(1, -1, 1, 1, 1)
    return jnp.maximum(g * yn + b, 0.0)


if __name__ == "__main__":
    # Module config: SingleConv(in_ch=4, out_ch=8, kernel_size=3, stride=1, padding=1)
    N, Cin, Cout, Dsp, k, stride, padding = 2, 4, 8, 8, 3, 1, 1

    key = jax.random.PRNGKey(0)
    kx, kw = jax.random.split(key)
    x = jax.random.normal(kx, (N, Cin, Dsp, Dsp, Dsp), dtype=jnp.float32)
    weight = 0.1 * jax.random.normal(kw, (Cout, Cin, k, k, k), dtype=jnp.float32)
    gamma = jnp.ones((Cout,), dtype=jnp.float32)   # InstanceNorm3d affine init
    beta = jnp.zeros((Cout,), dtype=jnp.float32)

    out = single_conv_forward(x, weight, gamma, beta, stride=stride, padding=padding)
    out = jax.block_until_ready(out)

    ref = _reference(x, weight, gamma, beta, stride=stride, padding=padding)
    assert out.shape == ref.shape, (out.shape, ref.shape)
    # bf16 matmul operands (f32 accumulation): tolerance loosened accordingly.
    assert jnp.allclose(out, ref, atol=2e-2, rtol=2e-2), float(
        jnp.max(jnp.abs(out - ref)))

    print("KERNEL_OK")
</pallas_src>

<mosaic_0001>
module attributes {stable_mosaic.version = 11 : i64} {
  func.func @_single_conv_kernel(%arg0: i32, %arg1: i32, %arg2: memref<1x8x1152xbf16, #tpu.memory_space<vmem>>, %arg3: memref<27x8x8xbf16, #tpu.memory_space<vmem>>, %arg4: memref<8x1xf32, #tpu.memory_space<vmem>>, %arg5: memref<8x1xf32, #tpu.memory_space<vmem>>, %arg6: memref<1x896xf32, #tpu.memory_space<vmem>>, %arg7: memref<1x8x896xf32, #tpu.memory_space<vmem>>) attributes {dimension_semantics = [#tpu.dimension_semantics<parallel>, #tpu.dimension_semantics<parallel>], iteration_bounds = array<i64: 2, 1>, scalar_prefetch = 0 : i64, scratch_operands = 0 : i64, tpu.core_type = #tpu.core_type<tc>, window_params = [{transform_indices = @transform_0, window_bounds = array<i64: 1, 8, 1152>}, {transform_indices = @transform_1, window_bounds = array<i64: 27, 8, 8>}, {transform_indices = @transform_2, window_bounds = array<i64: 8, 1>}, {transform_indices = @transform_3, window_bounds = array<i64: 8, 1>}, {pipeline_mode = #tpu.pipeline_mode<synchronous>, transform_indices = @transform_4, window_bounds = array<i64: 1, 896>}, {transform_indices = @transform_5, window_bounds = array<i64: 1, 8, 896>}]} {
    %c0 = arith.constant 0 : index
    %c0_0 = arith.constant 0 : index
    %c0_1 = arith.constant 0 : index
    %0 = vector.load %arg2[%c0, %c0_0, %c0_1] : memref<1x8x1152xbf16, #tpu.memory_space<vmem>>, vector<1x8x1152xbf16>
    %1 = vector.shape_cast %0 : vector<1x8x1152xbf16> to vector<8x1152xbf16>
    %c0_2 = arith.constant 0 : index
    %c0_3 = arith.constant 0 : index
    %c0_4 = arith.constant 0 : index
    %2 = vector.load %arg3[%c0_2, %c0_3, %c0_4] : memref<27x8x8xbf16, #tpu.memory_space<vmem>>, vector<1x8x8xbf16>
    %3 = vector.shape_cast %2 : vector<1x8x8xbf16> to vector<8x8xbf16>
    %4 = vector.extract_strided_slice %1 {offsets = [0, 0], sizes = [8, 896], strides = [1, 1]} : vector<8x1152xbf16> to vector<8x896xbf16>
    %cst = arith.constant dense<0.000000e+00> : vector<8x896xf32>
    %5 = tpu.matmul %3, %4, %cst {dimension_numbers = #tpu.dot_dimension_numbers<[1], [0], [0], [1], [0, 0, 1, 1], [], []>} : vector<8x8xbf16>, vector<8x896xbf16>, vector<8x896xf32> -> vector<8x896xf32>
    %c1 = arith.constant 1 : index
    %c0_5 = arith.constant 0 : index
    %c0_6 = arith.constant 0 : index
    %6 = vector.load %arg3[%c1, %c0_5, %c0_6] : memref<27x8x8xbf16, #tpu.memory_space<vmem>>, vector<1x8x8xbf16>
    %7 = vector.shape_cast %6 : vector<1x8x8xbf16> to vector<8x8xbf16>
    %8 = vector.extract_strided_slice %1 {offsets = [0, 1], sizes = [8, 896], strides = [1, 1]} : vector<8x1152xbf16> to vector<8x896xbf16>
    %cst_7 = arith.constant dense<0.000000e+00> : vector<8x896xf32>
    %9 = tpu.matmul %7, %8, %cst_7 {dimension_numbers = #tpu.dot_dimension_numbers<[1], [0], [0], [1], [0, 0, 1, 1], [], []>} : vector<8x8xbf16>, vector<8x896xbf16>, vector<8x896xf32> -> vector<8x896xf32>
    %10 = arith.addf %5, %9 : vector<8x896xf32>
    %c2 = arith.constant 2 : index
    %c0_8 = arith.constant 0 : index
    %c0_9 = arith.constant 0 : index
    %11 = vector.load %arg3[%c2, %c0_8, %c0_9] : memref<27x8x8xbf16, #tpu.memory_space<vmem>>, vector<1x8x8xbf16>
    %12 = vector.shape_cast %11 : vector<1x8x8xbf16> to vector<8x8xbf16>
    %13 = vector.extract_strided_slice %1 {offsets = [0, 2], sizes = [8, 896], strides = [1, 1]} : vector<8x1152xbf16> to vector<8x896xbf16>
    %cst_10 = arith.constant dense<0.000000e+00> : vector<8x896xf32>
    %14 = tpu.matmul %12, %13, %cst_10 {dimension_numbers = #tpu.dot_dimension_numbers<[1], [0], [0], [1], [0, 0, 1, 1], [], []>} : vector<8x8xbf16>, vector<8x896xbf16>, vector<8x896xf32> -> vector<8x896xf32>
    %15 = arith.addf %10, %14 : vector<8x896xf32>
    %c3 = arith.constant 3 : index
    %c0_11 = arith.constant 0 : index
    %c0_12 = arith.constant 0 : index
    %16 = vector.load %arg3[%c3, %c0_11, %c0_12] : memref<27x8x8xbf16, #tpu.memory_space<vmem>>, vector<1x8x8xbf16>
    %17 = vector.shape_cast %16 : vector<1x8x8xbf16> to vector<8x8xbf16>
    %18 = vector.extract_strided_slice %1 {offsets = [0, 10], sizes = [8, 896], strides = [1, 1]} : vector<8x1152xbf16> to vector<8x896xbf16>
    %cst_13 = arith.constant dense<0.000000e+00> : vector<8x896xf32>
    %19 = tpu.matmul %17, %18, %cst_13 {dimension_numbers = #tpu.dot_dimension_numbers<[1], [0], [0], [1], [0, 0, 1, 1], [], []>} : vector<8x8xbf16>, vector<8x896xbf16>, vector<8x896xf32> -> vector<8x896xf32>
    %20 = arith.addf %15, %19 : vector<8x896xf32>
    %c4 = arith.constant 4 : index
    %c0_14 = arith.constant 0 : index
    %c0_15 = arith.constant 0 : index
    %21 = vector.load %arg3[%c4, %c0_14, %c0_15] : memref<27x8x8xbf16, #tpu.memory_space<vmem>>, vector<1x8x8xbf16>
    %22 = vector.shape_cast %21 : vector<1x8x8xbf16> to vector<8x8xbf16>
    %23 = vector.extract_strided_slice %1 {offsets = [0, 11], sizes = [8, 896], strides = [1, 1]} : vector<8x1152xbf16> to vector<8x896xbf16>
    %cst_16 = arith.constant dense<0.000000e+00> : vector<8x896xf32>
    %24 = tpu.matmul %22, %23, %cst_16 {dimension_numbers = #tpu.dot_dimension_numbers<[1], [0], [0], [1], [0, 0, 1, 1], [], []>} : vector<8x8xbf16>, vector<8x896xbf16>, vector<8x896xf32> -> vector<8x896xf32>
    %25 = arith.addf %20, %24 : vector<8x896xf32>
    %c5 = arith.constant 5 : index
    %c0_17 = arith.constant 0 : index
    %c0_18 = arith.constant 0 : index
    %26 = vector.load %arg3[%c5, %c0_17, %c0_18] : memref<27x8x8xbf16, #tpu.memory_space<vmem>>, vector<1x8x8xbf16>
    %27 = vector.shape_cast %26 : vector<1x8x8xbf16> to vector<8x8xbf16>
    %28 = vector.extract_strided_slice %1 {offsets = [0, 12], sizes = [8, 896], strides = [1, 1]} : vector<8x1152xbf16> to vector<8x896xbf16>
    %cst_19 = arith.constant dense<0.000000e+00> : vector<8x896xf32>
    %29 = tpu.matmul %27, %28, %cst_19 {dimension_numbers = #tpu.dot_dimension_numbers<[1], [0], [0], [1], [0, 0, 1, 1], [], []>} : vector<8x8xbf16>, vector<8x896xbf16>, vector<8x896xf32> -> vector<8x896xf32>
    %30 = arith.addf %25, %29 : vector<8x896xf32>
    %c6 = arith.constant 6 : index
    %c0_20 = arith.constant 0 : index
    %c0_21 = arith.constant 0 : index
    %31 = vector.load %arg3[%c6, %c0_20, %c0_21] : memref<27x8x8xbf16, #tpu.memory_space<vmem>>, vector<1x8x8xbf16>
    %32 = vector.shape_cast %31 : vector<1x8x8xbf16> to vector<8x8xbf16>
    %33 = vector.extract_strided_slice %1 {offsets = [0, 20], sizes = [8, 896], strides = [1, 1]} : vector<8x1152xbf16> to vector<8x896xbf16>
    %cst_22 = arith.constant dense<0.000000e+00> : vector<8x896xf32>
    %34 = tpu.matmul %32, %33, %cst_22 {dimension_numbers = #tpu.dot_dimension_numbers<[1], [0], [0], [1], [0, 0, 1, 1], [], []>} : vector<8x8xbf16>, vector<8x896xbf16>, vector<8x896xf32> -> vector<8x896xf32>
    %35 = arith.addf %30, %34 : vector<8x896xf32>
    %c7 = arith.constant 7 : index
    %c0_23 = arith.constant 0 : index
    %c0_24 = arith.constant 0 : index
    %36 = vector.load %arg3[%c7, %c0_23, %c0_24] : memref<27x8x8xbf16, #tpu.memory_space<vmem>>, vector<1x8x8xbf16>
    %37 = vector.shape_cast %36 : vector<1x8x8xbf16> to vector<8x8xbf16>
    %38 = vector.extract_strided_slice %1 {offsets = [0, 21], sizes = [8, 896], strides = [1, 1]} : vector<8x1152xbf16> to vector<8x896xbf16>
    %cst_25 = arith.constant dense<0.000000e+00> : vector<8x896xf32>
    %39 = tpu.matmul %37, %38, %cst_25 {dimension_numbers = #tpu.dot_dimension_numbers<[1], [0], [0], [1], [0, 0, 1, 1], [], []>} : vector<8x8xbf16>, vector<8x896xbf16>, vector<8x896xf32> -> vector<8x896xf32>
    %40 = arith.addf %35, %39 : vector<8x896xf32>
    %c8 = arith.constant 8 : index
    %c0_26 = arith.constant 0 : index
    %c0_27 = arith.constant 0 : index
    %41 = vector.load %arg3[%c8, %c0_26, %c0_27] : memref<27x8x8xbf16, #tpu.memory_space<vmem>>, vector<1x8x8xbf16>
    %42 = vector.shape_cast %41 : vector<1x8x8xbf16> to vector<8x8xbf16>
    %43 = vector.extract_strided_slice %1 {offsets = [0, 22], sizes = [8, 896], strides = [1, 1]} : vector<8x1152xbf16> to vector<8x896xbf16>
    %cst_28 = arith.constant dense<0.000000e+00> : vector<8x896xf32>
    %44 = tpu.matmul %42, %43, %cst_28 {dimension_numbers = #tpu.dot_dimension_numbers<[1], [0], [0], [1], [0, 0, 1, 1], [], []>} : vector<8x8xbf16>, vector<8x896xbf16>, vector<8x896xf32> -> vector<8x896xf32>
    %45 = arith.addf %40, %44 : vector<8x896xf32>
    %c9 = arith.constant 9 : index
    %c0_29 = arith.constant 0 : index
    %c0_30 = arith.constant 0 : index
    %46 = vector.load %arg3[%c9, %c0_29, %c0_30] : memref<27x8x8xbf16, #tpu.memory_space<vmem>>, vector<1x8x8xbf16>
    %47 = vector.shape_cast %46 : vector<1x8x8xbf16> to vector<8x8xbf16>
    %48 = vector.extract_strided_slice %1 {offsets = [0, 100], sizes = [8, 896], strides = [1, 1]} : vector<8x1152xbf16> to vector<8x896xbf16>
    %cst_31 = arith.constant dense<0.000000e+00> : vector<8x896xf32>
    %49 = tpu.matmul %47, %48, %cst_31 {dimension_numbers = #tpu.dot_dimension_numbers<[1], [0], [0], [1], [0, 0, 1, 1], [], []>} : vector<8x8xbf16>, vector<8x896xbf16>, vector<8x896xf32> -> vector<8x896xf32>
    %50 = arith.addf %45, %49 : vector<8x896xf32>
    %c10 = arith.constant 10 : index
    %c0_32 = arith.constant 0 : index
    %c0_33 = arith.constant 0 : index
    %51 = vector.load %arg3[%c10, %c0_32, %c0_33] : memref<27x8x8xbf16, #tpu.memory_space<vmem>>, vector<1x8x8xbf16>
    %52 = vector.shape_cast %51 : vector<1x8x8xbf16> to vector<8x8xbf16>
    %53 = vector.extract_strided_slice %1 {offsets = [0, 101], sizes = [8, 896], strides = [1, 1]} : vector<8x1152xbf16> to vector<8x896xbf16>
    %cst_34 = arith.constant dense<0.000000e+00> : vector<8x896xf32>
    %54 = tpu.matmul %52, %53, %cst_34 {dimension_numbers = #tpu.dot_dimension_numbers<[1], [0], [0], [1], [0, 0, 1, 1], [], []>} : vector<8x8xbf16>, vector<8x896xbf16>, vector<8x896xf32> -> vector<8x896xf32>
    %55 = arith.addf %50, %54 : vector<8x896xf32>
    %c11 = arith.constant 11 : index
    %c0_35 = arith.constant 0 : index
    %c0_36 = arith.constant 0 : index
    %56 = vector.load %arg3[%c11, %c0_35, %c0_36] : memref<27x8x8xbf16, #tpu.memory_space<vmem>>, vector<1x8x8xbf16>
    %57 = vector.shape_cast %56 : vector<1x8x8xbf16> to vector<8x8xbf16>
    %58 = vector.extract_strided_slice %1 {offsets = [0, 102], sizes = [8, 896], strides = [1, 1]} : vector<8x1152xbf16> to vector<8x896xbf16>
    %cst_37 = arith.constant dense<0.000000e+00> : vector<8x896xf32>
    %59 = tpu.matmul %57, %58, %cst_37 {dimension_numbers = #tpu.dot_dimension_numbers<[1], [0], [0], [1], [0, 0, 1, 1], [], []>} : vector<8x8xbf16>, vector<8x896xbf16>, vector<8x896xf32> -> vector<8x896xf32>
    %60 = arith.addf %55, %59 : vector<8x896xf32>
    %c12 = arith.constant 12 : index
    %c0_38 = arith.constant 0 : index
    %c0_39 = arith.constant 0 : index
    %61 = vector.load %arg3[%c12, %c0_38, %c0_39] : memref<27x8x8xbf16, #tpu.memory_space<vmem>>, vector<1x8x8xbf16>
    %62 = vector.shape_cast %61 : vector<1x8x8xbf16> to vector<8x8xbf16>
    %63 = vector.extract_strided_slice %1 {offsets = [0, 110], sizes = [8, 896], strides = [1, 1]} : vector<8x1152xbf16> to vector<8x896xbf16>
    %cst_40 = arith.constant dense<0.000000e+00> : vector<8x896xf32>
    %64 = tpu.matmul %62, %63, %cst_40 {dimension_numbers = #tpu.dot_dimension_numbers<[1], [0], [0], [1], [0, 0, 1, 1], [], []>} : vector<8x8xbf16>, vector<8x896xbf16>, vector<8x896xf32> -> vector<8x896xf32>
    %65 = arith.addf %60, %64 : vector<8x896xf32>
    %c13 = arith.constant 13 : index
    %c0_41 = arith.constant 0 : index
    %c0_42 = arith.constant 0 : index
    %66 = vector.load %arg3[%c13, %c0_41, %c0_42] : memref<27x8x8xbf16, #tpu.memory_space<vmem>>, vector<1x8x8xbf16>
    %67 = vector.shape_cast %66 : vector<1x8x8xbf16> to vector<8x8xbf16>
    %68 = vector.extract_strided_slice %1 {offsets = [0, 111], sizes = [8, 896], strides = [1, 1]} : vector<8x1152xbf16> to vector<8x896xbf16>
    %cst_43 = arith.constant dense<0.000000e+00> : vector<8x896xf32>
    %69 = tpu.matmul %67, %68, %cst_43 {dimension_numbers = #tpu.dot_dimension_numbers<[1], [0], [0], [1], [0, 0, 1, 1], [], []>} : vector<8x8xbf16>, vector<8x896xbf16>, vector<8x896xf32> -> vector<8x896xf32>
    %70 = arith.addf %65, %69 : vector<8x896xf32>
    %c14 = arith.constant 14 : index
    %c0_44 = arith.constant 0 : index
    %c0_45 = arith.constant 0 : index
    %71 = vector.load %arg3[%c14, %c0_44, %c0_45] : memref<27x8x8xbf16, #tpu.memory_space<vmem>>, vector<1x8x8xbf16>
    %72 = vector.shape_cast %71 : vector<1x8x8xbf16> to vector<8x8xbf16>
    %73 = vector.extract_strided_slice %1 {offsets = [0, 112], sizes = [8, 896], strides = [1, 1]} : vector<8x1152xbf16> to vector<8x896xbf16>
    %cst_46 = arith.constant dense<0.000000e+00> : vector<8x896xf32>
    %74 = tpu.matmul %72, %73, %cst_46 {dimension_numbers = #tpu.dot_dimension_numbers<[1], [0], [0], [1], [0, 0, 1, 1], [], []>} : vector<8x8xbf16>, vector<8x896xbf16>, vector<8x896xf32> -> vector<8x896xf32>
    %75 = arith.addf %70, %74 : vector<8x896xf32>
    %c15 = arith.constant 15 : index
    %c0_47 = arith.constant 0 : index
    %c0_48 = arith.constant 0 : index
    %76 = vector.load %arg3[%c15, %c0_47, %c0_48] : memref<27x8x8xbf16, #tpu.memory_space<vmem>>, vector<1x8x8xbf16>
    %77 = vector.shape_cast %76 : vector<1x8x8xbf16> to vector<8x8xbf16>
    %78 = vector.extract_strided_slice %1 {offsets = [0, 120], sizes = [8, 896], strides = [1, 1]} : vector<8x1152xbf16> to vector<8x896xbf16>
    %cst_49 = arith.constant dense<0.000000e+00> : vector<8x896xf32>
    %79 = tpu.matmul %77, %78, %cst_49 {dimension_numbers = #tpu.dot_dimension_numbers<[1], [0], [0], [1], [0, 0, 1, 1], [], []>} : vector<8x8xbf16>, vector<8x896xbf16>, vector<8x896xf32> -> vector<8x896xf32>
    %80 = arith.addf %75, %79 : vector<8x896xf32>
    %c16 = arith.constant 16 : index
    %c0_50 = arith.constant 0 : index
    %c0_51 = arith.constant 0 : index
    %81 = vector.load %arg3[%c16, %c0_50, %c0_51] : memref<27x8x8xbf16, #tpu.memory_space<vmem>>, vector<1x8x8xbf16>
    %82 = vector.shape_cast %81 : vector<1x8x8xbf16> to vector<8x8xbf16>
    %83 = vector.extract_strided_slice %1 {offsets = [0, 121], sizes = [8, 896], strides = [1, 1]} : vector<8x1152xbf16> to vector<8x896xbf16>
    %cst_52 = arith.constant dense<0.000000e+00> : vector<8x896xf32>
    %84 = tpu.matmul %82, %83, %cst_52 {dimension_numbers = #tpu.dot_dimension_numbers<[1], [0], [0], [1], [0, 0, 1, 1], [], []>} : vector<8x8xbf16>, vector<8x896xbf16>, vector<8x896xf32> -> vector<8x896xf32>
    %85 = arith.addf %80, %84 : vector<8x896xf32>
    %c17 = arith.constant 17 : index
    %c0_53 = arith.constant 0 : index
    %c0_54 = arith.constant 0 : index
    %86 = vector.load %arg3[%c17, %c0_53, %c0_54] : memref<27x8x8xbf16, #tpu.memory_space<vmem>>, vector<1x8x8xbf16>
    %87 = vector.shape_cast %86 : vector<1x8x8xbf16> to vector<8x8xbf16>
    %88 = vector.extract_strided_slice %1 {offsets = [0, 122], sizes = [8, 896], strides = [1, 1]} : vector<8x1152xbf16> to vector<8x896xbf16>
    %cst_55 = arith.constant dense<0.000000e+00> : vector<8x896xf32>
    %89 = tpu.matmul %87, %88, %cst_55 {dimension_numbers = #tpu.dot_dimension_numbers<[1], [0], [0], [1], [0, 0, 1, 1], [], []>} : vector<8x8xbf16>, vector<8x896xbf16>, vector<8x896xf32> -> vector<8x896xf32>
    %90 = arith.addf %85, %89 : vector<8x896xf32>
    %c18 = arith.constant 18 : index
    %c0_56 = arith.constant 0 : index
    %c0_57 = arith.constant 0 : index
    %91 = vector.load %arg3[%c18, %c0_56, %c0_57] : memref<27x8x8xbf16, #tpu.memory_space<vmem>>, vector<1x8x8xbf16>
    %92 = vector.shape_cast %91 : vector<1x8x8xbf16> to vector<8x8xbf16>
    %93 = vector.extract_strided_slice %1 {offsets = [0, 200], sizes = [8, 896], strides = [1, 1]} : vector<8x1152xbf16> to vector<8x896xbf16>
    %cst_58 = arith.constant dense<0.000000e+00> : vector<8x896xf32>
    %94 = tpu.matmul %92, %93, %cst_58 {dimension_numbers = #tpu.dot_dimension_numbers<[1], [0], [0], [1], [0, 0, 1, 1], [], []>} : vector<8x8xbf16>, vector<8x896xbf16>, vector<8x896xf32> -> vector<8x896xf32>
    %95 = arith.addf %90, %94 : vector<8x896xf32>
    %c19 = arith.constant 19 : index
    %c0_59 = arith.constant 0 : index
    %c0_60 = arith.constant 0 : index
    %96 = vector.load %arg3[%c19, %c0_59, %c0_60] : memref<27x8x8xbf16, #tpu.memory_space<vmem>>, vector<1x8x8xbf16>
    %97 = vector.shape_cast %96 : vector<1x8x8xbf16> to vector<8x8xbf16>
    %98 = vector.extract_strided_slice %1 {offsets = [0, 201], sizes = [8, 896], strides = [1, 1]} : vector<8x1152xbf16> to vector<8x896xbf16>
    %cst_61 = arith.constant dense<0.000000e+00> : vector<8x896xf32>
    %99 = tpu.matmul %97, %98, %cst_61 {dimension_numbers = #tpu.dot_dimension_numbers<[1], [0], [0], [1], [0, 0, 1, 1], [], []>} : vector<8x8xbf16>, vector<8x896xbf16>, vector<8x896xf32> -> vector<8x896xf32>
    %100 = arith.addf %95, %99 : vector<8x896xf32>
    %c20 = arith.constant 20 : index
    %c0_62 = arith.constant 0 : index
    %c0_63 = arith.constant 0 : index
    %101 = vector.load %arg3[%c20, %c0_62, %c0_63] : memref<27x8x8xbf16, #tpu.memory_space<vmem>>, vector<1x8x8xbf16>
    %102 = vector.shape_cast %101 : vector<1x8x8xbf16> to vector<8x8xbf16>
    %103 = vector.extract_strided_slice %1 {offsets = [0, 202], sizes = [8, 896], strides = [1, 1]} : vector<8x1152xbf16> to vector<8x896xbf16>
    %cst_64 = arith.constant dense<0.000000e+00> : vector<8x896xf32>
    %104 = tpu.matmul %102, %103, %cst_64 {dimension_numbers = #tpu.dot_dimension_numbers<[1], [0], [0], [1], [0, 0, 1, 1], [], []>} : vector<8x8xbf16>, vector<8x896xbf16>, vector<8x896xf32> -> vector<8x896xf32>
    %105 = arith.addf %100, %104 : vector<8x896xf32>
    %c21 = arith.constant 21 : index
    %c0_65 = arith.constant 0 : index
    %c0_66 = arith.constant 0 : index
    %106 = vector.load %arg3[%c21, %c0_65, %c0_66] : memref<27x8x8xbf16, #tpu.memory_space<vmem>>, vector<1x8x8xbf16>
    %107 = vector.shape_cast %106 : vector<1x8x8xbf16> to vector<8x8xbf16>
    %108 = vector.extract_strided_slice %1 {offsets = [0, 210], sizes = [8, 896], strides = [1, 1]} : vector<8x1152xbf16> to vector<8x896xbf16>
    %cst_67 = arith.constant dense<0.000000e+00> : vector<8x896xf32>
    %109 = tpu.matmul %107, %108, %cst_67 {dimension_numbers = #tpu.dot_dimension_numbers<[1], [0], [0], [1], [0, 0, 1, 1], [], []>} : vector<8x8xbf16>, vector<8x896xbf16>, vector<8x896xf32> -> vector<8x896xf32>
    %110 = arith.addf %105, %109 : vector<8x896xf32>
    %c22 = arith.constant 22 : index
    %c0_68 = arith.constant 0 : index
    %c0_69 = arith.constant 0 : index
    %111 = vector.load %arg3[%c22, %c0_68, %c0_69] : memref<27x8x8xbf16, #tpu.memory_space<vmem>>, vector<1x8x8xbf16>
    %112 = vector.shape_cast %111 : vector<1x8x8xbf16> to vector<8x8xbf16>
    %113 = vector.extract_strided_slice %1 {offsets = [0, 211], sizes = [8, 896], strides = [1, 1]} : vector<8x1152xbf16> to vector<8x896xbf16>
    %cst_70 = arith.constant dense<0.000000e+00> : vector<8x896xf32>
    %114 = tpu.matmul %112, %113, %cst_70 {dimension_numbers = #tpu.dot_dimension_numbers<[1], [0], [0], [1], [0, 0, 1, 1], [], []>} : vector<8x8xbf16>, vector<8x896xbf16>, vector<8x896xf32> -> vector<8x896xf32>
    %115 = arith.addf %110, %114 : vector<8x896xf32>
    %c23 = arith.constant 23 : index
    %c0_71 = arith.constant 0 : index
    %c0_72 = arith.constant 0 : index
    %116 = vector.load %arg3[%c23, %c0_71, %c0_72] : memref<27x8x8xbf16, #tpu.memory_space<vmem>>, vector<1x8x8xbf16>
    %117 = vector.shape_cast %116 : vector<1x8x8xbf16> to vector<8x8xbf16>
    %118 = vector.extract_strided_slice %1 {offsets = [0, 212], sizes = [8, 896], strides = [1, 1]} : vector<8x1152xbf16> to vector<8x896xbf16>
    %cst_73 = arith.constant dense<0.000000e+00> : vector<8x896xf32>
    %119 = tpu.matmul %117, %118, %cst_73 {dimension_numbers = #tpu.dot_dimension_numbers<[1], [0], [0], [1], [0, 0, 1, 1], [], []>} : vector<8x8xbf16>, vector<8x896xbf16>, vector<8x896xf32> -> vector<8x896xf32>
    %120 = arith.addf %115, %119 : vector<8x896xf32>
    %c24 = arith.constant 24 : index
    %c0_74 = arith.constant 0 : index
    %c0_75 = arith.constant 0 : index
    %121 = vector.load %arg3[%c24, %c0_74, %c0_75] : memref<27x8x8xbf16, #tpu.memory_space<vmem>>, vector<1x8x8xbf16>
    %122 = vector.shape_cast %121 : vector<1x8x8xbf16> to vector<8x8xbf16>
    %123 = vector.extract_strided_slice %1 {offsets = [0, 220], sizes = [8, 896], strides = [1, 1]} : vector<8x1152xbf16> to vector<8x896xbf16>
    %cst_76 = arith.constant dense<0.000000e+00> : vector<8x896xf32>
    %124 = tpu.matmul %122, %123, %cst_76 {dimension_numbers = #tpu.dot_dimension_numbers<[1], [0], [0], [1], [0, 0, 1, 1], [], []>} : vector<8x8xbf16>, vector<8x896xbf16>, vector<8x896xf32> -> vector<8x896xf32>
    %125 = arith.addf %120, %124 : vector<8x896xf32>
    %c25 = arith.constant 25 : index
    %c0_77 = arith.constant 0 : index
    %c0_78 = arith.constant 0 : index
    %126 = vector.load %arg3[%c25, %c0_77, %c0_78] : memref<27x8x8xbf16, #tpu.memory_space<vmem>>, vector<1x8x8xbf16>
    %127 = vector.shape_cast %126 : vector<1x8x8xbf16> to vector<8x8xbf16>
    %128 = vector.extract_strided_slice %1 {offsets = [0, 221], sizes = [8, 896], strides = [1, 1]} : vector<8x1152xbf16> to vector<8x896xbf16>
    %cst_79 = arith.constant dense<0.000000e+00> : vector<8x896xf32>
    %129 = tpu.matmul %127, %128, %cst_79 {dimension_numbers = #tpu.dot_dimension_numbers<[1], [0], [0], [1], [0, 0, 1, 1], [], []>} : vector<8x8xbf16>, vector<8x896xbf16>, vector<8x896xf32> -> vector<8x896xf32>
    %130 = arith.addf %125, %129 : vector<8x896xf32>
    %c26 = arith.constant 26 : index
    %c0_80 = arith.constant 0 : index
    %c0_81 = arith.constant 0 : index
    %131 = vector.load %arg3[%c26, %c0_80, %c0_81] : memref<27x8x8xbf16, #tpu.memory_space<vmem>>, vector<1x8x8xbf16>
    %132 = vector.shape_cast %131 : vector<1x8x8xbf16> to vector<8x8xbf16>
    %133 = vector.extract_strided_slice %1 {offsets = [0, 222], sizes = [8, 896], strides = [1, 1]} : vector<8x1152xbf16> to vector<8x896xbf16>
    %cst_82 = arith.constant dense<0.000000e+00> : vector<8x896xf32>
    %134 = tpu.matmul %132, %133, %cst_82 {dimension_numbers = #tpu.dot_dimension_numbers<[1], [0], [0], [1], [0, 0, 1, 1], [], []>} : vector<8x8xbf16>, vector<8x896xbf16>, vector<8x896xf32> -> vector<8x896xf32>
    %135 = arith.addf %130, %134 : vector<8x896xf32>
    %c0_83 = arith.constant 0 : index
    %c0_84 = arith.constant 0 : index
    %136 = vector.load %arg6[%c0_83, %c0_84] : memref<1x896xf32, #tpu.memory_space<vmem>>, vector<1x896xf32>
    %137 = vector.broadcast %136 : vector<1x896xf32> to vector<8x896xf32>
    %138 = arith.mulf %135, %137 : vector<8x896xf32>
    %cst_85 = arith.constant dense<0.000000e+00> : vector<8xf32>
    %139 = vector.multi_reduction <add>, %138, %cst_85 [1] : vector<8x896xf32> to vector<8xf32>
    %140 = vector.shape_cast %139 : vector<8xf32> to vector<8x1xf32>
    %cst_86 = arith.constant 0.001953125 : f32
    %141 = vector.broadcast %cst_86 : f32 to vector<8x1xf32>
    %142 = arith.mulf %140, %141 : vector<8x1xf32>
    %143 = vector.broadcast %142 : vector<8x1xf32> to vector<8x896xf32>
    %144 = arith.subf %135, %143 : vector<8x896xf32>
    %145 = arith.mulf %144, %144 : vector<8x896xf32>
    %146 = vector.broadcast %136 : vector<1x896xf32> to vector<8x896xf32>
    %147 = arith.mulf %145, %146 : vector<8x896xf32>
    %cst_87 = arith.constant dense<0.000000e+00> : vector<8xf32>
    %148 = vector.multi_reduction <add>, %147, %cst_87 [1] : vector<8x896xf32> to vector<8xf32>
    %149 = vector.shape_cast %148 : vector<8xf32> to vector<8x1xf32>
    %cst_88 = arith.constant 0.001953125 : f32
    %150 = vector.broadcast %cst_88 : f32 to vector<8x1xf32>
    %151 = arith.mulf %149, %150 : vector<8x1xf32>
    %cst_89 = arith.constant 9.99999974E-6 : f32
    %152 = vector.broadcast %cst_89 : f32 to vector<8x1xf32>
    %153 = arith.addf %151, %152 : vector<8x1xf32>
    %154 = math.rsqrt %153 : vector<8x1xf32>
    %155 = vector.broadcast %154 : vector<8x1xf32> to vector<8x896xf32>
    %156 = arith.mulf %144, %155 : vector<8x896xf32>
    %c0_90 = arith.constant 0 : index
    %c0_91 = arith.constant 0 : index
    %157 = vector.load %arg4[%c0_90, %c0_91] : memref<8x1xf32, #tpu.memory_space<vmem>>, vector<8x1xf32>
    %158 = vector.broadcast %157 : vector<8x1xf32> to vector<8x896xf32>
    %159 = arith.mulf %158, %156 : vector<8x896xf32>
    %c0_92 = arith.constant 0 : index
    %c0_93 = arith.constant 0 : index
    %160 = vector.load %arg5[%c0_92, %c0_93] : memref<8x1xf32, #tpu.memory_space<vmem>>, vector<8x1xf32>
    %161 = vector.broadcast %160 : vector<8x1xf32> to vector<8x896xf32>
    %162 = arith.addf %159, %161 : vector<8x896xf32>
    %cst_94 = arith.constant 0.000000e+00 : f32
    %163 = vector.broadcast %cst_94 : f32 to vector<8x896xf32>
    %164 = arith.maximumf %162, %163 : vector<8x896xf32>
    %c0_95 = arith.constant 0 : index
    %c0_96 = arith.constant 0 : index
    %c0_97 = arith.constant 0 : index
    %165 = vector.load %arg7[%c0_95, %c0_96, %c0_97] : memref<1x8x896xf32, #tpu.memory_space<vmem>>, vector<1x8x896xf32>
    %166 = vector.shape_cast %165 : vector<1x8x896xf32> to vector<8x896xf32>
    %167 = vector.shape_cast %164 : vector<8x896xf32> to vector<1x8x896xf32>
    tpu.vector_store %arg7[%c0_95, %c0_96, %c0_97], %167 {strides = array<i32>} : memref<1x8x896xf32, #tpu.memory_space<vmem>>, vector<1x8x896xf32>,
    return
  }
  func.func @transform_0(%arg0: i32, %arg1: i32) -> (i32, i32, i32) {
    %c0_i32 = arith.constant 0 : i32
    %c0_i32_0 = arith.constant 0 : i32
    %c0_i32_1 = arith.constant 0 : i32
    return %arg0, %c0_i32, %c0_i32_0 : i32, i32, i32
  }
  func.func @transform_1(%arg0: i32, %arg1: i32) -> (i32, i32, i32) {
    %c0_i32 = arith.constant 0 : i32
    %c0_i32_0 = arith.constant 0 : i32
    %c0_i32_1 = arith.constant 0 : i32
    return %c0_i32, %arg1, %c0_i32_0 : i32, i32, i32
  }
  func.func @transform_2(%arg0: i32, %arg1: i32) -> (i32, i32) {
    %c0_i32 = arith.constant 0 : i32
    %c0_i32_0 = arith.constant 0 : i32
    return %arg1, %c0_i32 : i32, i32
  }
  func.func @transform_3(%arg0: i32, %arg1: i32) -> (i32, i32) {
    %c0_i32 = arith.constant 0 : i32
    %c0_i32_0 = arith.constant 0 : i32
    return %arg1, %c0_i32 : i32, i32
  }
  func.func @transform_4(%arg0: i32, %arg1: i32) -> (i32, i32) {
    %c0_i32 = arith.constant 0 : i32
    %c0_i32_0 = arith.constant 0 : i32
    %c0_i32_1 = arith.constant 0 : i32
    return %c0_i32, %c0_i32_0 : i32, i32
  }
  func.func @transform_5(%arg0: i32, %arg1: i32) -> (i32, i32, i32) {
    %c0_i32 = arith.constant 0 : i32
    %c0_i32_0 = arith.constant 0 : i32
    return %arg0, %arg1, %c0_i32 : i32, i32, i32
  }
}

</mosaic_0001>

<bundles_post_ra>
// kernel: single_conv_forward.1
= control target key start
LH: loop header
LB: loop body
LE: loop exit
PB: predicated region body
PF: predicated region fallthrough
CT: control target
= control target key end

     0   :  { %s7095_s18 = smov 0   ;;  %s7097_s19 = smov 0   ;;  %s8505_s0 = inlined_call_operand.vmem [shape: bf16[2,8,1152], index: 0, kind: input, shape index: {}]   ;;  %s8506_s1 = inlined_call_operand.vmem [shape: bf16[27,8,8], index: 1, kind: input, shape index: {}]   ;;  %s8507_s2 = inlined_call_operand.vmem [shape: f32[8,1], index: 2, kind: input, shape index: {}]   ;;  %s8508_s3 = inlined_call_operand.vmem [shape: f32[8,1], index: 3, kind: input, shape index: {}]   ;;  %s8509_s4 = inlined_call_operand.vmem [shape: f32[1,896], index: 4, kind: input, shape index: {}]   ;;  %s8510_s5 = inlined_call_operand.vmem [shape: f32[2,8,896], index: 5, kind: output, shape index: {}]  }
   0x1   :  { %s7099_s20 = smov 0  }
   0x2 LB: > { %s27_s21 = sadd.s32 1, %s7030_s19  ;;  %p6498_p0 = scmp.ge.s32.totalorder %s7034_s20, 1  ;;  %s7034_s20 = sphi %s7099_s20, %s15_s20   ;;  %s7030_s19 = sphi %s7097_s19, %s8512_s19   ;;  %s7026_s18 = sphi %s7095_s18, %s8511_s18  }
   0x3   : > { %p29_p1 = scmp.ge.s32.totalorder %s27_s21, 2  ;;  %p228_p2 = scmp.lt.s32.totalorder %s7034_s20, 3 }
   0x5   : > { %s8514_s21 = smov (%p29_p1, %s27_s21), 0  ;;  %p229_p3 = pnand %p6498_p0, %p228_p2 }
   0x6   : > { %p272_p4 = scmp.lt.s32.totalorder (!%p229_p3), %s7026_s18, 1  ;;  %s7037_s26 = smov (!%p229_p3), 127  }
   0x7   : > { %232 = sbr.rel (%p229_p3) target bundleno = 1096 (0x448), region = 40  ;;  %s7038_s27 = smov (!%p229_p3), 126  }
   0x8   : > { %s7039_s28 = smov (!%p229_p3), 118   ;;  %s7040_s29 = smov (!%p229_p3), 117  }
   0x9   : > { %s7041_s30 = smov (!%p229_p3), 116   ;;  %s7042_s6 = smov (!%p229_p3), 108  }
   0xa   : > { %s7043_s7 = smov (!%p229_p3), 107   ;;  %s7044_s8 = smov (!%p229_p3), 106  }
   0xb   : > { %s7047_s11 = smov (!%p229_p3), 28   ;;  %s7048_s14 = smov (!%p229_p3), 27  }
   0xc   : > { %s8516_s18 = smov (!%p272_p4, %s7026_s18), 1  ;;  %v7036_v0 = vmov 0   ;;  %vm343_vm0 = vcmask 1039360   ;;  %vm355_vm1 = vcmask 1043456   ;;  %v6501_v20 = vld [vmem:[%s8506_s1 + $0x4] sm:$0xf] }
   0xd   : > { %s6943_s22 = smul.u32 36, %s8516_s18  ;;  %409 = vmatprep.mubr.bf16.mxu0 %v7036_v0  ;;  %450 = vmatprep.mubr.bf16.mxu1 %v7036_v0  ;;  %vm351_vm2 = vcmask 64512   ;;  %v7045_v29 = vmov 0.0   ;;  %vm7046_vm3 = vmmov 0   ;;  %vm745_vm4 = vcmask 1031168   ;;  %s7049_s17 = smov 26  }
   0xe   : > { %6998 = vset.pattern.permute.xlu0 %v7036_v0  ;;  %6999 = vset.pattern.permute.xlu1 %v7036_v0  ;;  %v304_v40 = vld [vmem:[%s8506_s1] sm:$0xf]  ;;  %vm965_vm5 = vcmask 965632   ;;  %v6524_v59 = vld [vmem:[%s8506_s1 + $0x8] sm:$0xf]  ;;  %vm1185_vm6 = vcmask 957440  }
   0xf   : > { %s7121_s25 = scalar_lea.vmem %s8505_s0, %s6943_s22  ;;  %s7050_s24 = smov 18   ;;  %vm1405_vm7 = vcmask 949248   ;;  %vm1625_vm8 = vcmask 883712   ;;  %vm1845_vm9 = vcmask 875520   ;;  %vm2065_vm10 = vcmask 867328  }
  0x10   : > { %v300_v1 = vld [vmem:[%s7121_s25 + $0x8] sm:$0xff]  ;;  %v299_v2 = vld [vmem:[%s7121_s25] sm:$0xff]  ;;  %v301_v7 = vld [vmem:[%s7121_s25 + $0x10] sm:$0xff]  ;;  %s7053_s9 = smov 8   ;;  %s7054_s12 = smov 7   ;;  %vm2285_vm11 = vcmask 228352  }
  0x11   : > { %v7127_v3 = vcombine.low %v300_v1, %v300_v1  ;;  %v7129_v4 = vcombine.low %v299_v2, %v299_v2  ;;  %v7132_v5 = vcombine.high %v299_v2, %v299_v2  ;;  %v7135_v6 = vcombine.high %v300_v1, %v300_v1  ;;  %v302_v10 = vld [vmem:[%s7121_s25 + $0x18] sm:$0xff]  ;;  %s7055_s15 = smov 6   ;;  %s7056_s22 = smov 56  }
  0x12   : > { %v7140_v8 = vcombine.high %v301_v7, %v301_v7  ;;  %v7142_v9 = vcombine.low %v301_v7, %v301_v7  ;;  %v7147_v11 = vcombine.low %v302_v10, %v302_v10  ;;  %v7149_v12 = vcombine.high %v302_v10, %v302_v10  ;;  %s7060_s10 = smov 45   ;;  %s7061_s13 = smov 44  }
  0x13   : > { %331 = vrot.lane.b32.xlu1 %v7127_v3, %s7037_s26  ;;  %327 = vrot.lane.b32.xlu0 %v7129_v4, %s7037_s26  ;;  %v544_v34 = vsel %vm355_vm1, %v7129_v4, 0  ;;  %v550_v37 = vsel %vm355_vm1, %v7127_v3, 0  ;;  %vm2505_vm12 = vcmask 220160   ;;  %vm2725_vm13 = vcmask 211968   ;;  %s7062_s16 = smov 36   ;;  %s7063_s23 = smov 35  }
  0x14   : > { %v556_v41 = vsel %vm355_vm1, %v7142_v9, 0  ;;  %v562_v45 = vsel %vm355_vm1, %v7147_v11, 0  ;;  %vm2945_vm14 = vcmask 146432   ;;  %vm3165_vm15 = vcmask 138240  }
  0x17   : > { %333 = vrot.lane.b32.xlu1 %v7135_v6, %s7037_s26  ;;  %329 = vrot.lane.b32.xlu0 %v7132_v5, %s7037_s26 }
  0x1b   : > { %337 = vrot.lane.b32.xlu1 %v7140_v8, %s7037_s26  ;;  %335 = vrot.lane.b32.xlu0 %v7142_v9, %s7037_s26 }
  0x1f   : > { %341 = vrot.lane.b32.xlu1 %v7149_v12, %s7037_s26  ;;  %339 = vrot.lane.b32.xlu0 %v7147_v11, %s7037_s26  ;;  %s7057_s26 = smov 55  }
  0x23   : > { %729 = vrot.lane.b32.xlu0 %v7129_v4, %s7038_s27  ;;  %731 = vrot.lane.b32.xlu1 %v7132_v5, %s7038_s27 }
  0x27   : > { %733 = vrot.lane.b32.xlu0 %v7127_v3, %s7038_s27  ;;  %735 = vrot.lane.b32.xlu1 %v7135_v6, %s7038_s27 }
  0x2b   : > { %737 = vrot.lane.b32.xlu0 %v7142_v9, %s7038_s27  ;;  %739 = vrot.lane.b32.xlu1 %v7140_v8, %s7038_s27 }
  0x2f   : > { %741 = vrot.lane.b32.xlu0 %v7147_v11, %s7038_s27  ;;  %743 = vrot.lane.b32.xlu1 %v7149_v12, %s7038_s27  ;;  %s7064_s27 = smov 34  }
  0x33   : > { %949 = vrot.lane.b32.xlu0 %v7129_v4, %s7039_s28  ;;  %951 = vrot.lane.b32.xlu1 %v7132_v5, %s7039_s28 }
  0x37   : > { %953 = vrot.lane.b32.xlu0 %v7127_v3, %s7039_s28  ;;  %955 = vrot.lane.b32.xlu1 %v7135_v6, %s7039_s28 }
  0x3b   : > { %957 = vrot.lane.b32.xlu0 %v7142_v9, %s7039_s28  ;;  %959 = vrot.lane.b32.xlu1 %v7140_v8, %s7039_s28 }
  0x3f   : > { %961 = vrot.lane.b32.xlu0 %v7147_v11, %s7039_s28  ;;  %963 = vrot.lane.b32.xlu1 %v7149_v12, %s7039_s28  ;;  %s7051_s28 = smov 17  }
  0x43   : > { %1169 = vrot.lane.b32.xlu0 %v7129_v4, %s7040_s29  ;;  %1171 = vrot.lane.b32.xlu1 %v7132_v5, %s7040_s29 }
  0x47   : > { %1173 = vrot.lane.b32.xlu0 %v7127_v3, %s7040_s29  ;;  %1175 = vrot.lane.b32.xlu1 %v7135_v6, %s7040_s29 }
  0x4b   : > { %1177 = vrot.lane.b32.xlu0 %v7142_v9, %s7040_s29  ;;  %1179 = vrot.lane.b32.xlu1 %v7140_v8, %s7040_s29 }
  0x4f   : > { %1181 = vrot.lane.b32.xlu0 %v7147_v11, %s7040_s29  ;;  %1183 = vrot.lane.b32.xlu1 %v7149_v12, %s7040_s29  ;;  %s7058_s29 = smov 54  }
  0x53   : > { %1389 = vrot.lane.b32.xlu0 %v7129_v4, %s7041_s30  ;;  %1391 = vrot.lane.b32.xlu1 %v7132_v5, %s7041_s30 }
  0x57   : > { %1393 = vrot.lane.b32.xlu0 %v7127_v3, %s7041_s30  ;;  %1395 = vrot.lane.b32.xlu1 %v7135_v6, %s7041_s30 }
  0x5b   : > { %1397 = vrot.lane.b32.xlu0 %v7142_v9, %s7041_s30  ;;  %1399 = vrot.lane.b32.xlu1 %v7140_v8, %s7041_s30 }
  0x5f   : > { %1401 = vrot.lane.b32.xlu0 %v7147_v11, %s7041_s30  ;;  %1403 = vrot.lane.b32.xlu1 %v7149_v12, %s7041_s30  ;;  %s6944_s30 = smul.u32 56, %s8516_s18 }
  0x63   : > { %1609 = vrot.lane.b32.xlu0 %v7129_v4, %s7042_s6  ;;  %1611 = vrot.lane.b32.xlu1 %v7132_v5, %s7042_s6 }
  0x67   : > { %1613 = vrot.lane.b32.xlu0 %v7127_v3, %s7042_s6  ;;  %1615 = vrot.lane.b32.xlu1 %v7135_v6, %s7042_s6 }
  0x6b   : > { %1617 = vrot.lane.b32.xlu0 %v7142_v9, %s7042_s6  ;;  %1619 = vrot.lane.b32.xlu1 %v7140_v8, %s7042_s6 }
  0x6f   : > { %1621 = vrot.lane.b32.xlu0 %v7147_v11, %s7042_s6  ;;  %1623 = vrot.lane.b32.xlu1 %v7149_v12, %s7042_s6  ;;  %s7052_s6 = smov 16  }
  0x73   : > { %1829 = vrot.lane.b32.xlu0 %v7129_v4, %s7043_s7  ;;  %1831 = vrot.lane.b32.xlu1 %v7132_v5, %s7043_s7 }
  0x77   : > { %1833 = vrot.lane.b32.xlu0 %v7127_v3, %s7043_s7  ;;  %1835 = vrot.lane.b32.xlu1 %v7135_v6, %s7043_s7 }
  0x7b   : > { %1837 = vrot.lane.b32.xlu0 %v7142_v9, %s7043_s7  ;;  %1839 = vrot.lane.b32.xlu1 %v7140_v8, %s7043_s7 }
  0x7f   : > { %1841 = vrot.lane.b32.xlu0 %v7147_v11, %s7043_s7  ;;  %1843 = vrot.lane.b32.xlu1 %v7149_v12, %s7043_s7  ;;  %s7059_s7 = smov 46  }
  0x83   : > { %2049 = vrot.lane.b32.xlu0 %v7129_v4, %s7044_s8  ;;  %2051 = vrot.lane.b32.xlu1 %v7132_v5, %s7044_s8 }
  0x85   : > { %v332_v13 = vpop.permute.xlu1 %331  ;;  %v328_v14 = vpop.permute.xlu0 %327 }
  0x87   : > { %2053 = vrot.lane.b32.xlu0 %v7127_v3, %s7044_s8  ;;  %2055 = vrot.lane.b32.xlu1 %v7135_v6, %s7044_s8 }
  0x89   : > { %v334_v15 = vpop.permute.xlu1 %333  ;;  %v330_v16 = vpop.permute.xlu0 %329 }
  0x8a   : > { %v345_v17 = vsel %vm343_vm0, %v330_v16, %v332_v13  ;;  %v344_v18 = vsel %vm343_vm0, %v328_v14, %v330_v16  ;;  %v346_v21 = vsel %vm343_vm0, %v332_v13, %v334_v15 }
  0x8b   : > { %6510 = vmatprep.subr.msk.bf16.mxu0 %vm355_vm1, %v345_v17  ;;  %v357_v19 = vsel %vm355_vm1, %v344_v18, 0  ;;  %2057 = vrot.lane.b32.xlu0 %v7142_v9, %s7044_s8  ;;  %v363_v25 = vsel %vm355_vm1, %v346_v21, 0 }
  0x8c   : > { %392 = vmatpush1.bf16.msra.mxu0 %v357_v19  ;;  %2059 = vrot.lane.b32.xlu1 %v7140_v8, %s7044_s8 }
  0x8d   : > { %v338_v22 = vpop.permute.xlu1 %337  ;;  %v336_v23 = vpop.permute.xlu0 %335 }
  0x8e   : > { %v347_v24 = vsel %vm343_vm0, %v334_v15, %v336_v23  ;;  %v348_v26 = vsel %vm343_vm0, %v336_v23, %v338_v22 }
  0x8f   : > { %6511 = vmatmul.mubr.msk.bf16.vlgmr.msra.gmra.mxu0 %vm351_vm2, %v6501_v20  ;;  %6512 = vmatprep.subr.msk.bf16.mxu1 %vm355_vm1, %v347_v24  ;;  %v369_v32 = vsel %vm355_vm1, %v348_v26, 0  ;;  %v6532_v24 = vld [vmem:[%s8506_s1 + $0xc] sm:$0xf] }
  0x90   : > { %433 = vmatpush1.bf16.msra.mxu1 %v363_v25  ;;  %491 = vmatprep.mubr.bf16.mxu0 %v7036_v0 }
  0x91   : > { %v342_v27 = vpop.permute.xlu1 %341  ;;  %v340_v28 = vpop.permute.xlu0 %339  ;;  %6781 = vmatprep.subr.bf16.mxu1 %v7045_v29  ;;  %2061 = vrot.lane.b32.xlu0 %v7147_v11, %s7044_s8 }
  0x92   : > { %v350_v30 = vsel %vm343_vm0, %v340_v28, %v342_v27  ;;  %v349_v31 = vsel %vm343_vm0, %v338_v22, %v340_v28  ;;  %2063 = vrot.lane.b32.xlu1 %v7149_v12, %s7044_s8  ;;  %vm3385_vm0 = vcmask 130048   ;;  %s297_s8 = scalar_lea.vmem %s8510_s5, %s6944_s30 }
  0x93   : > { %6513 = vmatmul.mubr.msk.bf16.vlgmr.msra.gmra.mxu1 %vm351_vm2, %v6501_v20  ;;  %6514 = vmatprep.subr.msk.bf16.mxu0 %vm355_vm1, %v349_v31  ;;  %v375_v33 = vsel %vm355_vm1, %v350_v30, 0 }
  0x94   : > { %474 = vmatpush1.bf16.msra.mxu0 %v369_v32  ;;  %6782 = vmatpush3.bf16.msra.mxu1 %v375_v33 }
  0x95   : > { %6783 = vmatprep.mubr.msk.bf16.mxu1 %vm7046_vm3, %v7045_v29  ;;  %6517 = vmatprep.subr.msk.bf16.mxu0 %vm355_vm1, %v7132_v5  ;;  %v730_v35 = vpop.permute.xlu0 %729  ;;  %v732_v36 = vpop.permute.xlu1 %731 }
  0x96   : > { %2269 = vrot.lane.b32.xlu0 %v7129_v4, %s7047_s11  ;;  %6519 = vmatprep.subr.msk.bf16.mxu1 %vm355_vm1, %v7135_v6  ;;  %v746_v48 = vsel %vm745_vm4, %v730_v35, %v732_v36 }
  0x97   : > { %6515 = vmatmul.mubr.msk.bf16.vlgmr.msra.gmra.mxu0 %vm351_vm2, %v6501_v20  ;;  %2271 = vrot.lane.b32.xlu1 %v7132_v5, %s7047_s11  ;;  %v757_v50 = vsel %vm355_vm1, %v746_v48, 0 }
  0x98   : > { %579 = vmatpush1.bf16.msra.mxu0 %v544_v34  ;;  %596 = vmatprep.mubr.bf16.mxu0 %v7036_v0 }
  0x99   : > { %6521 = vmatprep.subr.msk.bf16.mxu0 %vm355_vm1, %v7140_v8  ;;  %v734_v38 = vpop.permute.xlu0 %733  ;;  %v736_v39 = vpop.permute.xlu1 %735 }
  0x9a   : > { %2273 = vrot.lane.b32.xlu0 %v7127_v3, %s7047_s11  ;;  %v747_v44 = vsel %vm745_vm4, %v732_v36, %v734_v38  ;;  %v748_v53 = vsel %vm745_vm4, %v734_v38, %v736_v39 }
  0x9b   : > { %6784 = vmatmul.mubr.msk.bf16.vlgmr.msra.gmra.mxu1 %vm351_vm2, %v6501_v20  ;;  %2275 = vrot.lane.b32.xlu1 %v7135_v6, %s7047_s11  ;;  %v763_v55 = vsel %vm355_vm1, %v748_v53, 0 }
  0x9c   : > { %620 = vmatpush1.bf16.msra.mxu1 %v550_v37  ;;  %637 = vmatprep.mubr.bf16.mxu1 %v7036_v0 }
  0x9d   : > { %6787 = vmatprep.subr.bf16.mxu1 %v7045_v29  ;;  %v738_v42 = vpop.permute.xlu0 %737  ;;  %v740_v43 = vpop.permute.xlu1 %739 }
  0x9e   : > { %2277 = vrot.lane.b32.xlu0 %v7142_v9, %s7047_s11  ;;  %v749_v49 = vsel %vm745_vm4, %v736_v39, %v738_v42  ;;  %v750_v58 = vsel %vm745_vm4, %v738_v42, %v740_v43 }
  0x9f   : > { %6518 = vmatmul.mubr.msk.bf16.vlgmr.msra.gmra.mxu0 %vm351_vm2, %v304_v40  ;;  %2279 = vrot.lane.b32.xlu1 %v7140_v8, %s7047_s11  ;;  %v769_v60 = vsel %vm355_vm1, %v750_v58, 0 }
  0xa0   : > { %661 = vmatpush1.bf16.msra.mxu0 %v556_v41  ;;  %678 = vmatprep.mubr.bf16.mxu0 %v7036_v0 }
  0xa1   : > { %6525 = vmatprep.subr.msk.bf16.mxu0 %vm355_vm1, %v747_v44  ;;  %v742_v46 = vpop.permute.xlu0 %741  ;;  %v744_v47 = vpop.permute.xlu1 %743 }
  0xa2   : > { %2281 = vrot.lane.b32.xlu0 %v7147_v11, %s7047_s11  ;;  %v751_v54 = vsel %vm745_vm4, %v740_v43, %v742_v46  ;;  %v752_v63 = vsel %vm745_vm4, %v742_v46, %v744_v47  ;;  %vm3825_vm4 = vcmask 56320  }
  0xa3   : > { %6520 = vmatmul.mubr.msk.bf16.vlgmr.msra.gmra.mxu1 %vm351_vm2, %v304_v40  ;;  %2283 = vrot.lane.b32.xlu1 %v7149_v12, %s7047_s11  ;;  %v775_v2 = vsel %vm355_vm1, %v752_v63, 0 }
  0xa4   : > { %6788 = vmatpush3.bf16.msra.mxu1 %v562_v45  ;;  %6789 = vmatprep.mubr.msk.bf16.mxu1 %vm7046_vm3, %v7045_v29  ;;  %v6540_v45 = vld [vmem:[%s8506_s1 + $0x10] sm:$0xf] }
  0xa5   : > { %6527 = vmatprep.subr.msk.bf16.mxu1 %vm355_vm1, %v749_v49  ;;  %v950_v51 = vpop.permute.xlu0 %949  ;;  %v952_v52 = vpop.permute.xlu1 %951 }
  0xa6   : > { %2489 = vrot.lane.b32.xlu0 %v7129_v4, %s7048_s14  ;;  %v966_v13 = vsel %vm965_vm5, %v950_v51, %v952_v52 }
  0xa7   : > { %6522 = vmatmul.mubr.msk.bf16.vlgmr.msra.gmra.mxu0 %vm351_vm2, %v304_v40  ;;  %2491 = vrot.lane.b32.xlu1 %v7132_v5, %s7048_s14  ;;  %v977_v15 = vsel %vm355_vm1, %v966_v13, 0 }
  0xa8   : > { %792 = vmatpush1.bf16.msra.mxu0 %v757_v50  ;;  %809 = vmatprep.mubr.bf16.mxu0 %v7036_v0 }
  0xa9   : > { %6529 = vmatprep.subr.msk.bf16.mxu0 %vm355_vm1, %v751_v54  ;;  %v954_v56 = vpop.permute.xlu0 %953  ;;  %v956_v57 = vpop.permute.xlu1 %955 }
  0xaa   : > { %2493 = vrot.lane.b32.xlu0 %v7127_v3, %s7048_s14  ;;  %v967_v1 = vsel %vm965_vm5, %v952_v52, %v954_v56  ;;  %v968_v18 = vsel %vm965_vm5, %v954_v56, %v956_v57 }
  0xab   : > { %6790 = vmatmul.mubr.msk.bf16.vlgmr.msra.gmra.mxu1 %vm351_vm2, %v304_v40  ;;  %2495 = vrot.lane.b32.xlu1 %v7135_v6, %s7048_s14  ;;  %v983_v20 = vsel %vm355_vm1, %v968_v18, 0 }
  0xac   : > { %833 = vmatpush1.bf16.msra.mxu1 %v763_v55  ;;  %850 = vmatprep.mubr.bf16.mxu1 %v7036_v0 }
  0xad   : > { %6793 = vmatprep.subr.bf16.mxu1 %v7045_v29  ;;  %v958_v61 = vpop.permute.xlu0 %957  ;;  %v960_v62 = vpop.permute.xlu1 %959 }
  0xae   : > { %2497 = vrot.lane.b32.xlu0 %v7142_v9, %s7048_s14  ;;  %v969_v14 = vsel %vm965_vm5, %v956_v57, %v958_v61  ;;  %v970_v23 = vsel %vm965_vm5, %v958_v61, %v960_v62 }
  0xaf   : > { %6526 = vmatmul.mubr.msk.bf16.vlgmr.msra.gmra.mxu0 %vm351_vm2, %v6524_v59  ;;  %2499 = vrot.lane.b32.xlu1 %v7140_v8, %s7048_s14  ;;  %v989_v25 = vsel %vm355_vm1, %v970_v23, 0 }
  0xb0   : > { %874 = vmatpush1.bf16.msra.mxu0 %v769_v60  ;;  %891 = vmatprep.mubr.bf16.mxu0 %v7036_v0 }
  0xb1   : > { %6533 = vmatprep.subr.msk.bf16.mxu0 %vm355_vm1, %v967_v1  ;;  %v962_v7 = vpop.permute.xlu0 %961  ;;  %v964_v10 = vpop.permute.xlu1 %963 }
  0xb2   : > { %2501 = vrot.lane.b32.xlu0 %v7147_v11, %s7048_s14  ;;  %v971_v19 = vsel %vm965_vm5, %v960_v62, %v962_v7  ;;  %v972_v28 = vsel %vm965_vm5, %v962_v7, %v964_v10  ;;  %vm4045_vm5 = vcmask 48128  }
  0xb3   : > { %6528 = vmatmul.mubr.msk.bf16.vlgmr.msra.gmra.mxu1 %vm351_vm2, %v6524_v59  ;;  %2503 = vrot.lane.b32.xlu1 %v7149_v12, %s7048_s14  ;;  %v995_v31 = vsel %vm355_vm1, %v972_v28, 0 }
  0xb4   : > { %6794 = vmatpush3.bf16.msra.mxu1 %v775_v2  ;;  %6795 = vmatprep.mubr.msk.bf16.mxu1 %vm7046_vm3, %v7045_v29  ;;  %v6548_v2 = vld [vmem:[%s8506_s1 + $0x14] sm:$0xf] }
  0xb5   : > { %6535 = vmatprep.subr.msk.bf16.mxu1 %vm355_vm1, %v969_v14  ;;  %v1170_v16 = vpop.permute.xlu0 %1169  ;;  %v1172_v17 = vpop.permute.xlu1 %1171 }
  0xb6   : > { %2709 = vrot.lane.b32.xlu0 %v7129_v4, %s7049_s17  ;;  %v1186_v34 = vsel %vm1185_vm6, %v1170_v16, %v1172_v17 }
  0xb7   : > { %6530 = vmatmul.mubr.msk.bf16.vlgmr.msra.gmra.mxu0 %vm351_vm2, %v6524_v59  ;;  %2711 = vrot.lane.b32.xlu1 %v7132_v5, %s7049_s17  ;;  %v1197_v36 = vsel %vm355_vm1, %v1186_v34, 0 }
  0xb8   : > { %1012 = vmatpush1.bf16.msra.mxu0 %v977_v15  ;;  %1029 = vmatprep.mubr.bf16.mxu0 %v7036_v0 }
  0xb9   : > { %6537 = vmatprep.subr.msk.bf16.mxu0 %vm355_vm1, %v971_v19  ;;  %v1174_v21 = vpop.permute.xlu0 %1173  ;;  %v1176_v22 = vpop.permute.xlu1 %1175 }
  0xba   : > { %2713 = vrot.lane.b32.xlu0 %v7127_v3, %s7049_s17  ;;  %v1187_v30 = vsel %vm1185_vm6, %v1172_v17, %v1174_v21  ;;  %v1188_v39 = vsel %vm1185_vm6, %v1174_v21, %v1176_v22 }
  0xbb   : > { %6796 = vmatmul.mubr.msk.bf16.vlgmr.msra.gmra.mxu1 %vm351_vm2, %v6524_v59  ;;  %2715 = vrot.lane.b32.xlu1 %v7135_v6, %s7049_s17  ;;  %v1203_v41 = vsel %vm355_vm1, %v1188_v39, 0 }
  0xbc   : > { %1053 = vmatpush1.bf16.msra.mxu1 %v983_v20  ;;  %1070 = vmatprep.mubr.bf16.mxu1 %v7036_v0 }
  0xbd   : > { %6799 = vmatprep.subr.bf16.mxu1 %v7045_v29  ;;  %v1178_v26 = vpop.permute.xlu0 %1177  ;;  %v1180_v27 = vpop.permute.xlu1 %1179 }
  0xbe   : > { %2717 = vrot.lane.b32.xlu0 %v7142_v9, %s7049_s17  ;;  %v1189_v35 = vsel %vm1185_vm6, %v1176_v22, %v1178_v26  ;;  %v1190_v44 = vsel %vm1185_vm6, %v1178_v26, %v1180_v27 }
  0xbf   : > { %6534 = vmatmul.mubr.msk.bf16.vlgmr.msra.gmra.mxu0 %vm351_vm2, %v6532_v24  ;;  %2719 = vrot.lane.b32.xlu1 %v7140_v8, %s7049_s17  ;;  %v1209_v46 = vsel %vm355_vm1, %v1190_v44, 0 }
  0xc0   : > { %1094 = vmatpush1.bf16.msra.mxu0 %v989_v25  ;;  %1111 = vmatprep.mubr.bf16.mxu0 %v7036_v0 }
  0xc1   : > { %6541 = vmatprep.subr.msk.bf16.mxu0 %vm355_vm1, %v1187_v30  ;;  %v1182_v32 = vpop.permute.xlu0 %1181  ;;  %v1184_v33 = vpop.permute.xlu1 %1183 }
  0xc2   : > { %2721 = vrot.lane.b32.xlu0 %v7147_v11, %s7049_s17  ;;  %v1191_v40 = vsel %vm1185_vm6, %v1180_v27, %v1182_v32  ;;  %v1192_v49 = vsel %vm1185_vm6, %v1182_v32, %v1184_v33  ;;  %vm4268_vm6 = vcmask 457728  }
  0xc3   : > { %6536 = vmatmul.mubr.msk.bf16.vlgmr.msra.gmra.mxu1 %vm351_vm2, %v6532_v24  ;;  %2723 = vrot.lane.b32.xlu1 %v7149_v12, %s7049_s17  ;;  %v1215_v51 = vsel %vm355_vm1, %v1192_v49, 0 }
  0xc4   : > { %6800 = vmatpush3.bf16.msra.mxu1 %v995_v31  ;;  %6801 = vmatprep.mubr.msk.bf16.mxu1 %vm7046_vm3, %v7045_v29  ;;  %v6556_v31 = vld [vmem:[%s8506_s1 + $0x18] sm:$0xf] }
  0xc5   : > { %6543 = vmatprep.subr.msk.bf16.mxu1 %vm355_vm1, %v1189_v35  ;;  %v1390_v37 = vpop.permute.xlu0 %1389  ;;  %v1392_v38 = vpop.permute.xlu1 %1391 }
  0xc6   : > { %2929 = vrot.lane.b32.xlu0 %v7129_v4, %s7050_s24  ;;  %v1406_v54 = vsel %vm1405_vm7, %v1390_v37, %v1392_v38 }
  0xc7   : > { %6538 = vmatmul.mubr.msk.bf16.vlgmr.msra.gmra.mxu0 %vm351_vm2, %v6532_v24  ;;  %2931 = vrot.lane.b32.xlu1 %v7132_v5, %s7050_s24  ;;  %v1417_v56 = vsel %vm355_vm1, %v1406_v54, 0 }
  0xc8   : > { %1232 = vmatpush1.bf16.msra.mxu0 %v1197_v36  ;;  %1249 = vmatprep.mubr.bf16.mxu0 %v7036_v0 }
  0xc9   : > { %6545 = vmatprep.subr.msk.bf16.mxu0 %vm355_vm1, %v1191_v40  ;;  %v1394_v42 = vpop.permute.xlu0 %1393  ;;  %v1396_v43 = vpop.permute.xlu1 %1395 }
  0xca   : > { %2933 = vrot.lane.b32.xlu0 %v7127_v3, %s7050_s24  ;;  %v1407_v50 = vsel %vm1405_vm7, %v1392_v38, %v1394_v42  ;;  %v1408_v59 = vsel %vm1405_vm7, %v1394_v42, %v1396_v43 }
  0xcb   : > { %6802 = vmatmul.mubr.msk.bf16.vlgmr.msra.gmra.mxu1 %vm351_vm2, %v6532_v24  ;;  %2935 = vrot.lane.b32.xlu1 %v7135_v6, %s7050_s24  ;;  %v1423_v61 = vsel %vm355_vm1, %v1408_v59, 0 }
  0xcc   : > { %1273 = vmatpush1.bf16.msra.mxu1 %v1203_v41  ;;  %1290 = vmatprep.mubr.bf16.mxu1 %v7036_v0 }
  0xcd   : > { %6805 = vmatprep.subr.bf16.mxu1 %v7045_v29  ;;  %v1398_v47 = vpop.permute.xlu0 %1397  ;;  %v1400_v48 = vpop.permute.xlu1 %1399 }
  0xce   : > { %2937 = vrot.lane.b32.xlu0 %v7142_v9, %s7050_s24  ;;  %v1409_v55 = vsel %vm1405_vm7, %v1396_v43, %v1398_v47  ;;  %v1410_v1 = vsel %vm1405_vm7, %v1398_v47, %v1400_v48 }
  0xcf   : > { %6542 = vmatmul.mubr.msk.bf16.vlgmr.msra.gmra.mxu0 %vm351_vm2, %v6540_v45  ;;  %2939 = vrot.lane.b32.xlu1 %v7140_v8, %s7050_s24  ;;  %v1429_v7 = vsel %vm355_vm1, %v1410_v1, 0 }
  0xd0   : > { %1314 = vmatpush1.bf16.msra.mxu0 %v1209_v46  ;;  %1331 = vmatprep.mubr.bf16.mxu0 %v7036_v0 }
  0xd1   : > { %6549 = vmatprep.subr.msk.bf16.mxu0 %vm355_vm1, %v1407_v50  ;;  %v1402_v52 = vpop.permute.xlu0 %1401  ;;  %v1404_v53 = vpop.permute.xlu1 %1403 }
  0xd2   : > { %2941 = vrot.lane.b32.xlu0 %v7147_v11, %s7050_s24  ;;  %v1411_v60 = vsel %vm1405_vm7, %v1400_v48, %v1402_v52  ;;  %v1412_v14 = vsel %vm1405_vm7, %v1402_v52, %v1404_v53  ;;  %vm4488_vm7 = vcmask 449536  }
  0xd3   : > { %6544 = vmatmul.mubr.msk.bf16.vlgmr.msra.gmra.mxu1 %vm351_vm2, %v6540_v45  ;;  %2943 = vrot.lane.b32.xlu1 %v7149_v12, %s7050_s24  ;;  %v1435_v16 = vsel %vm355_vm1, %v1412_v14, 0  ;;  %v6572_v14 = vld [vmem:[%s8506_s1 + $0x20] sm:$0xf] }
  0xd4   : > { %6806 = vmatpush3.bf16.msra.mxu1 %v1215_v51  ;;  %6807 = vmatprep.mubr.msk.bf16.mxu1 %vm7046_vm3, %v7045_v29  ;;  %v6564_v51 = vld [vmem:[%s8506_s1 + $0x1c] sm:$0xf] }
  0xd5   : > { %6551 = vmatprep.subr.msk.bf16.mxu1 %vm355_vm1, %v1409_v55  ;;  %v1610_v57 = vpop.permute.xlu0 %1609  ;;  %v1612_v58 = vpop.permute.xlu1 %1611 }
  0xd6   : > { %3149 = vrot.lane.b32.xlu0 %v7129_v4, %s7051_s28  ;;  %v1626_v19 = vsel %vm1625_vm8, %v1610_v57, %v1612_v58 }
  0xd7   : > { %6546 = vmatmul.mubr.msk.bf16.vlgmr.msra.gmra.mxu0 %vm351_vm2, %v6540_v45  ;;  %3151 = vrot.lane.b32.xlu1 %v7132_v5, %s7051_s28  ;;  %v1637_v21 = vsel %vm355_vm1, %v1626_v19, 0 }
  0xd8   : > { %1452 = vmatpush1.bf16.msra.mxu0 %v1417_v56  ;;  %1469 = vmatprep.mubr.bf16.mxu0 %v7036_v0 }
  0xd9   : > { %6553 = vmatprep.subr.msk.bf16.mxu0 %vm355_vm1, %v1411_v60  ;;  %v1614_v62 = vpop.permute.xlu0 %1613  ;;  %v1616_v63 = vpop.permute.xlu1 %1615 }
  0xda   : > { %3153 = vrot.lane.b32.xlu0 %v7127_v3, %s7051_s28  ;;  %v1627_v15 = vsel %vm1625_vm8, %v1612_v58, %v1614_v62  ;;  %v1628_v24 = vsel %vm1625_vm8, %v1614_v62, %v1616_v63 }
  0xdb   : > { %6808 = vmatmul.mubr.msk.bf16.vlgmr.msra.gmra.mxu1 %vm351_vm2, %v6540_v45  ;;  %3155 = vrot.lane.b32.xlu1 %v7135_v6, %s7051_s28  ;;  %v1643_v26 = vsel %vm355_vm1, %v1628_v24, 0 }
  0xdc   : > { %1493 = vmatpush1.bf16.msra.mxu1 %v1423_v61  ;;  %1510 = vmatprep.mubr.bf16.mxu1 %v7036_v0 }
  0xdd   : > { %6811 = vmatprep.subr.bf16.mxu1 %v7045_v29  ;;  %v1618_v10 = vpop.permute.xlu0 %1617  ;;  %v1620_v13 = vpop.permute.xlu1 %1619 }
  0xde   : > { %3157 = vrot.lane.b32.xlu0 %v7142_v9, %s7051_s28  ;;  %v1629_v20 = vsel %vm1625_vm8, %v1616_v63, %v1618_v10  ;;  %v1630_v30 = vsel %vm1625_vm8, %v1618_v10, %v1620_v13 }
  0xdf   : > { %6550 = vmatmul.mubr.msk.bf16.vlgmr.msra.gmra.mxu0 %vm351_vm2, %v6548_v2  ;;  %3159 = vrot.lane.b32.xlu1 %v7140_v8, %s7051_s28  ;;  %v1649_v32 = vsel %vm355_vm1, %v1630_v30, 0 }
  0xe0   : > { %1534 = vmatpush1.bf16.msra.mxu0 %v1429_v7  ;;  %1551 = vmatprep.mubr.bf16.mxu0 %v7036_v0 }
  0xe1   : > { %6557 = vmatprep.subr.msk.bf16.mxu0 %vm355_vm1, %v1627_v15  ;;  %v1622_v17 = vpop.permute.xlu0 %1621  ;;  %v1624_v18 = vpop.permute.xlu1 %1623 }
  0xe2   : > { %3161 = vrot.lane.b32.xlu0 %v7147_v11, %s7051_s28  ;;  %v1631_v25 = vsel %vm1625_vm8, %v1620_v13, %v1622_v17  ;;  %v1632_v35 = vsel %vm1625_vm8, %v1622_v17, %v1624_v18  ;;  %vm4708_vm8 = vcmask 441344  }
  0xe3   : > { %6552 = vmatmul.mubr.msk.bf16.vlgmr.msra.gmra.mxu1 %vm351_vm2, %v6548_v2  ;;  %3163 = vrot.lane.b32.xlu1 %v7149_v12, %s7051_s28  ;;  %v1655_v37 = vsel %vm355_vm1, %v1632_v35, 0 }
  0xe4   : > { %6812 = vmatpush3.bf16.msra.mxu1 %v1435_v16  ;;  %6813 = vmatprep.mubr.msk.bf16.mxu1 %vm7046_vm3, %v7045_v29 }
  0xe5   : > { %6559 = vmatprep.subr.msk.bf16.mxu1 %vm355_vm1, %v1629_v20  ;;  %v1830_v22 = vpop.permute.xlu0 %1829  ;;  %v1832_v23 = vpop.permute.xlu1 %1831 }
  0xe6   : > { %3369 = vrot.lane.b32.xlu0 %v7129_v4, %s7052_s6  ;;  %v1846_v40 = vsel %vm1845_vm9, %v1830_v22, %v1832_v23 }
  0xe7   : > { %6554 = vmatmul.mubr.msk.bf16.vlgmr.msra.gmra.mxu0 %vm351_vm2, %v6548_v2  ;;  %3371 = vrot.lane.b32.xlu1 %v7132_v5, %s7052_s6  ;;  %v1857_v42 = vsel %vm355_vm1, %v1846_v40, 0 }
  0xe8   : > { %1672 = vmatpush1.bf16.msra.mxu0 %v1637_v21  ;;  %1689 = vmatprep.mubr.bf16.mxu0 %v7036_v0 }
  0xe9   : > { %6561 = vmatprep.subr.msk.bf16.mxu0 %vm355_vm1, %v1631_v25  ;;  %v1834_v27 = vpop.permute.xlu0 %1833  ;;  %v1836_v28 = vpop.permute.xlu1 %1835 }
  0xea   : > { %3373 = vrot.lane.b32.xlu0 %v7127_v3, %s7052_s6  ;;  %v1847_v36 = vsel %vm1845_vm9, %v1832_v23, %v1834_v27  ;;  %v1848_v45 = vsel %vm1845_vm9, %v1834_v27, %v1836_v28 }
  0xeb   : > { %6814 = vmatmul.mubr.msk.bf16.vlgmr.msra.gmra.mxu1 %vm351_vm2, %v6548_v2  ;;  %3375 = vrot.lane.b32.xlu1 %v7135_v6, %s7052_s6  ;;  %v1863_v47 = vsel %vm355_vm1, %v1848_v45, 0 }
  0xec   : > { %1713 = vmatpush1.bf16.msra.mxu1 %v1643_v26  ;;  %1730 = vmatprep.mubr.bf16.mxu1 %v7036_v0 }
  0xed   : > { %6817 = vmatprep.subr.bf16.mxu1 %v7045_v29  ;;  %v1838_v33 = vpop.permute.xlu0 %1837  ;;  %v1840_v34 = vpop.permute.xlu1 %1839 }
  0xee   : > { %3377 = vrot.lane.b32.xlu0 %v7142_v9, %s7052_s6  ;;  %v1849_v41 = vsel %vm1845_vm9, %v1836_v28, %v1838_v33  ;;  %v1850_v50 = vsel %vm1845_vm9, %v1838_v33, %v1840_v34 }
  0xef   : > { %6558 = vmatmul.mubr.msk.bf16.vlgmr.msra.gmra.mxu0 %vm351_vm2, %v6556_v31  ;;  %3379 = vrot.lane.b32.xlu1 %v7140_v8, %s7052_s6  ;;  %v1869_v52 = vsel %vm355_vm1, %v1850_v50, 0 }
  0xf0   : > { %1754 = vmatpush1.bf16.msra.mxu0 %v1649_v32  ;;  %1771 = vmatprep.mubr.bf16.mxu0 %v7036_v0 }
  0xf1   : > { %6565 = vmatprep.subr.msk.bf16.mxu0 %vm355_vm1, %v1847_v36  ;;  %v1842_v38 = vpop.permute.xlu0 %1841  ;;  %v1844_v39 = vpop.permute.xlu1 %1843 }
  0xf2   : > { %3381 = vrot.lane.b32.xlu0 %v7147_v11, %s7052_s6  ;;  %v1851_v46 = vsel %vm1845_vm9, %v1840_v34, %v1842_v38  ;;  %v1852_v54 = vsel %vm1845_vm9, %v1842_v38, %v1844_v39  ;;  %vm4928_vm9 = vcmask 375808  }
  0xf3   : > { %6560 = vmatmul.mubr.msk.bf16.vlgmr.msra.gmra.mxu1 %vm351_vm2, %v6556_v31  ;;  %3383 = vrot.lane.b32.xlu1 %v7149_v12, %s7052_s6  ;;  %v1875_v57 = vsel %vm355_vm1, %v1852_v54, 0  ;;  %v6588_v54 = vld [vmem:[%s8506_s1 + $0x28] sm:$0xf] }
  0xf4   : > { %6818 = vmatpush3.bf16.msra.mxu1 %v1655_v37  ;;  %6819 = vmatprep.mubr.msk.bf16.mxu1 %vm7046_vm3, %v7045_v29 }
  0xf5   : > { %6567 = vmatprep.subr.msk.bf16.mxu1 %vm355_vm1, %v1849_v41  ;;  %v2050_v43 = vpop.permute.xlu0 %2049  ;;  %v2052_v44 = vpop.permute.xlu1 %2051 }
  0xf6   : > { %3589 = vrot.lane.b32.xlu0 %v7129_v4, %s7053_s9  ;;  %v2066_v58 = vsel %vm2065_vm10, %v2050_v43, %v2052_v44 }
  0xf7   : > { %6562 = vmatmul.mubr.msk.bf16.vlgmr.msra.gmra.mxu0 %vm351_vm2, %v6556_v31  ;;  %3591 = vrot.lane.b32.xlu1 %v7132_v5, %s7053_s9  ;;  %v2077_v62 = vsel %vm355_vm1, %v2066_v58, 0 }
  0xf8   : > { %1892 = vmatpush1.bf16.msra.mxu0 %v1857_v42  ;;  %1909 = vmatprep.mubr.bf16.mxu0 %v7036_v0 }
  0xf9   : > { %6569 = vmatprep.subr.msk.bf16.mxu0 %vm355_vm1, %v1851_v46  ;;  %v2054_v48 = vpop.permute.xlu0 %2053  ;;  %v2056_v49 = vpop.permute.xlu1 %2055 }
  0xfa   : > { %3593 = vrot.lane.b32.xlu0 %v7127_v3, %s7053_s9  ;;  %v2067_v55 = vsel %vm2065_vm10, %v2052_v44, %v2054_v48  ;;  %v2068_v63 = vsel %vm2065_vm10, %v2054_v48, %v2056_v49 }
  0xfb   : > { %6820 = vmatmul.mubr.msk.bf16.vlgmr.msra.gmra.mxu1 %vm351_vm2, %v6556_v31  ;;  %3595 = vrot.lane.b32.xlu1 %v7135_v6, %s7053_s9  ;;  %v2083_v7 = vsel %vm355_vm1, %v2068_v63, 0 }
  0xfc   : > { %1933 = vmatpush1.bf16.msra.mxu1 %v1863_v47  ;;  %1950 = vmatprep.mubr.bf16.mxu1 %v7036_v0 }
  0xfd   : > { %6823 = vmatprep.subr.bf16.mxu1 %v7045_v29  ;;  %v2058_v53 = vpop.permute.xlu0 %2057 }
  0xfe   : > { %3597 = vrot.lane.b32.xlu0 %v7142_v9, %s7053_s9  ;;  %v2060_v56 = vpop.permute.xlu1 %2059  ;;  %v2069_v59 = vsel %vm2065_vm10, %v2056_v49, %v2058_v53 }
  0xff   : > { %6566 = vmatmul.mubr.msk.bf16.vlgmr.msra.gmra.mxu0 %vm351_vm2, %v6564_v51  ;;  %3599 = vrot.lane.b32.xlu1 %v7140_v8, %s7053_s9  ;;  %v2070_v13 = vsel %vm2065_vm10, %v2058_v53, %v2060_v56 }
 0x100   : > { %1974 = vmatpush1.bf16.msra.mxu0 %v1869_v52  ;;  %1991 = vmatprep.mubr.bf16.mxu0 %v7036_v0  ;;  %v2089_v16 = vsel %vm355_vm1, %v2070_v13, 0 }
 0x101   : > { %6573 = vmatprep.subr.msk.bf16.mxu0 %vm355_vm1, %v2067_v55 }
 0x102   : > { %3601 = vrot.lane.b32.xlu0 %v7147_v11, %s7053_s9 }
 0x103   : > { %6568 = vmatmul.mubr.msk.bf16.vlgmr.msra.gmra.mxu1 %vm351_vm2, %v6564_v51  ;;  %v2062_v60 = vpop.permute.xlu0 %2061  ;;  %3603 = vrot.lane.b32.xlu1 %v7149_v12, %s7053_s9 }
 0x104   : > { %6824 = vmatpush3.bf16.msra.mxu1 %v1875_v57  ;;  %6825 = vmatprep.mubr.msk.bf16.mxu1 %vm7046_vm3, %v7045_v29  ;;  %v2064_v61 = vpop.permute.xlu1 %2063  ;;  %v2071_v1 = vsel %vm2065_vm10, %v2060_v56, %v2062_v60 }
 0x105   : > { %6575 = vmatprep.subr.msk.bf16.mxu1 %vm355_vm1, %v2069_v59  ;;  %v2072_v18 = vsel %vm2065_vm10, %v2062_v60, %v2064_v61  ;;  %v7663_v60 = vld [vmem:[%s7121_s25 + $0x20] ss:$0 sps:$4 sm:$0xff]   ;;  %vm5148_vm10 = vcmask 367616  }
 0x106   : > { %3809 = vrot.lane.b32.xlu0 %v7129_v4, %s7054_s12  ;;  %v2095_v21 = vsel %vm355_vm1, %v2072_v18, 0 }
 0x107   : > { %6570 = vmatmul.mubr.msk.bf16.vlgmr.msra.gmra.mxu0 %vm351_vm2, %v6564_v51  ;;  %3811 = vrot.lane.b32.xlu1 %v7132_v5, %s7054_s12 }
 0x108   : > { %2112 = vmatpush1.bf16.msra.mxu0 %v2077_v62  ;;  %2129 = vmatprep.mubr.bf16.mxu0 %v7036_v0  ;;  %v2270_v2 = vpop.permute.xlu0 %2269 }
 0x109   : > { %6577 = vmatprep.subr.msk.bf16.mxu0 %vm355_vm1, %v2071_v1  ;;  %v2272_v10 = vpop.permute.xlu1 %2271 }
 0x10a   : > { %3813 = vrot.lane.b32.xlu0 %v7127_v3, %s7054_s12  ;;  %v2286_v23 = vsel %vm2285_vm11, %v2270_v2, %v2272_v10 }
 0x10b   : > { %6826 = vmatmul.mubr.msk.bf16.vlgmr.msra.gmra.mxu1 %vm351_vm2, %v6564_v51  ;;  %3815 = vrot.lane.b32.xlu1 %v7135_v6, %s7054_s12  ;;  %v2297_v26 = vsel %vm355_vm1, %v2286_v23, 0 }
 0x10c   : > { %2153 = vmatpush1.bf16.msra.mxu1 %v2083_v7  ;;  %2170 = vmatprep.mubr.bf16.mxu1 %v7036_v0  ;;  %v2274_v15 = vpop.permute.xlu0 %2273 }
 0x10d   : > { %6829 = vmatprep.subr.bf16.mxu1 %v7045_v29  ;;  %v2276_v17 = vpop.permute.xlu1 %2275  ;;  %v2287_v19 = vsel %vm2285_vm11, %v2272_v10, %v2274_v15 }
 0x10e   : > { %3817 = vrot.lane.b32.xlu0 %v7142_v9, %s7054_s12  ;;  %v2288_v28 = vsel %vm2285_vm11, %v2274_v15, %v2276_v17 }
 0x10f   : > { %6574 = vmatmul.mubr.msk.bf16.vlgmr.msra.gmra.mxu0 %vm351_vm2, %v6572_v14  ;;  %3819 = vrot.lane.b32.xlu1 %v7140_v8, %s7054_s12  ;;  %v2303_v32 = vsel %vm355_vm1, %v2288_v28, 0 }
 0x110   : > { %2194 = vmatpush1.bf16.msra.mxu0 %v2089_v16  ;;  %2211 = vmatprep.mubr.bf16.mxu0 %v7036_v0  ;;  %v2278_v20 = vpop.permute.xlu0 %2277 }
 0x111   : > { %6581 = vmatprep.subr.msk.bf16.mxu0 %vm355_vm1, %v2287_v19  ;;  %v2280_v22 = vpop.permute.xlu1 %2279  ;;  %v2289_v24 = vsel %vm2285_vm11, %v2276_v17, %v2278_v20 }
 0x112   : > { %3821 = vrot.lane.b32.xlu0 %v7147_v11, %s7054_s12  ;;  %v2290_v34 = vsel %vm2285_vm11, %v2278_v20, %v2280_v22  ;;  %v6596_v20 = vld [vmem:[%s8506_s1 + $0x2c] sm:$0xf] }
 0x113   : > { %6576 = vmatmul.mubr.msk.bf16.vlgmr.msra.gmra.mxu1 %vm351_vm2, %v6572_v14  ;;  %3823 = vrot.lane.b32.xlu1 %v7149_v12, %s7054_s12  ;;  %v2309_v36 = vsel %vm355_vm1, %v2290_v34, 0 }
 0x114   : > { %6830 = vmatpush3.bf16.msra.mxu1 %v2095_v21  ;;  %6831 = vmatprep.mubr.msk.bf16.mxu1 %vm7046_vm3, %v7045_v29  ;;  %v2282_v25 = vpop.permute.xlu0 %2281 }
 0x115   : > { %6583 = vmatprep.subr.msk.bf16.mxu1 %vm355_vm1, %v2289_v24  ;;  %v2284_v27 = vpop.permute.xlu1 %2283  ;;  %v2291_v30 = vsel %vm2285_vm11, %v2280_v22, %v2282_v25 }
 0x116   : > { %4029 = vrot.lane.b32.xlu0 %v7129_v4, %s7055_s15  ;;  %v6580_v4 = vld [vmem:[%s8506_s1 + $0x24] sm:$0xf]  ;;  %v2292_v38 = vsel %vm2285_vm11, %v2282_v25, %v2284_v27  ;;  %vm5368_vm11 = vcmask 359424  }
 0x117   : > { %6578 = vmatmul.mubr.msk.bf16.vlgmr.msra.gmra.mxu0 %vm351_vm2, %v6572_v14  ;;  %4031 = vrot.lane.b32.xlu1 %v7132_v5, %s7055_s15  ;;  %v2315_v41 = vsel %vm355_vm1, %v2292_v38, 0 }
 0x118   : > { %2332 = vmatpush1.bf16.msra.mxu0 %v2297_v26  ;;  %2349 = vmatprep.mubr.bf16.mxu0 %v7036_v0  ;;  %v2490_v31 = vpop.permute.xlu0 %2489 }
 0x119   : > { %6585 = vmatprep.subr.msk.bf16.mxu0 %vm355_vm1, %v2291_v30  ;;  %v2492_v33 = vpop.permute.xlu1 %2491 }
 0x11a   : > { %4033 = vrot.lane.b32.xlu0 %v7127_v3, %s7055_s15  ;;  %v2506_v43 = vsel %vm2505_vm12, %v2490_v31, %v2492_v33 }
 0x11b   : > { %6832 = vmatmul.mubr.msk.bf16.vlgmr.msra.gmra.mxu1 %vm351_vm2, %v6572_v14  ;;  %4035 = vrot.lane.b32.xlu1 %v7135_v6, %s7055_s15  ;;  %v2517_v46 = vsel %vm355_vm1, %v2506_v43, 0 }
 0x11c   : > { %2373 = vmatpush1.bf16.msra.mxu1 %v2303_v32  ;;  %2390 = vmatprep.mubr.bf16.mxu1 %v7036_v0  ;;  %v2494_v35 = vpop.permute.xlu0 %2493 }
 0x11d   : > { %6835 = vmatprep.subr.bf16.mxu1 %v7045_v29  ;;  %v2496_v37 = vpop.permute.xlu1 %2495  ;;  %v2507_v39 = vsel %vm2505_vm12, %v2492_v33, %v2494_v35 }
 0x11e   : > { %4037 = vrot.lane.b32.xlu0 %v7142_v9, %s7055_s15  ;;  %v2508_v48 = vsel %vm2505_vm12, %v2494_v35, %v2496_v37 }
 0x11f   : > { %6582 = vmatmul.mubr.msk.bf16.vlgmr.msra.gmra.mxu0 %vm351_vm2, %v6580_v4  ;;  %4039 = vrot.lane.b32.xlu1 %v7140_v8, %s7055_s15  ;;  %v2523_v51 = vsel %vm355_vm1, %v2508_v48, 0 }
 0x120   : > { %2414 = vmatpush1.bf16.msra.mxu0 %v2309_v36  ;;  %2431 = vmatprep.mubr.bf16.mxu0 %v7036_v0  ;;  %v2498_v40 = vpop.permute.xlu0 %2497 }
 0x121   : > { %6589 = vmatprep.subr.msk.bf16.mxu0 %vm355_vm1, %v2507_v39  ;;  %v2500_v42 = vpop.permute.xlu1 %2499  ;;  %v2509_v44 = vsel %vm2505_vm12, %v2496_v37, %v2498_v40 }
 0x122   : > { %4041 = vrot.lane.b32.xlu0 %v7147_v11, %s7055_s15  ;;  %v2510_v53 = vsel %vm2505_vm12, %v2498_v40, %v2500_v42  ;;  %v6604_v40 = vld [vmem:[%s8506_s1 + $0x30] sm:$0xf] }
 0x123   : > { %6584 = vmatmul.mubr.msk.bf16.vlgmr.msra.gmra.mxu1 %vm351_vm2, %v6580_v4  ;;  %4043 = vrot.lane.b32.xlu1 %v7149_v12, %s7055_s15  ;;  %v2529_v56 = vsel %vm355_vm1, %v2510_v53, 0 }
 0x124   : > { %6836 = vmatpush3.bf16.msra.mxu1 %v2315_v41  ;;  %6837 = vmatprep.mubr.msk.bf16.mxu1 %vm7046_vm3, %v7045_v29  ;;  %v2502_v45 = vpop.permute.xlu0 %2501 }
 0x125   : > { %6591 = vmatprep.subr.msk.bf16.mxu1 %vm355_vm1, %v2509_v44  ;;  %v2504_v47 = vpop.permute.xlu1 %2503  ;;  %v2511_v49 = vsel %vm2505_vm12, %v2500_v42, %v2502_v45 }
 0x126   : > { %4252 = vrot.lane.b32.xlu0 %v7132_v5, %s7056_s22  ;;  %v2512_v58 = vsel %vm2505_vm12, %v2502_v45, %v2504_v47  ;;  %vm5588_vm12 = vcmask 293888  }
 0x127   : > { %6586 = vmatmul.mubr.msk.bf16.vlgmr.msra.gmra.mxu0 %vm351_vm2, %v6580_v4  ;;  %4254 = vrot.lane.b32.xlu1 %v7127_v3, %s7056_s22  ;;  %v2535_v62 = vsel %vm355_vm1, %v2512_v58, 0 }
 0x128   : > { %2552 = vmatpush1.bf16.msra.mxu0 %v2517_v46  ;;  %2569 = vmatprep.mubr.bf16.mxu0 %v7036_v0  ;;  %v2710_v50 = vpop.permute.xlu0 %2709 }
 0x129   : > { %6593 = vmatprep.subr.msk.bf16.mxu0 %vm355_vm1, %v2511_v49  ;;  %v2712_v52 = vpop.permute.xlu1 %2711 }
 0x12a   : > { %4256 = vrot.lane.b32.xlu0 %v7135_v6, %s7056_s22  ;;  %v2726_v1 = vsel %vm2725_vm13, %v2710_v50, %v2712_v52 }
 0x12b   : > { %6838 = vmatmul.mubr.msk.bf16.vlgmr.msra.gmra.mxu1 %vm351_vm2, %v6580_v4  ;;  %4258 = vrot.lane.b32.xlu1 %v7142_v9, %s7056_s22  ;;  %v2737_v10 = vsel %vm355_vm1, %v2726_v1, 0 }
 0x12c   : > { %2593 = vmatpush1.bf16.msra.mxu1 %v2523_v51  ;;  %2610 = vmatprep.mubr.bf16.mxu1 %v7036_v0  ;;  %v2714_v55 = vpop.permute.xlu0 %2713 }
 0x12d   : > { %6841 = vmatprep.subr.bf16.mxu1 %v7045_v29  ;;  %v2716_v57 = vpop.permute.xlu1 %2715  ;;  %v2727_v59 = vsel %vm2725_vm13, %v2712_v52, %v2714_v55 }
 0x12e   : > { %4260 = vrot.lane.b32.xlu0 %v7140_v8, %s7056_s22  ;;  %v2728_v14 = vsel %vm2725_vm13, %v2714_v55, %v2716_v57 }
 0x12f   : > { %6590 = vmatmul.mubr.msk.bf16.vlgmr.msra.gmra.mxu0 %vm351_vm2, %v6588_v54  ;;  %4262 = vrot.lane.b32.xlu1 %v7147_v11, %s7056_s22  ;;  %v2743_v17 = vsel %vm355_vm1, %v2728_v14, 0 }
 0x130   : > { %2634 = vmatpush1.bf16.msra.mxu0 %v2529_v56  ;;  %2651 = vmatprep.mubr.bf16.mxu0 %v7036_v0  ;;  %v2718_v61 = vpop.permute.xlu0 %2717 }
 0x131   : > { %6597 = vmatprep.subr.msk.bf16.mxu0 %vm355_vm1, %v2727_v59  ;;  %v2720_v63 = vpop.permute.xlu1 %2719  ;;  %v2729_v2 = vsel %vm2725_vm13, %v2716_v57, %v2718_v61 }
 0x132   : > { %4264 = vrot.lane.b32.xlu0 %v7149_v12, %s7056_s22  ;;  %v2730_v19 = vsel %vm2725_vm13, %v2718_v61, %v2720_v63 }
 0x133   : > { %6592 = vmatmul.mubr.msk.bf16.vlgmr.msra.gmra.mxu1 %vm351_vm2, %v6588_v54  ;;  %4266 = vrot.lane.b32.xlu1 %v7663_v60, %s7056_s22  ;;  %v2749_v22 = vsel %vm355_vm1, %v2730_v19, 0 }
 0x134   : > { %6842 = vmatpush3.bf16.msra.mxu1 %v2535_v62  ;;  %6843 = vmatprep.mubr.msk.bf16.mxu1 %vm7046_vm3, %v7045_v29  ;;  %v2722_v7 = vpop.permute.xlu0 %2721 }
 0x135   : > { %6599 = vmatprep.subr.msk.bf16.mxu1 %vm355_vm1, %v2729_v2  ;;  %v2724_v13 = vpop.permute.xlu1 %2723  ;;  %v2731_v15 = vsel %vm2725_vm13, %v2720_v63, %v2722_v7 }
 0x136   : > { %4472 = vrot.lane.b32.xlu0 %v7132_v5, %s7057_s26  ;;  %v2732_v24 = vsel %vm2725_vm13, %v2722_v7, %v2724_v13  ;;  %vm5808_vm13 = vcmask 285696  }
 0x137   : > { %6594 = vmatmul.mubr.msk.bf16.vlgmr.msra.gmra.mxu0 %vm351_vm2, %v6588_v54  ;;  %4474 = vrot.lane.b32.xlu1 %v7127_v3, %s7057_s26  ;;  %v2755_v27 = vsel %vm355_vm1, %v2732_v24, 0 }
 0x138   : > { %2772 = vmatpush1.bf16.msra.mxu0 %v2737_v10  ;;  %2789 = vmatprep.mubr.bf16.mxu0 %v7036_v0  ;;  %v2930_v16 = vpop.permute.xlu0 %2929 }
 0x139   : > { %6601 = vmatprep.subr.msk.bf16.mxu0 %vm355_vm1, %v2731_v15  ;;  %v2932_v18 = vpop.permute.xlu1 %2931 }
 0x13a   : > { %4476 = vrot.lane.b32.xlu0 %v7135_v6, %s7057_s26  ;;  %v2946_v30 = vsel %vm2945_vm14, %v2930_v16, %v2932_v18 }
 0x13b   : > { %6844 = vmatmul.mubr.msk.bf16.vlgmr.msra.gmra.mxu1 %vm351_vm2, %v6588_v54  ;;  %4478 = vrot.lane.b32.xlu1 %v7142_v9, %s7057_s26  ;;  %v2957_v33 = vsel %vm355_vm1, %v2946_v30, 0 }
 0x13c   : > { %2813 = vmatpush1.bf16.msra.mxu1 %v2743_v17  ;;  %2830 = vmatprep.mubr.bf16.mxu1 %v7036_v0  ;;  %v2934_v21 = vpop.permute.xlu0 %2933 }
 0x13d   : > { %6847 = vmatprep.subr.bf16.mxu1 %v7045_v29  ;;  %v2936_v23 = vpop.permute.xlu1 %2935  ;;  %v2947_v25 = vsel %vm2945_vm14, %v2932_v18, %v2934_v21  ;;  %v7798_v18 = vld [vmem:[%s8506_s1 + $0x34] sm:$0xf] }
 0x13e   : > { %4480 = vrot.lane.b32.xlu0 %v7140_v8, %s7057_s26  ;;  %v2948_v4 = vsel %vm2945_vm14, %v2934_v21, %v2936_v23 }
 0x13f   : > { %6598 = vmatmul.mubr.msk.bf16.vlgmr.msra.gmra.mxu0 %vm351_vm2, %v6596_v20  ;;  %4482 = vrot.lane.b32.xlu1 %v7147_v11, %s7057_s26  ;;  %v2963_v37 = vsel %vm355_vm1, %v2948_v4, 0 }
 0x140   : > { %2854 = vmatpush1.bf16.msra.mxu0 %v2749_v22  ;;  %2871 = vmatprep.mubr.bf16.mxu0 %v7036_v0  ;;  %v2938_v26 = vpop.permute.xlu0 %2937 }
 0x141   : > { %6605 = vmatprep.subr.msk.bf16.mxu0 %vm355_vm1, %v2947_v25  ;;  %v2940_v28 = vpop.permute.xlu1 %2939  ;;  %v2949_v31 = vsel %vm2945_vm14, %v2936_v23, %v2938_v26 }
 0x142   : > { %4484 = vrot.lane.b32.xlu0 %v7149_v12, %s7057_s26  ;;  %v2950_v39 = vsel %vm2945_vm14, %v2938_v26, %v2940_v28 }
 0x143   : > { %6600 = vmatmul.mubr.msk.bf16.vlgmr.msra.gmra.mxu1 %vm351_vm2, %v6596_v20  ;;  %4486 = vrot.lane.b32.xlu1 %v7663_v60, %s7057_s26  ;;  %v2969_v42 = vsel %vm355_vm1, %v2950_v39, 0 }
 0x144   : > { %6848 = vmatpush3.bf16.msra.mxu1 %v2755_v27  ;;  %6849 = vmatprep.mubr.msk.bf16.mxu1 %vm7046_vm3, %v7045_v29  ;;  %v2942_v32 = vpop.permute.xlu0 %2941 }
 0x145   : > { %6607 = vmatprep.subr.msk.bf16.mxu1 %vm355_vm1, %v2949_v31  ;;  %v2944_v34 = vpop.permute.xlu1 %2943  ;;  %v2951_v35 = vsel %vm2945_vm14, %v2940_v28, %v2942_v32 }
 0x146   : > { %4692 = vrot.lane.b32.xlu0 %v7132_v5, %s7058_s29  ;;  %v2952_v44 = vsel %vm2945_vm14, %v2942_v32, %v2944_v34  ;;  %vm6028_vm14 = vcmask 277504  }
 0x147   : > { %6602 = vmatmul.mubr.msk.bf16.vlgmr.msra.gmra.mxu0 %vm351_vm2, %v6596_v20  ;;  %4694 = vrot.lane.b32.xlu1 %v7127_v3, %s7058_s29  ;;  %v2975_v48 = vsel %vm355_vm1, %v2952_v44, 0 }
 0x148   : > { %2992 = vmatpush1.bf16.msra.mxu0 %v2957_v33  ;;  %3009 = vmatprep.mubr.bf16.mxu0 %v7036_v0  ;;  %v3150_v36 = vpop.permute.xlu0 %3149 }
 0x149   : > { %6609 = vmatprep.subr.msk.bf16.mxu0 %vm355_vm1, %v2951_v35  ;;  %v3152_v38 = vpop.permute.xlu1 %3151 }
 0x14a   : > { %4696 = vrot.lane.b32.xlu0 %v7135_v6, %s7058_s29  ;;  %v3166_v51 = vsel %vm3165_vm15, %v3150_v36, %v3152_v38 }
 0x14b   : > { %6850 = vmatmul.mubr.msk.bf16.vlgmr.msra.gmra.mxu1 %vm351_vm2, %v6596_v20  ;;  %4698 = vrot.lane.b32.xlu1 %v7142_v9, %s7058_s29  ;;  %v3177_v58 = vsel %vm355_vm1, %v3166_v51, 0 }
 0x14c   : > { %3033 = vmatpush1.bf16.msra.mxu1 %v2963_v37  ;;  %3050 = vmatprep.mubr.bf16.mxu1 %v7036_v0  ;;  %v3154_v41 = vpop.permute.xlu0 %3153 }
 0x14d   : > { %6853 = vmatprep.subr.bf16.mxu1 %v7045_v29  ;;  %v3156_v43 = vpop.permute.xlu1 %3155  ;;  %v3167_v45 = vsel %vm3165_vm15, %v3152_v38, %v3154_v41 }
 0x14e   : > { %4700 = vrot.lane.b32.xlu0 %v7140_v8, %s7058_s29  ;;  %v3168_v59 = vsel %vm3165_vm15, %v3154_v41, %v3156_v43 }
 0x14f   : > { %v7748_v46 = vpop.f32.mrf.mxu0  ;;  %6606 = vmatmul.mubr.msk.bf16.vlgmr.msra.gmra.mxu0 %vm351_vm2, %v6604_v40  ;;  %4702 = vrot.lane.b32.xlu1 %v7147_v11, %s7058_s29  ;;  %v3183_v13 = vsel %vm355_vm1, %v3168_v59, 0 }
 0x150   : > { %3074 = vmatpush1.bf16.msra.mxu0 %v2969_v42  ;;  %3091 = vmatprep.mubr.bf16.mxu0 %v7036_v0  ;;  %v3158_v47 = vpop.permute.xlu0 %3157 }
 0x151   : > { %v7755_v49 = vpop.f32.mrf.mxu0  ;;  %6613 = vmatprep.subr.msk.bf16.mxu0 %vm355_vm1, %v3167_v45  ;;  %v3160_v50 = vpop.permute.xlu1 %3159  ;;  %v3169_v52 = vsel %vm3165_vm15, %v3156_v43, %v3158_v47 }
 0x152   : > { %4704 = vrot.lane.b32.xlu0 %v7149_v12, %s7058_s29  ;;  %v3170_v14 = vsel %vm3165_vm15, %v3158_v47, %v3160_v50 }
 0x153   : > { %v415_v53 = vpop.f32.mrf.mxu0  ;;  %v7762_v54 = vpop.f32.mrf.mxu1  ;;  %6608 = vmatmul.mubr.msk.bf16.vlgmr.msra.gmra.mxu1 %vm351_vm2, %v6604_v40  ;;  %4706 = vrot.lane.b32.xlu1 %v7663_v60, %s7058_s29  ;;  %v3189_v22 = vsel %vm355_vm1, %v3170_v14, 0 }
 0x154   : > { %6854 = vmatpush3.bf16.msra.mxu1 %v2975_v48  ;;  %6855 = vmatprep.mubr.msk.bf16.mxu1 %vm7046_vm3, %v7045_v29  ;;  %v3162_v55 = vpop.permute.xlu0 %3161 }
 0x155   : > { %v416_v56 = vpop.f32.mrf.mxu0  ;;  %v7769_v57 = vpop.f32.mrf.mxu1  ;;  %6615 = vmatprep.subr.msk.bf16.mxu1 %vm355_vm1, %v3169_v52  ;;  %v3171_v61 = vsel %vm3165_vm15, %v3160_v50, %v3162_v55 }
 0x156   : > { %4912 = vrot.lane.b32.xlu0 %v7132_v5, %s7059_s7  ;;  %v3164_v62 = vpop.permute.xlu1 %3163 }
 0x157   : > { %v456_v63 = vpop.f32.mrf.mxu1  ;;  %v7777_v1 = vpop.f32.mrf.mxu0  ;;  %6610 = vmatmul.mubr.msk.bf16.vlgmr.msra.gmra.mxu0 %vm351_vm2, %v6604_v40  ;;  %4914 = vrot.lane.b32.xlu1 %v7127_v3, %s7059_s7  ;;  %v3172_v23 = vsel %vm3165_vm15, %v3162_v55, %v3164_v62  ;;  %v7868_v62 = vld [vmem:[%s8506_s1 + $0x38] sm:$0xf] }
 0x158   : > { %3212 = vmatpush1.bf16.msra.mxu0 %v3177_v58  ;;  %3229 = vmatprep.mubr.bf16.mxu0 %v7036_v0  ;;  %v3370_v2 = vpop.permute.xlu0 %3369  ;;  %v3195_v31 = vsel %vm355_vm1, %v3172_v23, 0 }
 0x159   : > { %v457_v7 = vpop.f32.mrf.mxu1  ;;  %v7783_v10 = vpop.f32.mrf.mxu0  ;;  %6617 = vmatprep.subr.msk.bf16.mxu0 %vm355_vm1, %v3171_v61 }
 0x15a   : > { %4916 = vrot.lane.b32.xlu0 %v7135_v6, %s7059_s7  ;;  %v3372_v15 = vpop.permute.xlu1 %3371 }
 0x15b   : > { %v497_v16 = vpop.f32.mrf.mxu0  ;;  %v7790_v17 = vpop.f32.mrf.mxu1  ;;  %6856 = vmatmul.mubr.msk.bf16.vlgmr.msra.gmra.mxu1 %vm351_vm2, %v6604_v40  ;;  %4918 = vrot.lane.b32.xlu1 %v7142_v9, %s7059_s7  ;;  %v3386_v4 = vsel %vm3385_vm0, %v3370_v2, %v3372_v15 }
 0x15c   : > { %3253 = vmatpush1.bf16.msra.mxu1 %v3183_v13  ;;  %3270 = vmatprep.mubr.bf16.mxu1 %v7036_v0  ;;  %v3374_v19 = vpop.permute.xlu0 %3373  ;;  %v3397_v43 = vsel %vm355_vm1, %v3386_v4, 0 }
 0x15d   : > { %v498_v20 = vpop.f32.mrf.mxu0  ;;  %v6785_v21 = vpop.f32.mrf.mxu1  ;;  %6859 = vmatprep.subr.bf16.mxu1 %v7045_v29  ;;  %v3387_v24 = vsel %vm3385_vm0, %v3372_v15, %v3374_v19 }
 0x15e   : > { %4920 = vrot.lane.b32.xlu0 %v7140_v8, %s7059_s7  ;;  %v3376_v25 = vpop.permute.xlu1 %3375 }
 0x15f   : > { %v537_v26 = vpop.f32.mrf.mxu1  ;;  %v598_v27 = vpop.f32.mrf.mxu0  ;;  %6614 = vmatmul.mubr.msk.bf16.vlgmr.msra.gmra.mxu0 %vm351_vm2, %v7798_v18  ;;  %4922 = vrot.lane.b32.xlu1 %v7147_v11, %s7059_s7  ;;  %v3388_v45 = vsel %vm3385_vm0, %v3374_v19, %v3376_v25 }
 0x160   : > { %v7812_v28 = vadd.f32 %v598_v27, %v7748_v46  ;;  %3294 = vmatpush1.bf16.msra.mxu0 %v3189_v22  ;;  %3311 = vmatprep.mubr.bf16.mxu0 %v7036_v0  ;;  %v3378_v30 = vpop.permute.xlu0 %3377 }
 0x161   : > { %v6786_v32 = vpop.f32.mrf.mxu1  ;;  %v600_v33 = vpop.f32.mrf.mxu0  ;;  %6621 = vmatprep.subr.msk.bf16.mxu0 %vm355_vm1, %v3387_v24  ;;  %v3389_v35 = vsel %vm3385_vm0, %v3376_v25, %v3378_v30 }
 0x162   : > { %v7818_v34 = vadd.f32 %v600_v33, %v7755_v49  ;;  %4924 = vrot.lane.b32.xlu0 %v7149_v12, %s7059_s7  ;;  %v3380_v36 = vpop.permute.xlu1 %3379 }
 0x163   : > { %v639_v37 = vpop.f32.mrf.mxu1  ;;  %v602_v38 = vpop.f32.mrf.mxu0  ;;  %6616 = vmatmul.mubr.msk.bf16.vlgmr.msra.gmra.mxu1 %vm351_vm2, %v7798_v18  ;;  %4926 = vrot.lane.b32.xlu1 %v7663_v60, %s7059_s7  ;;  %v3390_v56 = vsel %vm3385_vm0, %v3378_v30, %v3380_v36 }
 0x164   : > { %v7829_v39 = vadd.f32 %v639_v37, %v7762_v54  ;;  %6860 = vmatpush3.bf16.msra.mxu1 %v3195_v31  ;;  %6861 = vmatprep.mubr.msk.bf16.mxu1 %vm7046_vm3, %v7045_v29  ;;  %v3382_v40 = vpop.permute.xlu0 %3381  ;;  %v3403_v54 = vsel %vm355_vm1, %v3388_v45, 0  ;;  %v3409_v7 = vsel %vm355_vm1, %v3390_v56, 0 }
 0x165   : > { %v641_v41 = vpop.f32.mrf.mxu1  ;;  %v603_v42 = vpop.f32.mrf.mxu0  ;;  %6623 = vmatprep.subr.msk.bf16.mxu1 %vm355_vm1, %v3389_v35  ;;  %v3391_v46 = vsel %vm3385_vm0, %v3380_v36, %v3382_v40 }
 0x166   : > { %v7836_v44 = vadd.f32 %v641_v41, %v7769_v57  ;;  %5132 = vrot.lane.b32.xlu0 %v7132_v5, %s7060_s10  ;;  %v3384_v47 = vpop.permute.xlu1 %3383 }
 0x167   : > { %v643_v48 = vpop.f32.mrf.mxu1  ;;  %v680_v49 = vpop.f32.mrf.mxu0  ;;  %6618 = vmatmul.mubr.msk.bf16.vlgmr.msra.gmra.mxu0 %vm351_vm2, %v7798_v18  ;;  %5134 = vrot.lane.b32.xlu1 %v7127_v3, %s7060_s10 }
 0x168   : > { %v7847_v50 = vadd.f32 %v680_v49, %v7777_v1  ;;  %3432 = vmatpush1.bf16.msra.mxu0 %v3397_v43  ;;  %3449 = vmatprep.mubr.bf16.mxu0 %v7036_v0  ;;  %v3590_v51 = vpop.permute.xlu0 %3589 }
 0x169   : > { %v644_v52 = vpop.f32.mrf.mxu1  ;;  %v682_v53 = vpop.f32.mrf.mxu0  ;;  %6625 = vmatprep.subr.msk.bf16.mxu0 %vm355_vm1, %v3391_v46 }
 0x16a   : > { %v7853_v55 = vadd.f32 %v682_v53, %v7783_v10  ;;  %5136 = vrot.lane.b32.xlu0 %v7135_v6, %s7060_s10  ;;  %v3592_v57 = vpop.permute.xlu1 %3591  ;;  %v3392_v10 = vsel %vm3385_vm0, %v3382_v40, %v3384_v47 }
 0x16b   : > { %v721_v58 = vpop.f32.mrf.mxu1  ;;  %v684_v59 = vpop.f32.mrf.mxu0  ;;  %6862 = vmatmul.mubr.msk.bf16.vlgmr.msra.gmra.mxu1 %vm351_vm2, %v7798_v18  ;;  %5138 = vrot.lane.b32.xlu1 %v7142_v9, %s7060_s10  ;;  %v3415_v19 = vsel %vm355_vm1, %v3392_v10, 0  ;;  %v3606_v23 = vsel %vm351_vm2, %v3590_v51, %v3592_v57 }
 0x16c   : > { %v7863_v61 = vadd.f32 %v721_v58, %v7790_v17  ;;  %3473 = vmatpush1.bf16.msra.mxu1 %v3403_v54  ;;  %3490 = vmatprep.mubr.bf16.mxu1 %v7036_v0  ;;  %v3594_v63 = vpop.permute.xlu0 %3593  ;;  %v3617_v33 = vsel %vm355_vm1, %v3606_v23, 0 }
 0x16d   : > { %v6791_v1 = vpop.f32.mrf.mxu1  ;;  %v685_v2 = vpop.f32.mrf.mxu0  ;;  %6865 = vmatprep.subr.bf16.mxu1 %v7045_v29  ;;  %v3607_v13 = vsel %vm351_vm2, %v3592_v57, %v3594_v63 }
 0x16e   : > { %5140 = vrot.lane.b32.xlu0 %v7140_v8, %s7060_s10  ;;  %v3596_v14 = vpop.permute.xlu1 %3595 }
 0x16f   : > { %v724_v15 = vpop.f32.mrf.mxu1  ;;  %v811_v16 = vpop.f32.mrf.mxu0  ;;  %6622 = vmatmul.mubr.msk.bf16.vlgmr.msra.gmra.mxu0 %vm351_vm2, %v7868_v62  ;;  %5142 = vrot.lane.b32.xlu1 %v7147_v11, %s7060_s10  ;;  %v3608_v4 = vsel %vm351_vm2, %v3594_v63, %v3596_v14 }
 0x170   : > { %v7882_v17 = vadd.f32 %v811_v16, %v7812_v28  ;;  %3514 = vmatpush1.bf16.msra.mxu0 %v3409_v7  ;;  %3531 = vmatprep.mubr.bf16.mxu0 %v7036_v0  ;;  %v3598_v18 = vpop.permute.xlu0 %3597  ;;  %v3623_v41 = vsel %vm355_vm1, %v3608_v4, 0 }
 0x171   : > { %v6792_v20 = vpop.f32.mrf.mxu1  ;;  %v813_v21 = vpop.f32.mrf.mxu0  ;;  %6629 = vmatprep.subr.msk.bf16.mxu0 %vm355_vm1, %v3607_v13  ;;  %v3609_v24 = vsel %vm351_vm2, %v3596_v14, %v3598_v18 }
 0x172   : > { %v7888_v22 = vadd.f32 %v813_v21, %v7818_v34  ;;  %5144 = vrot.lane.b32.xlu0 %v7149_v12, %s7060_s10  ;;  %v3600_v25 = vpop.permute.xlu1 %3599 }
 0x173   : > { %v852_v26 = vpop.f32.mrf.mxu1  ;;  %v815_v27 = vpop.f32.mrf.mxu0  ;;  %6624 = vmatmul.mubr.msk.bf16.vlgmr.msra.gmra.mxu1 %vm351_vm2, %v7868_v62  ;;  %5146 = vrot.lane.b32.xlu1 %v7663_v60, %s7060_s10  ;;  %v3610_v45 = vsel %vm351_vm2, %v3598_v18, %v3600_v25 }
 0x174   : > { %v7899_v28 = vadd.f32 %v852_v26, %v7829_v39  ;;  %6866 = vmatpush3.bf16.msra.mxu1 %v3415_v19  ;;  %6867 = vmatprep.mubr.msk.bf16.mxu1 %vm7046_vm3, %v7045_v29  ;;  %v3602_v30 = vpop.permute.xlu0 %3601  ;;  %v3629_v52 = vsel %vm355_vm1, %v3610_v45, 0 }
 0x175   : > { %v854_v31 = vpop.f32.mrf.mxu1  ;;  %v816_v32 = vpop.f32.mrf.mxu0  ;;  %6631 = vmatprep.subr.msk.bf16.mxu1 %vm355_vm1, %v3609_v24  ;;  %v3611_v35 = vsel %vm351_vm2, %v3600_v25, %v3602_v30 }
 0x176   : > { %v7906_v34 = vadd.f32 %v854_v31, %v7836_v44  ;;  %5352 = vrot.lane.b32.xlu0 %v7132_v5, %s7061_s13  ;;  %v3604_v36 = vpop.permute.xlu1 %3603 }
 0x177   : > { %v856_v37 = vpop.f32.mrf.mxu1  ;;  %v893_v38 = vpop.f32.mrf.mxu0  ;;  %6626 = vmatmul.mubr.msk.bf16.vlgmr.msra.gmra.mxu0 %vm351_vm2, %v7868_v62  ;;  %5354 = vrot.lane.b32.xlu1 %v7127_v3, %s7061_s13 }
 0x178   : > { %v7917_v39 = vadd.f32 %v893_v38, %v7847_v50  ;;  %3652 = vmatpush1.bf16.msra.mxu0 %v3617_v33  ;;  %3669 = vmatprep.mubr.bf16.mxu0 %v7036_v0  ;;  %v3810_v40 = vpop.permute.xlu0 %3809  ;;  %v7938_v50 = vld [vmem:[%s8506_s1 + $0x3c] sm:$0xf] }
 0x179   : > { %v857_v42 = vpop.f32.mrf.mxu1  ;;  %v895_v43 = vpop.f32.mrf.mxu0  ;;  %6633 = vmatprep.subr.msk.bf16.mxu0 %vm355_vm1, %v3611_v35 }
 0x17a   : > { %v7923_v44 = vadd.f32 %v895_v43, %v7853_v55  ;;  %5356 = vrot.lane.b32.xlu0 %v7135_v6, %s7061_s13  ;;  %v3812_v46 = vpop.permute.xlu1 %3811  ;;  %v3612_v55 = vsel %vm351_vm2, %v3602_v30, %v3604_v36 }
 0x17b   : > { %v934_v47 = vpop.f32.mrf.mxu1  ;;  %v897_v48 = vpop.f32.mrf.mxu0  ;;  %6868 = vmatmul.mubr.msk.bf16.vlgmr.msra.gmra.mxu1 %vm351_vm2, %v7868_v62  ;;  %5358 = vrot.lane.b32.xlu1 %v7142_v9, %s7061_s13  ;;  %v3635_v63 = vsel %vm355_vm1, %v3612_v55, 0  ;;  %v3826_v10 = vsel %vm3825_vm4, %v3810_v40, %v3812_v46 }
 0x17c   : > { %v7933_v49 = vadd.f32 %v934_v47, %v7863_v61  ;;  %3693 = vmatpush1.bf16.msra.mxu1 %v3623_v41  ;;  %3710 = vmatprep.mubr.bf16.mxu1 %v7036_v0  ;;  %v3814_v51 = vpop.permute.xlu0 %3813  ;;  %v3837_v19 = vsel %vm355_vm1, %v3826_v10, 0 }
 0x17d   : > { %v6797_v53 = vpop.f32.mrf.mxu1  ;;  %v898_v54 = vpop.f32.mrf.mxu0  ;;  %6871 = vmatprep.subr.bf16.mxu1 %v7045_v29  ;;  %v3827_v56 = vsel %vm3825_vm4, %v3812_v46, %v3814_v51 }
 0x17e   : > { %5360 = vrot.lane.b32.xlu0 %v7140_v8, %s7061_s13  ;;  %v3816_v57 = vpop.permute.xlu1 %3815 }
 0x17f   : > { %v937_v58 = vpop.f32.mrf.mxu1  ;;  %v1031_v59 = vpop.f32.mrf.mxu0  ;;  %6630 = vmatmul.mubr.msk.bf16.vlgmr.msra.gmra.mxu0 %vm351_vm2, %v7938_v50  ;;  %5362 = vrot.lane.b32.xlu1 %v7147_v11, %s7061_s13  ;;  %v3828_v23 = vsel %vm3825_vm4, %v3814_v51, %v3816_v57 }
 0x180   : > { %v7952_v61 = vadd.f32 %v1031_v59, %v7882_v17  ;;  %3734 = vmatpush1.bf16.msra.mxu0 %v3629_v52  ;;  %3751 = vmatprep.mubr.bf16.mxu0 %v7036_v0  ;;  %v3818_v62 = vpop.permute.xlu0 %3817  ;;  %v3843_v31 = vsel %vm355_vm1, %v3828_v23, 0 }
 0x181   : > { %v6798_v1 = vpop.f32.mrf.mxu1  ;;  %v1033_v2 = vpop.f32.mrf.mxu0  ;;  %6637 = vmatprep.subr.msk.bf16.mxu0 %vm355_vm1, %v3827_v56  ;;  %v3829_v13 = vsel %vm3825_vm4, %v3816_v57, %v3818_v62 }
 0x182   : > { %v7958_v7 = vadd.f32 %v1033_v2, %v7888_v22  ;;  %5364 = vrot.lane.b32.xlu0 %v7149_v12, %s7061_s13  ;;  %v3820_v14 = vpop.permute.xlu1 %3819 }
 0x183   : > { %v1072_v15 = vpop.f32.mrf.mxu1  ;;  %v1035_v16 = vpop.f32.mrf.mxu0  ;;  %6632 = vmatmul.mubr.msk.bf16.vlgmr.msra.gmra.mxu1 %vm351_vm2, %v7938_v50  ;;  %5366 = vrot.lane.b32.xlu1 %v7663_v60, %s7061_s13  ;;  %v3830_v4 = vsel %vm3825_vm4, %v3818_v62, %v3820_v14 }
 0x184   : > { %v7969_v17 = vadd.f32 %v1072_v15, %v7899_v28  ;;  %6872 = vmatpush3.bf16.msra.mxu1 %v3635_v63  ;;  %6873 = vmatprep.mubr.msk.bf16.mxu1 %vm7046_vm3, %v7045_v29  ;;  %v3822_v18 = vpop.permute.xlu0 %3821  ;;  %v3849_v41 = vsel %vm355_vm1, %v3830_v4, 0 }
 0x185   : > { %v1074_v20 = vpop.f32.mrf.mxu1  ;;  %v1036_v21 = vpop.f32.mrf.mxu0  ;;  %6639 = vmatprep.subr.msk.bf16.mxu1 %vm355_vm1, %v3829_v13  ;;  %v3831_v24 = vsel %vm3825_vm4, %v3820_v14, %v3822_v18 }
 0x186   : > { %v7976_v22 = vadd.f32 %v1074_v20, %v7906_v34  ;;  %5572 = vrot.lane.b32.xlu0 %v7132_v5, %s7062_s16  ;;  %v3824_v25 = vpop.permute.xlu1 %3823 }
 0x187   : > { %v1076_v26 = vpop.f32.mrf.mxu1  ;;  %v1113_v27 = vpop.f32.mrf.mxu0  ;;  %6634 = vmatmul.mubr.msk.bf16.vlgmr.msra.gmra.mxu0 %vm351_vm2, %v7938_v50  ;;  %5574 = vrot.lane.b32.xlu1 %v7127_v3, %s7062_s16 }
 0x188   : > { %v7987_v28 = vadd.f32 %v1113_v27, %v7917_v39  ;;  %3872 = vmatpush1.bf16.msra.mxu0 %v3837_v19  ;;  %3889 = vmatprep.mubr.bf16.mxu0 %v7036_v0  ;;  %v4030_v30 = vpop.permute.xlu0 %4029  ;;  %v8008_v39 = vld [vmem:[%s8506_s1 + $0x40] sm:$0xf] }
 0x189   : > { %v1077_v32 = vpop.f32.mrf.mxu1  ;;  %v1115_v33 = vpop.f32.mrf.mxu0  ;;  %6641 = vmatprep.subr.msk.bf16.mxu0 %vm355_vm1, %v3831_v24 }
 0x18a   : > { %v7993_v34 = vadd.f32 %v1115_v33, %v7923_v44  ;;  %5576 = vrot.lane.b32.xlu0 %v7135_v6, %s7062_s16  ;;  %v4032_v35 = vpop.permute.xlu1 %4031  ;;  %v3832_v44 = vsel %vm3825_vm4, %v3822_v18, %v3824_v25 }
 0x18b   : > { %v1154_v36 = vpop.f32.mrf.mxu1  ;;  %v1117_v37 = vpop.f32.mrf.mxu0  ;;  %6874 = vmatmul.mubr.msk.bf16.vlgmr.msra.gmra.mxu1 %vm351_vm2, %v7938_v50  ;;  %5578 = vrot.lane.b32.xlu1 %v7142_v9, %s7062_s16  ;;  %v3855_v51 = vsel %vm355_vm1, %v3832_v44, 0  ;;  %v4046_v55 = vsel %vm4045_vm5, %v4030_v30, %v4032_v35 }
 0x18c   : > { %v8003_v38 = vadd.f32 %v1154_v36, %v7933_v49  ;;  %3913 = vmatpush1.bf16.msra.mxu1 %v3843_v31  ;;  %3930 = vmatprep.mubr.bf16.mxu1 %v7036_v0  ;;  %v4034_v40 = vpop.permute.xlu0 %4033  ;;  %v4057_v63 = vsel %vm355_vm1, %v4046_v55, 0 }
 0x18d   : > { %v6803_v42 = vpop.f32.mrf.mxu1  ;;  %v1118_v43 = vpop.f32.mrf.mxu0  ;;  %6877 = vmatprep.subr.bf16.mxu1 %v7045_v29  ;;  %v4047_v45 = vsel %vm4045_vm5, %v4032_v35, %v4034_v40 }
 0x18e   : > { %5580 = vrot.lane.b32.xlu0 %v7140_v8, %s7062_s16  ;;  %v4036_v46 = vpop.permute.xlu1 %4035 }
 0x18f   : > { %v1157_v47 = vpop.f32.mrf.mxu1  ;;  %v1251_v48 = vpop.f32.mrf.mxu0  ;;  %6638 = vmatmul.mubr.msk.bf16.vlgmr.msra.gmra.mxu0 %vm351_vm2, %v8008_v39  ;;  %5582 = vrot.lane.b32.xlu1 %v7147_v11, %s7062_s16  ;;  %v4048_v10 = vsel %vm4045_vm5, %v4034_v40, %v4036_v46 }
 0x190   : > { %v8022_v49 = vadd.f32 %v1251_v48, %v7952_v61  ;;  %3954 = vmatpush1.bf16.msra.mxu0 %v3849_v41  ;;  %3971 = vmatprep.mubr.bf16.mxu0 %v7036_v0  ;;  %v4038_v50 = vpop.permute.xlu0 %4037  ;;  %v4063_v19 = vsel %vm355_vm1, %v4048_v10, 0 }
 0x191   : > { %v6804_v52 = vpop.f32.mrf.mxu1  ;;  %v1253_v53 = vpop.f32.mrf.mxu0  ;;  %6645 = vmatprep.subr.msk.bf16.mxu0 %vm355_vm1, %v4047_v45  ;;  %v4049_v56 = vsel %vm4045_vm5, %v4036_v46, %v4038_v50 }
 0x192   : > { %v8028_v54 = vadd.f32 %v1253_v53, %v7958_v7  ;;  %5584 = vrot.lane.b32.xlu0 %v7149_v12, %s7062_s16  ;;  %v4040_v57 = vpop.permute.xlu1 %4039 }
 0x193   : > { %v1292_v58 = vpop.f32.mrf.mxu1  ;;  %v1255_v59 = vpop.f32.mrf.mxu0  ;;  %6640 = vmatmul.mubr.msk.bf16.vlgmr.msra.gmra.mxu1 %vm351_vm2, %v8008_v39  ;;  %5586 = vrot.lane.b32.xlu1 %v7663_v60, %s7062_s16  ;;  %v4050_v23 = vsel %vm4045_vm5, %v4038_v50, %v4040_v57 }
 0x194   : > { %v8039_v61 = vadd.f32 %v1292_v58, %v7969_v17  ;;  %6878 = vmatpush3.bf16.msra.mxu1 %v3855_v51  ;;  %6879 = vmatprep.mubr.msk.bf16.mxu1 %vm7046_vm3, %v7045_v29  ;;  %v4042_v62 = vpop.permute.xlu0 %4041  ;;  %v4069_v31 = vsel %vm355_vm1, %v4050_v23, 0 }
 0x195   : > { %v1294_v1 = vpop.f32.mrf.mxu1  ;;  %v1256_v2 = vpop.f32.mrf.mxu0  ;;  %6647 = vmatprep.subr.msk.bf16.mxu1 %vm355_vm1, %v4049_v56  ;;  %v4051_v13 = vsel %vm4045_vm5, %v4040_v57, %v4042_v62 }
 0x196   : > { %v8046_v7 = vadd.f32 %v1294_v1, %v7976_v22  ;;  %5792 = vrot.lane.b32.xlu0 %v7132_v5, %s7063_s23  ;;  %v4044_v14 = vpop.permute.xlu1 %4043 }
 0x197   : > { %v1296_v15 = vpop.f32.mrf.mxu1  ;;  %v1333_v16 = vpop.f32.mrf.mxu0  ;;  %6642 = vmatmul.mubr.msk.bf16.vlgmr.msra.gmra.mxu0 %vm351_vm2, %v8008_v39  ;;  %5794 = vrot.lane.b32.xlu1 %v7127_v3, %s7063_s23 }
 0x198   : > { %v8057_v17 = vadd.f32 %v1333_v16, %v7987_v28  ;;  %4092 = vmatpush1.bf16.msra.mxu0 %v4057_v63  ;;  %4109 = vmatprep.mubr.bf16.mxu0 %v7036_v0  ;;  %v4253_v18 = vpop.permute.xlu0 %4252  ;;  %v8078_v28 = vld [vmem:[%s8506_s1 + $0x44] sm:$0xf] }
 0x199   : > { %v1297_v20 = vpop.f32.mrf.mxu1  ;;  %v1335_v21 = vpop.f32.mrf.mxu0  ;;  %6649 = vmatprep.subr.msk.bf16.mxu0 %vm355_vm1, %v4051_v13 }
 0x19a   : > { %v8063_v22 = vadd.f32 %v1335_v21, %v7993_v34  ;;  %5796 = vrot.lane.b32.xlu0 %v7135_v6, %s7063_s23  ;;  %v4255_v24 = vpop.permute.xlu1 %4254  ;;  %v4052_v34 = vsel %vm4045_vm5, %v4042_v62, %v4044_v14  ;;  %v6652_v14 = vld [vmem:[%s8506_s1 + $0x48] sm:$0xf] }
 0x19b   : > { %v1374_v25 = vpop.f32.mrf.mxu1  ;;  %v1337_v26 = vpop.f32.mrf.mxu0  ;;  %6880 = vmatmul.mubr.msk.bf16.vlgmr.msra.gmra.mxu1 %vm351_vm2, %v8008_v39  ;;  %5798 = vrot.lane.b32.xlu1 %v7142_v9, %s7063_s23  ;;  %v4075_v40 = vsel %vm355_vm1, %v4052_v34, 0  ;;  %v4269_v44 = vsel %vm4268_vm6, %v4253_v18, %v4255_v24 }
 0x19c   : > { %v8073_v27 = vadd.f32 %v1374_v25, %v8003_v38  ;;  %4133 = vmatpush1.bf16.msra.mxu1 %v4063_v19  ;;  %4150 = vmatprep.mubr.bf16.mxu1 %v7036_v0  ;;  %v4257_v30 = vpop.permute.xlu0 %4256  ;;  %v4280_v51 = vsel %vm355_vm1, %v4269_v44, 0 }
 0x19d   : > { %v6809_v32 = vpop.f32.mrf.mxu1  ;;  %v1338_v33 = vpop.f32.mrf.mxu0  ;;  %6883 = vmatprep.subr.bf16.mxu1 %v7045_v29  ;;  %v4270_v4 = vsel %vm4268_vm6, %v4255_v24, %v4257_v30 }
 0x19e   : > { %5800 = vrot.lane.b32.xlu0 %v7140_v8, %s7063_s23  ;;  %v4259_v35 = vpop.permute.xlu1 %4258  ;;  %v7011_v32 = vld [vmem:[%s7121_s25 + $0x20] ss:$0 sps:$4 sm:$0xff]  }
 0x19f   : > { %v1377_v36 = vpop.f32.mrf.mxu1  ;;  %v1471_v37 = vpop.f32.mrf.mxu0  ;;  %6646 = vmatmul.mubr.msk.bf16.vlgmr.msra.gmra.mxu0 %vm351_vm2, %v8078_v28  ;;  %5802 = vrot.lane.b32.xlu1 %v7147_v11, %s7063_s23  ;;  %v4271_v55 = vsel %vm4268_vm6, %v4257_v30, %v4259_v35 }
 0x1a0   : > { %v8092_v38 = vadd.f32 %v1471_v37, %v8022_v49  ;;  %4174 = vmatpush1.bf16.msra.mxu0 %v4069_v31  ;;  %4191 = vmatprep.mubr.bf16.mxu0 %v7036_v0  ;;  %v4261_v39 = vpop.permute.xlu0 %4260  ;;  %v4286_v62 = vsel %vm355_vm1, %v4271_v55, 0 }
 0x1a1   : > { %v6810_v41 = vpop.f32.mrf.mxu1  ;;  %v1473_v42 = vpop.f32.mrf.mxu0  ;;  %6654 = vmatprep.subr.msk.bf16.mxu0 %vm355_vm1, %v4270_v4  ;;  %v4272_v45 = vsel %vm4268_vm6, %v4259_v35, %v4261_v39 }
 0x1a2   : > { %v8098_v43 = vadd.f32 %v1473_v42, %v8028_v54  ;;  %5804 = vrot.lane.b32.xlu0 %v7149_v12, %s7063_s23  ;;  %v4263_v46 = vpop.permute.xlu1 %4262 }
 0x1a3   : > { %v1512_v47 = vpop.f32.mrf.mxu1  ;;  %v1475_v48 = vpop.f32.mrf.mxu0  ;;  %6648 = vmatmul.mubr.msk.bf16.vlgmr.msra.gmra.mxu1 %vm351_vm2, %v8078_v28  ;;  %5806 = vrot.lane.b32.xlu1 %v7663_v60, %s7063_s23  ;;  %v4273_v2 = vsel %vm4268_vm6, %v4261_v39, %v4263_v46 }
 0x1a4   : > { %v8109_v49 = vadd.f32 %v1512_v47, %v8039_v61  ;;  %6884 = vmatpush3.bf16.msra.mxu1 %v4075_v40  ;;  %6885 = vmatprep.mubr.msk.bf16.mxu1 %vm7046_vm3, %v7045_v29  ;;  %v4265_v50 = vpop.permute.xlu0 %4264  ;;  %v4292_v15 = vsel %vm355_vm1, %v4273_v2, 0 }
 0x1a5   : > { %v1514_v52 = vpop.f32.mrf.mxu1  ;;  %v1476_v53 = vpop.f32.mrf.mxu0  ;;  %6656 = vmatprep.subr.msk.bf16.mxu1 %vm355_vm1, %v4272_v45  ;;  %v4274_v60 = vsel %vm4268_vm6, %v4263_v46, %v4265_v50 }
 0x1a6   : > { %v8116_v54 = vadd.f32 %v1514_v52, %v8046_v7  ;;  %6012 = vrot.lane.b32.xlu0 %v7132_v5, %s7064_s27  ;;  %v4267_v56 = vpop.permute.xlu1 %4266  ;;  %v6661_v53 = vld [vmem:[%s8506_s1 + $0x4c] sm:$0xf] }
 0x1a7   : > { %v1516_v57 = vpop.f32.mrf.mxu1  ;;  %v1553_v58 = vpop.f32.mrf.mxu0  ;;  %6650 = vmatmul.mubr.msk.bf16.vlgmr.msra.gmra.mxu0 %vm351_vm2, %v8078_v28  ;;  %6014 = vrot.lane.b32.xlu1 %v7127_v3, %s7064_s27  ;;  %v4275_v18 = vsel %vm4268_vm6, %v4265_v50, %v4267_v56 }
 0x1a8   : > { %v8127_v59 = vadd.f32 %v1553_v58, %v8057_v17  ;;  %4315 = vmatpush1.bf16.msra.mxu0 %v4280_v51  ;;  %4332 = vmatprep.mubr.bf16.mxu0 %v7036_v0  ;;  %v4473_v61 = vpop.permute.xlu0 %4472  ;;  %v4298_v24 = vsel %vm355_vm1, %v4275_v18, 0 }
 0x1a9   : > { %v1517_v63 = vpop.f32.mrf.mxu1  ;;  %v1555_v5 = vpop.f32.mrf.mxu0  ;;  %6658 = vmatprep.subr.msk.bf16.mxu0 %vm355_vm1, %v4274_v60 }
 0x1aa   : > { %v8133_v1 = vadd.f32 %v1555_v5, %v8063_v22  ;;  %6016 = vrot.lane.b32.xlu0 %v7135_v6, %s7064_s27  ;;  %v4475_v3 = vpop.permute.xlu1 %4474 }
 0x1ab   : > { %v1594_v7 = vpop.f32.mrf.mxu1  ;;  %v1557_v10 = vpop.f32.mrf.mxu0  ;;  %6886 = vmatmul.mubr.msk.bf16.vlgmr.msra.gmra.mxu1 %vm351_vm2, %v8078_v28  ;;  %6018 = vrot.lane.b32.xlu1 %v7142_v9, %s7064_s27 }
 0x1ac   : > { %v8143_v13 = vadd.f32 %v1594_v7, %v8073_v27  ;;  %4356 = vmatpush1.bf16.msra.mxu1 %v4286_v62  ;;  %4373 = vmatprep.mubr.bf16.mxu1 %v7036_v0  ;;  %v4477_v6 = vpop.permute.xlu0 %4476  ;;  %v4489_v27 = vsel %vm4488_vm7, %v4473_v61, %v4475_v3 }
 0x1ad   : > { %v6815_v16 = vpop.f32.mrf.mxu1  ;;  %v1558_v17 = vpop.f32.mrf.mxu0  ;;  %6889 = vmatprep.subr.bf16.mxu1 %v7045_v29  ;;  %v4490_v9 = vsel %vm4488_vm7, %v4475_v3, %v4477_v6  ;;  %v4500_v4 = vsel %vm355_vm1, %v4489_v27, 0 }
 0x1ae   : > { %6020 = vrot.lane.b32.xlu0 %v7140_v8, %s7064_s27  ;;  %v4479_v19 = vpop.permute.xlu1 %4478 }
 0x1af   : > { %v1597_v20 = vpop.f32.mrf.mxu1  ;;  %v1691_v21 = vpop.f32.mrf.mxu0  ;;  %6655 = vmatmul.mubr.msk.bf16.vlgmr.msra.gmra.mxu0 %vm351_vm2, %v6652_v14  ;;  %6022 = vrot.lane.b32.xlu1 %v7147_v11, %s7064_s27  ;;  %v4491_v37 = vsel %vm4488_vm7, %v4477_v6, %v4479_v19 }
 0x1b0   : > { %v8159_v22 = vadd.f32 %v1691_v21, %v8092_v38  ;;  %4397 = vmatpush1.bf16.msra.mxu0 %v4292_v15  ;;  %4414 = vmatprep.mubr.bf16.mxu0 %v7036_v0  ;;  %v4481_v23 = vpop.permute.xlu0 %4480  ;;  %v4506_v44 = vsel %vm355_vm1, %v4491_v37, 0 }
 0x1b1   : > { %v6816_v25 = vpop.f32.mrf.mxu1  ;;  %v1693_v8 = vpop.f32.mrf.mxu0  ;;  %6662 = vmatprep.subr.msk.bf16.mxu0 %vm355_vm1, %v4490_v9  ;;  %v4492_v11 = vsel %vm4488_vm7, %v4479_v19, %v4481_v23 }
 0x1b2   : > { %v8165_v26 = vadd.f32 %v1693_v8, %v8098_v43  ;;  %6024 = vrot.lane.b32.xlu0 %v7149_v12, %s7064_s27  ;;  %v4483_v28 = vpop.permute.xlu1 %4482 }
 0x1b3   : > { %v1732_v30 = vpop.f32.mrf.mxu1  ;;  %v1695_v31 = vpop.f32.mrf.mxu0  ;;  %6657 = vmatmul.mubr.msk.bf16.vlgmr.msra.gmra.mxu1 %vm351_vm2, %v6652_v14  ;;  %6026 = vrot.lane.b32.xlu1 %v7011_v32, %s7064_s27  ;;  %v4493_v48 = vsel %vm4488_vm7, %v4481_v23, %v4483_v28 }
 0x1b4   : > { %v1822_v33 = vadd.f32 %v1732_v30, %v8109_v49  ;;  %6890 = vmatpush3.bf16.msra.mxu1 %v4298_v24  ;;  %6891 = vmatprep.mubr.msk.bf16.mxu1 %vm7046_vm3, %v7045_v29  ;;  %v4485_v34 = vpop.permute.xlu0 %4484  ;;  %v4512_v55 = vsel %vm355_vm1, %v4493_v48, 0 }
 0x1b5   : > { %v1734_v35 = vpop.f32.mrf.mxu1  ;;  %v1696_v36 = vpop.f32.mrf.mxu0  ;;  %6664 = vmatprep.subr.msk.bf16.mxu1 %vm355_vm1, %v4492_v11  ;;  %v4494_v38 = vsel %vm4488_vm7, %v4483_v28, %v4485_v34 }
 0x1b6   : > { %v1823_v12 = vadd.f32 %v1734_v35, %v8116_v54  ;;  %v4487_v39 = vpop.permute.xlu1 %4486  ;;  %v6669_v35 = vld [vmem:[%s8506_s1 + $0x50] sm:$0xf] }
 0x1b7   : > { %v1736_v40 = vpop.f32.mrf.mxu1  ;;  %v1773_v41 = vpop.f32.mrf.mxu0  ;;  %6659 = vmatmul.mubr.msk.bf16.vlgmr.msra.gmra.mxu0 %vm351_vm2, %v6652_v14  ;;  %v4495_v57 = vsel %vm4488_vm7, %v4485_v34, %v4487_v39 }
 0x1b8   : > { %v1824_v42 = vadd.f32 %v1773_v41, %v8127_v59  ;;  %4535 = vmatpush1.bf16.msra.mxu0 %v4500_v4  ;;  %4552 = vmatprep.mubr.bf16.mxu0 %v7036_v0  ;;  %v4693_v43 = vpop.permute.xlu0 %4692 }
 0x1b9   : > { %v1737_v45 = vpop.f32.mrf.mxu1  ;;  %v1775_v46 = vpop.f32.mrf.mxu0  ;;  %6666 = vmatprep.subr.msk.bf16.mxu0 %vm355_vm1, %v4494_v38 }
 0x1ba   : > { %v1825_v47 = vadd.f32 %v1775_v46, %v8133_v1  ;;  %v4695_v49 = vpop.permute.xlu1 %4694  ;;  %v4518_v1 = vsel %vm355_vm1, %v4495_v57, 0 }
 0x1bb   : > { %v1814_v50 = vpop.f32.mrf.mxu1  ;;  %v1777_v51 = vpop.f32.mrf.mxu0  ;;  %6892 = vmatmul.mubr.msk.bf16.vlgmr.msra.gmra.mxu1 %vm351_vm2, %v6652_v14  ;;  %v4709_v10 = vsel %vm4708_vm8, %v4693_v43, %v4695_v49 }
 0x1bc   : > { %v1826_v52 = vadd.f32 %v1814_v50, %v8143_v13  ;;  %4576 = vmatpush1.bf16.msra.mxu1 %v4506_v44  ;;  %4593 = vmatprep.mubr.bf16.mxu1 %v7036_v0  ;;  %v4697_v54 = vpop.permute.xlu0 %4696  ;;  %v4720_v18 = vsel %vm355_vm1, %v4709_v10, 0 }
 0x1bd   : > { %v6821_v60 = vpop.f32.mrf.mxu1  ;;  %v1778_v56 = vpop.f32.mrf.mxu0  ;;  %6895 = vmatprep.subr.bf16.mxu1 %v7045_v29  ;;  %v4710_v58 = vsel %vm4708_vm8, %v4695_v49, %v4697_v54 }
 0x1be   : > { %v4699_v59 = vpop.permute.xlu1 %4698 }
 0x1bf   : > { %v1817_v61 = vpop.f32.mrf.mxu1  ;;  %v1911_v62 = vpop.f32.mrf.mxu0  ;;  %6663 = vmatmul.mubr.msk.bf16.vlgmr.msra.gmra.mxu0 %vm351_vm2, %v6661_v53  ;;  %v4711_v21 = vsel %vm4708_vm8, %v4697_v54, %v4699_v59 }
 0x1c0   : > { %v2040_v63 = vadd.f32 %v1911_v62, %v8159_v22  ;;  %4617 = vmatpush1.bf16.msra.mxu0 %v4512_v55  ;;  %4634 = vmatprep.mubr.bf16.mxu0 %v7036_v0  ;;  %v4701_v5 = vpop.permute.xlu0 %4700  ;;  %v4726_v27 = vsel %vm355_vm1, %v4711_v21, 0 }
 0x1c1   : > { %v6822_v2 = vpop.f32.mrf.mxu1  ;;  %v1913_v3 = vpop.f32.mrf.mxu0  ;;  %6670 = vmatprep.subr.msk.bf16.mxu0 %vm355_vm1, %v4710_v58  ;;  %v4712_v13 = vsel %vm4708_vm8, %v4699_v59, %v4701_v5 }
 0x1c2   : > { %v2041_v7 = vadd.f32 %v1913_v3, %v8165_v26  ;;  %v4703_v14 = vpop.permute.xlu1 %4702 }
 0x1c3   : > { %v1915_v6 = vpop.f32.mrf.mxu0  ;;  %v1952_v15 = vpop.f32.mrf.mxu1  ;;  %6665 = vmatmul.mubr.msk.bf16.vlgmr.msra.gmra.mxu1 %vm351_vm2, %v6661_v53  ;;  %v4713_v31 = vsel %vm4708_vm8, %v4701_v5, %v4703_v14 }
 0x1c4   : > { %v2042_v16 = vadd.f32 %v1952_v15, %v1822_v33  ;;  %6896 = vmatpush3.bf16.msra.mxu1 %v4518_v1  ;;  %6897 = vmatprep.mubr.msk.bf16.mxu1 %vm7046_vm3, %v7045_v29  ;;  %v4705_v17 = vpop.permute.xlu0 %4704 }
 0x1c5   : > { %v1954_v9 = vpop.f32.mrf.mxu1  ;;  %v1916_v19 = vpop.f32.mrf.mxu0  ;;  %6672 = vmatprep.subr.msk.bf16.mxu1 %vm355_vm1, %v4712_v13  ;;  %v4714_v22 = vsel %vm4708_vm8, %v4703_v14, %v4705_v17 }
 0x1c6   : > { %v2043_v20 = vadd.f32 %v1954_v9, %v1823_v12  ;;  %v4707_v23 = vpop.permute.xlu1 %4706  ;;  %v4732_v12 = vsel %vm355_vm1, %v4713_v31, 0  ;;  %v6677_v9 = vld [vmem:[%s8506_s1 + $0x54] sm:$0xf] }
 0x1c7   : > { %v1956_v24 = vpop.f32.mrf.mxu1  ;;  %v1993_v25 = vpop.f32.mrf.mxu0  ;;  %6667 = vmatmul.mubr.msk.bf16.vlgmr.msra.gmra.mxu0 %vm351_vm2, %v6661_v53  ;;  %v4715_v39 = vsel %vm4708_vm8, %v4705_v17, %v4707_v23 }
 0x1c8   : > { %v2044_v8 = vadd.f32 %v1993_v25, %v1824_v42  ;;  %4755 = vmatpush1.bf16.msra.mxu0 %v4720_v18  ;;  %4772 = vmatprep.mubr.bf16.mxu0 %v7036_v0  ;;  %v4913_v26 = vpop.permute.xlu0 %4912  ;;  %v4738_v46 = vsel %vm355_vm1, %v4715_v39, 0 }
 0x1c9   : > { %v1957_v11 = vpop.f32.mrf.mxu1  ;;  %v1995_v28 = vpop.f32.mrf.mxu0  ;;  %6674 = vmatprep.subr.msk.bf16.mxu0 %vm355_vm1, %v4714_v22 }
 0x1ca   : > { %v2045_v30 = vadd.f32 %v1995_v28, %v1825_v47  ;;  %v4915_v32 = vpop.permute.xlu1 %4914 }
 0x1cb   : > { %v1997_v33 = vpop.f32.mrf.mxu0  ;;  %v2034_v34 = vpop.f32.mrf.mxu1  ;;  %6898 = vmatmul.mubr.msk.bf16.vlgmr.msra.gmra.mxu1 %vm351_vm2, %v6661_v53  ;;  %v4929_v50 = vsel %vm4928_vm9, %v4913_v26, %v4915_v32 }
 0x1cc   : > { %v2046_v4 = vadd.f32 %v2034_v34, %v1826_v52  ;;  %4796 = vmatpush1.bf16.msra.mxu1 %v4726_v27  ;;  %4813 = vmatprep.mubr.bf16.mxu1 %v7036_v0  ;;  %v4917_v36 = vpop.permute.xlu0 %4916  ;;  %v4940_v56 = vsel %vm355_vm1, %v4929_v50, 0 }
 0x1cd   : > { %v6827_v37 = vpop.f32.mrf.mxu1  ;;  %v1998_v38 = vpop.f32.mrf.mxu0  ;;  %6901 = vmatprep.subr.bf16.mxu1 %v7045_v29  ;;  %v4930_v40 = vsel %vm4928_vm9, %v4915_v32, %v4917_v36 }
 0x1ce   : > { %v4919_v41 = vpop.permute.xlu1 %4918 }
 0x1cf   : > { %v2037_v42 = vpop.f32.mrf.mxu1  ;;  %v2131_v43 = vpop.f32.mrf.mxu0  ;;  %6671 = vmatmul.mubr.msk.bf16.vlgmr.msra.gmra.mxu0 %vm351_vm2, %v6669_v35  ;;  %v4931_v61 = vsel %vm4928_vm9, %v4917_v36, %v4919_v41 }
 0x1d0   : > { %v2260_v44 = vadd.f32 %v2131_v43, %v2040_v63  ;;  %4837 = vmatpush1.bf16.msra.mxu0 %v4732_v12  ;;  %4854 = vmatprep.mubr.bf16.mxu0 %v7036_v0  ;;  %v4921_v45 = vpop.permute.xlu0 %4920 }
 0x1d1   : > { %v6828_v47 = vpop.f32.mrf.mxu1  ;;  %v2133_v48 = vpop.f32.mrf.mxu0  ;;  %6678 = vmatprep.subr.msk.bf16.mxu0 %vm355_vm1, %v4930_v40  ;;  %v4932_v51 = vsel %vm4928_vm9, %v4919_v41, %v4921_v45 }
 0x1d2   : > { %v2261_v49 = vadd.f32 %v2133_v48, %v2041_v7  ;;  %v4923_v52 = vpop.permute.xlu1 %4922  ;;  %v4946_v7 = vsel %vm355_vm1, %v4931_v61, 0 }
 0x1d3   : > { %v2135_v53 = vpop.f32.mrf.mxu0  ;;  %v2172_v54 = vpop.f32.mrf.mxu1  ;;  %6673 = vmatmul.mubr.msk.bf16.vlgmr.msra.gmra.mxu1 %vm351_vm2, %v6669_v35  ;;  %v4933_v6 = vsel %vm4928_vm9, %v4921_v45, %v4923_v52 }
 0x1d4   : > { %v2262_v55 = vadd.f32 %v2172_v54, %v2042_v16  ;;  %6902 = vmatpush3.bf16.msra.mxu1 %v4738_v46  ;;  %6903 = vmatprep.mubr.msk.bf16.mxu1 %vm7046_vm3, %v7045_v29  ;;  %v4925_v60 = vpop.permute.xlu0 %4924 }
 0x1d5   : > { %v2174_v57 = vpop.f32.mrf.mxu1  ;;  %v2136_v58 = vpop.f32.mrf.mxu0  ;;  %6680 = vmatprep.subr.msk.bf16.mxu1 %vm355_vm1, %v4932_v51  ;;  %v4934_v62 = vsel %vm4928_vm9, %v4923_v52, %v4925_v60 }
 0x1d6   : > { %v2263_v59 = vadd.f32 %v2174_v57, %v2043_v20  ;;  %v4927_v63 = vpop.permute.xlu1 %4926  ;;  %v4952_v20 = vsel %vm355_vm1, %v4933_v6, 0  ;;  %v6685_v57 = vld [vmem:[%s8506_s1 + $0x58] sm:$0xf] }
 0x1d7   : > { %v2176_v5 = vpop.f32.mrf.mxu1  ;;  %v2213_v1 = vpop.f32.mrf.mxu0  ;;  %6675 = vmatmul.mubr.msk.bf16.vlgmr.msra.gmra.mxu0 %vm351_vm2, %v6669_v35  ;;  %v4935_v23 = vsel %vm4928_vm9, %v4925_v60, %v4927_v63 }
 0x1d8   : > { %v2264_v2 = vadd.f32 %v2213_v1, %v2044_v8  ;;  %4975 = vmatpush1.bf16.msra.mxu0 %v4940_v56  ;;  %4992 = vmatprep.mubr.bf16.mxu0 %v7036_v0  ;;  %v5133_v3 = vpop.permute.xlu0 %5132  ;;  %v4958_v28 = vsel %vm355_vm1, %v4935_v23, 0 }
 0x1d9   : > { %v2177_v10 = vpop.f32.mrf.mxu1  ;;  %v2215_v13 = vpop.f32.mrf.mxu0  ;;  %6682 = vmatprep.subr.msk.bf16.mxu0 %vm355_vm1, %v4934_v62 }
 0x1da   : > { %v2265_v14 = vadd.f32 %v2215_v13, %v2045_v30  ;;  %v5135_v15 = vpop.permute.xlu1 %5134 }
 0x1db   : > { %v2217_v16 = vpop.f32.mrf.mxu0  ;;  %v2254_v17 = vpop.f32.mrf.mxu1  ;;  %6904 = vmatmul.mubr.msk.bf16.vlgmr.msra.gmra.mxu1 %vm351_vm2, %v6669_v35  ;;  %v5149_v33 = vsel %vm5148_vm10, %v5133_v3, %v5135_v15 }
 0x1dc   : > { %v2266_v18 = vadd.f32 %v2254_v17, %v2046_v4  ;;  %5016 = vmatpush1.bf16.msra.mxu1 %v4946_v7  ;;  %5033 = vmatprep.mubr.bf16.mxu1 %v7036_v0  ;;  %v5137_v19 = vpop.permute.xlu0 %5136  ;;  %v5160_v38 = vsel %vm355_vm1, %v5149_v33, 0 }
 0x1dd   : > { %v6833_v21 = vpop.f32.mrf.mxu1  ;;  %v2218_v22 = vpop.f32.mrf.mxu0  ;;  %6907 = vmatprep.subr.bf16.mxu1 %v7045_v29  ;;  %v5150_v24 = vsel %vm5148_vm10, %v5135_v15, %v5137_v19 }
 0x1de   : > { %v5139_v25 = vpop.permute.xlu1 %5138 }
 0x1df   : > { %v2257_v8 = vpop.f32.mrf.mxu1  ;;  %v2351_v26 = vpop.f32.mrf.mxu0  ;;  %6679 = vmatmul.mubr.msk.bf16.vlgmr.msra.gmra.mxu0 %vm351_vm2, %v6677_v9  ;;  %v5151_v42 = vsel %vm5148_vm10, %v5137_v19, %v5139_v25 }
 0x1e0   : > { %v2480_v27 = vadd.f32 %v2351_v26, %v2260_v44  ;;  %5057 = vmatpush1.bf16.msra.mxu0 %v4952_v20  ;;  %5074 = vmatprep.mubr.bf16.mxu0 %v7036_v0  ;;  %v5141_v11 = vpop.permute.xlu0 %5140 }
 0x1e1   : > { %v6834_v30 = vpop.f32.mrf.mxu1  ;;  %v2353_v31 = vpop.f32.mrf.mxu0  ;;  %6686 = vmatprep.subr.msk.bf16.mxu0 %vm355_vm1, %v5150_v24  ;;  %v5152_v34 = vsel %vm5148_vm10, %v5139_v25, %v5141_v11 }
 0x1e2   : > { %v2481_v32 = vadd.f32 %v2353_v31, %v2261_v49  ;;  %v5143_v4 = vpop.permute.xlu1 %5142  ;;  %v5166_v49 = vsel %vm355_vm1, %v5151_v42, 0 }
 0x1e3   : > { %v2355_v35 = vpop.f32.mrf.mxu0  ;;  %v2392_v36 = vpop.f32.mrf.mxu1  ;;  %6681 = vmatmul.mubr.msk.bf16.vlgmr.msra.gmra.mxu1 %vm351_vm2, %v6677_v9  ;;  %v5153_v53 = vsel %vm5148_vm10, %v5141_v11, %v5143_v4 }
 0x1e4   : > { %v2482_v12 = vadd.f32 %v2392_v36, %v2262_v55  ;;  %6908 = vmatpush3.bf16.msra.mxu1 %v4958_v28  ;;  %6909 = vmatprep.mubr.msk.bf16.mxu1 %vm7046_vm3, %v7045_v29  ;;  %v5145_v37 = vpop.permute.xlu0 %5144 }
 0x1e5   : > { %v2394_v39 = vpop.f32.mrf.mxu1  ;;  %v2356_v40 = vpop.f32.mrf.mxu0  ;;  %6688 = vmatprep.subr.msk.bf16.mxu1 %vm355_vm1, %v5152_v34  ;;  %v5154_v43 = vsel %vm5148_vm10, %v5143_v4, %v5145_v37 }
 0x1e6   : > { %v2483_v41 = vadd.f32 %v2394_v39, %v2263_v59  ;;  %v5147_v44 = vpop.permute.xlu1 %5146  ;;  %v5172_v59 = vsel %vm355_vm1, %v5153_v53, 0  ;;  %v6693_v39 = vld [vmem:[%s8506_s1 + $0x5c] sm:$0xf] }
 0x1e7   : > { %v2396_v45 = vpop.f32.mrf.mxu1  ;;  %v2433_v46 = vpop.f32.mrf.mxu0  ;;  %6683 = vmatmul.mubr.msk.bf16.vlgmr.msra.gmra.mxu0 %vm351_vm2, %v6677_v9  ;;  %v5155_v63 = vsel %vm5148_vm10, %v5145_v37, %v5147_v44 }
 0x1e8   : > { %v2484_v47 = vadd.f32 %v2433_v46, %v2264_v2  ;;  %5195 = vmatpush1.bf16.msra.mxu0 %v5160_v38  ;;  %5212 = vmatprep.mubr.bf16.mxu0 %v7036_v0  ;;  %v5353_v48 = vpop.permute.xlu0 %5352  ;;  %v5178_v13 = vsel %vm355_vm1, %v5155_v63, 0 }
 0x1e9   : > { %v2397_v50 = vpop.f32.mrf.mxu1  ;;  %v2435_v51 = vpop.f32.mrf.mxu0  ;;  %6690 = vmatprep.subr.msk.bf16.mxu0 %vm355_vm1, %v5154_v43 }
 0x1ea   : > { %v2485_v52 = vadd.f32 %v2435_v51, %v2265_v14  ;;  %v5355_v54 = vpop.permute.xlu1 %5354 }
 0x1eb   : > { %v2437_v55 = vpop.f32.mrf.mxu0  ;;  %v2474_v60 = vpop.f32.mrf.mxu1  ;;  %6910 = vmatmul.mubr.msk.bf16.vlgmr.msra.gmra.mxu1 %vm351_vm2, %v6677_v9  ;;  %v5369_v16 = vsel %vm5368_vm11, %v5353_v48, %v5355_v54 }
 0x1ec   : > { %v2486_v56 = vadd.f32 %v2474_v60, %v2266_v18  ;;  %5236 = vmatpush1.bf16.msra.mxu1 %v5166_v49  ;;  %5253 = vmatprep.mubr.bf16.mxu1 %v7036_v0  ;;  %v5357_v58 = vpop.permute.xlu0 %5356  ;;  %v5380_v22 = vsel %vm355_vm1, %v5369_v16, 0 }
 0x1ed   : > { %v6839_v61 = vpop.f32.mrf.mxu1  ;;  %v2438_v62 = vpop.f32.mrf.mxu0  ;;  %6913 = vmatprep.subr.bf16.mxu1 %v7045_v29  ;;  %v5370_v5 = vsel %vm5368_vm11, %v5355_v54, %v5357_v58 }
 0x1ee   : > { %v5359_v1 = vpop.permute.xlu1 %5358 }
 0x1ef   : > { %v2477_v2 = vpop.f32.mrf.mxu1  ;;  %v2571_v3 = vpop.f32.mrf.mxu0  ;;  %6687 = vmatmul.mubr.msk.bf16.vlgmr.msra.gmra.mxu0 %vm351_vm2, %v6685_v57  ;;  %v5371_v8 = vsel %vm5368_vm11, %v5357_v58, %v5359_v1 }
 0x1f0   : > { %v2700_v7 = vadd.f32 %v2571_v3, %v2480_v27  ;;  %5277 = vmatpush1.bf16.msra.mxu0 %v5172_v59  ;;  %5294 = vmatprep.mubr.bf16.mxu0 %v7036_v0  ;;  %v5361_v10 = vpop.permute.xlu0 %5360 }
 0x1f1   : > { %v6840_v14 = vpop.f32.mrf.mxu1  ;;  %v2573_v6 = vpop.f32.mrf.mxu0  ;;  %6694 = vmatprep.subr.msk.bf16.mxu0 %vm355_vm1, %v5370_v5  ;;  %v5372_v17 = vsel %vm5368_vm11, %v5359_v1, %v5361_v10 }
 0x1f2   : > { %v2701_v15 = vadd.f32 %v2573_v6, %v2481_v32  ;;  %v5363_v18 = vpop.permute.xlu1 %5362  ;;  %v5386_v32 = vsel %vm355_vm1, %v5371_v8, 0 }
 0x1f3   : > { %v2575_v9 = vpop.f32.mrf.mxu0  ;;  %v2612_v19 = vpop.f32.mrf.mxu1  ;;  %6689 = vmatmul.mubr.msk.bf16.vlgmr.msra.gmra.mxu1 %vm351_vm2, %v6685_v57  ;;  %v5373_v35 = vsel %vm5368_vm11, %v5361_v10, %v5363_v18 }
 0x1f4   : > { %v2702_v20 = vadd.f32 %v2612_v19, %v2482_v12  ;;  %6914 = vmatpush3.bf16.msra.mxu1 %v5178_v13  ;;  %6915 = vmatprep.mubr.msk.bf16.mxu1 %vm7046_vm3, %v7045_v29  ;;  %v5365_v21 = vpop.permute.xlu0 %5364 }
 0x1f5   : > { %v2614_v23 = vpop.f32.mrf.mxu1  ;;  %v2576_v24 = vpop.f32.mrf.mxu0  ;;  %6696 = vmatprep.subr.msk.bf16.mxu1 %vm355_vm1, %v5372_v17  ;;  %v5374_v26 = vsel %vm5368_vm11, %v5363_v18, %v5365_v21 }
 0x1f6   : > { %v2703_v25 = vadd.f32 %v2614_v23, %v2483_v41  ;;  %v5367_v27 = vpop.permute.xlu1 %5366  ;;  %v5392_v41 = vsel %vm355_vm1, %v5373_v35, 0  ;;  %v6701_v23 = vld [vmem:[%s8506_s1 + $0x60] sm:$0xf] }
 0x1f7   : > { %v2616_v11 = vpop.f32.mrf.mxu1  ;;  %v2653_v28 = vpop.f32.mrf.mxu0  ;;  %6691 = vmatmul.mubr.msk.bf16.vlgmr.msra.gmra.mxu0 %vm351_vm2, %v6685_v57  ;;  %v5375_v44 = vsel %vm5368_vm11, %v5365_v21, %v5367_v27 }
 0x1f8   : > { %v2704_v30 = vadd.f32 %v2653_v28, %v2484_v47  ;;  %5415 = vmatpush1.bf16.msra.mxu0 %v5380_v22  ;;  %5432 = vmatprep.mubr.bf16.mxu0 %v7036_v0  ;;  %v5573_v31 = vpop.permute.xlu0 %5572  ;;  %v5398_v51 = vsel %vm355_vm1, %v5375_v44, 0 }
 0x1f9   : > { %v2617_v33 = vpop.f32.mrf.mxu1  ;;  %v2655_v34 = vpop.f32.mrf.mxu0  ;;  %6698 = vmatprep.subr.msk.bf16.mxu0 %vm355_vm1, %v5374_v26 }
 0x1fa   : > { %v2705_v4 = vadd.f32 %v2655_v34, %v2485_v52  ;;  %v5575_v36 = vpop.permute.xlu1 %5574 }
 0x1fb   : > { %v2657_v12 = vpop.f32.mrf.mxu0  ;;  %v2694_v37 = vpop.f32.mrf.mxu1  ;;  %6916 = vmatmul.mubr.msk.bf16.vlgmr.msra.gmra.mxu1 %vm351_vm2, %v6685_v57  ;;  %v5589_v55 = vsel %vm5588_vm12, %v5573_v31, %v5575_v36 }
 0x1fc   : > { %v2706_v38 = vadd.f32 %v2694_v37, %v2486_v56  ;;  %5456 = vmatpush1.bf16.msra.mxu1 %v5386_v32  ;;  %5473 = vmatprep.mubr.bf16.mxu1 %v7036_v0  ;;  %v5577_v40 = vpop.permute.xlu0 %5576  ;;  %v5600_v62 = vsel %vm355_vm1, %v5589_v55, 0 }
 0x1fd   : > { %v6845_v42 = vpop.f32.mrf.mxu1  ;;  %v2658_v43 = vpop.f32.mrf.mxu0  ;;  %6919 = vmatprep.subr.bf16.mxu1 %v7045_v29  ;;  %v5590_v45 = vsel %vm5588_vm12, %v5575_v36, %v5577_v40 }
 0x1fe   : > { %v5579_v46 = vpop.permute.xlu1 %5578 }
 0x1ff   : > { %v2697_v47 = vpop.f32.mrf.mxu1  ;;  %v2791_v48 = vpop.f32.mrf.mxu0  ;;  %6695 = vmatmul.mubr.msk.bf16.vlgmr.msra.gmra.mxu0 %vm351_vm2, %v6693_v39  ;;  %v5591_v2 = vsel %vm5588_vm12, %v5577_v40, %v5579_v46 }
 0x200   : > { %v2920_v49 = vadd.f32 %v2791_v48, %v2700_v7  ;;  %5497 = vmatpush1.bf16.msra.mxu0 %v5392_v41  ;;  %5514 = vmatprep.mubr.bf16.mxu0 %v7036_v0  ;;  %v5581_v50 = vpop.permute.xlu0 %5580 }
 0x201   : > { %v6846_v52 = vpop.f32.mrf.mxu1  ;;  %v2793_v53 = vpop.f32.mrf.mxu0  ;;  %6702 = vmatprep.subr.msk.bf16.mxu0 %vm355_vm1, %v5590_v45  ;;  %v5592_v60 = vsel %vm5588_vm12, %v5579_v46, %v5581_v50 }
 0x202   : > { %v2921_v54 = vadd.f32 %v2793_v53, %v2701_v15  ;;  %v5583_v56 = vpop.permute.xlu1 %5582  ;;  %v5606_v15 = vsel %vm355_vm1, %v5591_v2, 0 }
 0x203   : > { %v2795_v57 = vpop.f32.mrf.mxu0  ;;  %v2832_v58 = vpop.f32.mrf.mxu1  ;;  %6697 = vmatmul.mubr.msk.bf16.vlgmr.msra.gmra.mxu1 %vm351_vm2, %v6693_v39  ;;  %v5593_v9 = vsel %vm5588_vm12, %v5581_v50, %v5583_v56 }
 0x204   : > { %v2922_v59 = vadd.f32 %v2832_v58, %v2702_v20  ;;  %6920 = vmatpush3.bf16.msra.mxu1 %v5398_v51  ;;  %6921 = vmatprep.mubr.msk.bf16.mxu1 %vm7046_vm3, %v7045_v29  ;;  %v5585_v61 = vpop.permute.xlu0 %5584 }
 0x205   : > { %v2834_v63 = vpop.f32.mrf.mxu1  ;;  %v2796_v5 = vpop.f32.mrf.mxu0  ;;  %6704 = vmatprep.subr.msk.bf16.mxu1 %vm355_vm1, %v5592_v60  ;;  %v5594_v3 = vsel %vm5588_vm12, %v5583_v56, %v5585_v61 }
 0x206   : > { %v2923_v1 = vadd.f32 %v2834_v63, %v2703_v25  ;;  %v5587_v7 = vpop.permute.xlu1 %5586  ;;  %v5612_v25 = vsel %vm355_vm1, %v5593_v9, 0  ;;  %v6709_v63 = vld [vmem:[%s8506_s1 + $0x64] sm:$0xf] }
 0x207   : > { %v2836_v10 = vpop.f32.mrf.mxu1  ;;  %v2873_v13 = vpop.f32.mrf.mxu0  ;;  %6699 = vmatmul.mubr.msk.bf16.vlgmr.msra.gmra.mxu0 %vm351_vm2, %v6693_v39  ;;  %v5595_v27 = vsel %vm5588_vm12, %v5585_v61, %v5587_v7 }
 0x208   : > { %v2924_v14 = vadd.f32 %v2873_v13, %v2704_v30  ;;  %5635 = vmatpush1.bf16.msra.mxu0 %v5600_v62  ;;  %5652 = vmatprep.mubr.bf16.mxu0 %v7036_v0  ;;  %v5793_v6 = vpop.permute.xlu0 %5792  ;;  %v5618_v34 = vsel %vm355_vm1, %v5595_v27, 0 }
 0x209   : > { %v2837_v16 = vpop.f32.mrf.mxu1  ;;  %v2875_v17 = vpop.f32.mrf.mxu0  ;;  %6706 = vmatprep.subr.msk.bf16.mxu0 %vm355_vm1, %v5594_v3 }
 0x20a   : > { %v2925_v18 = vadd.f32 %v2875_v17, %v2705_v4  ;;  %v5795_v19 = vpop.permute.xlu1 %5794 }
 0x20b   : > { %v2877_v20 = vpop.f32.mrf.mxu0  ;;  %v2914_v21 = vpop.f32.mrf.mxu1  ;;  %6922 = vmatmul.mubr.msk.bf16.vlgmr.msra.gmra.mxu1 %vm351_vm2, %v6693_v39  ;;  %v5809_v12 = vsel %vm5808_vm13, %v5793_v6, %v5795_v19 }
 0x20c   : > { %v2926_v22 = vadd.f32 %v2914_v21, %v2706_v38  ;;  %5676 = vmatpush1.bf16.msra.mxu1 %v5606_v15  ;;  %5693 = vmatprep.mubr.bf16.mxu1 %v7036_v0  ;;  %v5797_v24 = vpop.permute.xlu0 %5796  ;;  %v5820_v43 = vsel %vm355_vm1, %v5809_v12, 0 }
 0x20d   : > { %v6851_v8 = vpop.f32.mrf.mxu1  ;;  %v2878_v26 = vpop.f32.mrf.mxu0  ;;  %6925 = vmatprep.subr.bf16.mxu1 %v7045_v29  ;;  %v5810_v11 = vsel %vm5808_vm13, %v5795_v19, %v5797_v24 }
 0x20e   : > { %v5799_v28 = vpop.permute.xlu1 %5798 }
 0x20f   : > { %v2917_v30 = vpop.f32.mrf.mxu1  ;;  %v3011_v31 = vpop.f32.mrf.mxu0  ;;  %6703 = vmatmul.mubr.msk.bf16.vlgmr.msra.gmra.mxu0 %vm351_vm2, %v6701_v23  ;;  %v5811_v47 = vsel %vm5808_vm13, %v5797_v24, %v5799_v28 }
 0x210   : > { %v3140_v32 = vadd.f32 %v3011_v31, %v2920_v49  ;;  %5717 = vmatpush1.bf16.msra.mxu0 %v5612_v25  ;;  %5734 = vmatprep.mubr.bf16.mxu0 %v7036_v0  ;;  %v5801_v33 = vpop.permute.xlu0 %5800 }
 0x211   : > { %v6852_v4 = vpop.f32.mrf.mxu1  ;;  %v3013_v35 = vpop.f32.mrf.mxu0  ;;  %6710 = vmatprep.subr.msk.bf16.mxu0 %vm355_vm1, %v5810_v11  ;;  %v5812_v37 = vsel %vm5808_vm13, %v5799_v28, %v5801_v33 }
 0x212   : > { %v3141_v36 = vadd.f32 %v3013_v35, %v2921_v54  ;;  %v5803_v38 = vpop.permute.xlu1 %5802  ;;  %v5826_v54 = vsel %vm355_vm1, %v5811_v47, 0 }
 0x213   : > { %v3015_v39 = vpop.f32.mrf.mxu0  ;;  %v3052_v40 = vpop.f32.mrf.mxu1  ;;  %6705 = vmatmul.mubr.msk.bf16.vlgmr.msra.gmra.mxu1 %vm351_vm2, %v6701_v23  ;;  %v5813_v57 = vsel %vm5808_vm13, %v5801_v33, %v5803_v38 }
 0x214   : > { %v3142_v41 = vadd.f32 %v3052_v40, %v2922_v59  ;;  %6926 = vmatpush3.bf16.msra.mxu1 %v5618_v34  ;;  %6927 = vmatprep.mubr.msk.bf16.mxu1 %vm7046_vm3, %v7045_v29  ;;  %v5805_v42 = vpop.permute.xlu0 %5804 }
 0x215   : > { %v3054_v44 = vpop.f32.mrf.mxu1  ;;  %v3016_v45 = vpop.f32.mrf.mxu0  ;;  %6712 = vmatprep.subr.msk.bf16.mxu1 %vm355_vm1, %v5812_v37  ;;  %v5814_v48 = vsel %vm5808_vm13, %v5803_v38, %v5805_v42 }
 0x216   : > { %v3143_v46 = vadd.f32 %v3054_v44, %v2923_v1  ;;  %v5807_v49 = vpop.permute.xlu1 %5806  ;;  %v5832_v1 = vsel %vm355_vm1, %v5813_v57, 0 }
 0x217   : > { %v3056_v50 = vpop.f32.mrf.mxu1  ;;  %v3093_v51 = vpop.f32.mrf.mxu0  ;;  %6707 = vmatmul.mubr.msk.bf16.vlgmr.msra.gmra.mxu0 %vm351_vm2, %v6701_v23  ;;  %v5815_v7 = vsel %vm5808_vm13, %v5805_v42, %v5807_v49  ;;  %v6717_v42 = vld [vmem:[%s8506_s1 + $0x68] sm:$0xf] }
 0x218   : > { %v3144_v52 = vadd.f32 %v3093_v51, %v2924_v14  ;;  %5855 = vmatpush1.bf16.msra.mxu0 %v5820_v43  ;;  %5872 = vmatprep.mubr.bf16.mxu0 %v7036_v0  ;;  %v6013_v53 = vpop.permute.xlu0 %6012  ;;  %v5838_v17 = vsel %vm355_vm1, %v5815_v7, 0 }
 0x219   : > { %v3057_v55 = vpop.f32.mrf.mxu1  ;;  %v3095_v60 = vpop.f32.mrf.mxu0  ;;  %6714 = vmatprep.subr.msk.bf16.mxu0 %vm355_vm1, %v5814_v48 }
 0x21a   : > { %v3145_v56 = vadd.f32 %v3095_v60, %v2925_v18  ;;  %v6015_v58 = vpop.permute.xlu1 %6014 }
 0x21b   : > { %v3097_v59 = vpop.f32.mrf.mxu0  ;;  %v3134_v61 = vpop.f32.mrf.mxu1  ;;  %6928 = vmatmul.mubr.msk.bf16.vlgmr.msra.gmra.mxu1 %vm351_vm2, %v6701_v23  ;;  %v6029_v20 = vsel %vm6028_vm14, %v6013_v53, %v6015_v58 }
 0x21c   : > { %v3146_v62 = vadd.f32 %v3134_v61, %v2926_v22  ;;  %5896 = vmatpush1.bf16.msra.mxu1 %v5826_v54  ;;  %5913 = vmatprep.mubr.bf16.mxu1 %v7036_v0  ;;  %v6017_v5 = vpop.permute.xlu0 %6016  ;;  %v6040_v26 = vsel %vm355_vm1, %v6029_v20, 0 }
 0x21d   : > { %v6857_v2 = vpop.f32.mrf.mxu1  ;;  %v3098_v3 = vpop.f32.mrf.mxu0  ;;  %6931 = vmatprep.subr.bf16.mxu1 %v7045_v29  ;;  %v6030_v10 = vsel %vm6028_vm14, %v6015_v58, %v6017_v5 }
 0x21e   : > { %v6019_v13 = vpop.permute.xlu1 %6018 }
 0x21f   : > { %v3137_v14 = vpop.f32.mrf.mxu1  ;;  %v3231_v6 = vpop.f32.mrf.mxu0  ;;  %6711 = vmatmul.mubr.msk.bf16.vlgmr.msra.gmra.mxu0 %vm351_vm2, %v6709_v63  ;;  %v6031_v30 = vsel %vm6028_vm14, %v6017_v5, %v6019_v13 }
 0x220   : > { %v3360_v15 = vadd.f32 %v3231_v6, %v3140_v32  ;;  %5937 = vmatpush1.bf16.msra.mxu0 %v5832_v1  ;;  %5954 = vmatprep.mubr.bf16.mxu0 %v7036_v0  ;;  %v6021_v16 = vpop.permute.xlu0 %6020  ;;  %v6046_v4 = vsel %vm355_vm1, %v6031_v30, 0 }
 0x221   : > { %v6858_v18 = vpop.f32.mrf.mxu1  ;;  %v3233_v9 = vpop.f32.mrf.mxu0  ;;  %6718 = vmatprep.subr.msk.bf16.mxu0 %vm355_vm1, %v6030_v10  ;;  %v6032_v21 = vsel %vm6028_vm14, %v6019_v13, %v6021_v16 }
 0x222   : > { %v3361_v19 = vadd.f32 %v3233_v9, %v3141_v36  ;;  %v6023_v22 = vpop.permute.xlu1 %6022 }
 0x223   : > { %v3235_v23 = vpop.f32.mrf.mxu0  ;;  %v3272_v24 = vpop.f32.mrf.mxu1  ;;  %6713 = vmatmul.mubr.msk.bf16.vlgmr.msra.gmra.mxu1 %vm351_vm2, %v6709_v63  ;;  %v6033_v37 = vsel %vm6028_vm14, %v6021_v16, %v6023_v22 }
 0x224   : > { %v3362_v25 = vadd.f32 %v3272_v24, %v3142_v41  ;;  %6932 = vmatpush3.bf16.msra.mxu1 %v5838_v17  ;;  %6933 = vmatprep.mubr.msk.bf16.mxu1 %vm7046_vm3, %v7045_v29  ;;  %v6025_v8 = vpop.permute.xlu0 %6024  ;;  %v6052_v43 = vsel %vm355_vm1, %v6033_v37, 0 }
 0x225   : > { %v3274_v27 = vpop.f32.mrf.mxu1  ;;  %v3236_v11 = vpop.f32.mrf.mxu0  ;;  %6720 = vmatprep.subr.msk.bf16.mxu1 %vm355_vm1, %v6032_v21  ;;  %v6034_v31 = vsel %vm6028_vm14, %v6023_v22, %v6025_v8 }
 0x226   : > { %v3363_v28 = vadd.f32 %v3274_v27, %v3143_v46  ;;  %v6027_v38 = vpop.permute.xlu1 %6026 }
 0x227   : > { %v3276_v32 = vpop.f32.mrf.mxu1  ;;  %v3313_v33 = vpop.f32.mrf.mxu0  ;;  %6715 = vmatmul.mubr.msk.bf16.vlgmr.msra.gmra.mxu0 %vm351_vm2, %v6709_v63  ;;  %v6035_v46 = vsel %vm6028_vm14, %v6025_v8, %v6027_v38 }
 0x228   : > { %v3364_v34 = vadd.f32 %v3313_v33, %v3144_v52  ;;  %6075 = vmatpush1.bf16.msra.mxu0 %v6040_v26  ;;  %6092 = vmatprep.mubr.bf16.mxu0 %v7036_v0  ;;  %v6058_v50 = vsel %vm355_vm1, %v6035_v46, 0 }
 0x229   : > { %v3277_v35 = vpop.f32.mrf.mxu1  ;;  %v3315_v36 = vpop.f32.mrf.mxu0  ;;  %6722 = vmatprep.subr.msk.bf16.mxu0 %vm355_vm1, %v6034_v31 }
 0x22a   : > { %v3365_v12 = vadd.f32 %v3315_v36, %v3145_v56 }
 0x22b   : > { %v3317_v39 = vpop.f32.mrf.mxu0  ;;  %v3354_v40 = vpop.f32.mrf.mxu1  ;;  %6934 = vmatmul.mubr.msk.bf16.vlgmr.msra.gmra.mxu1 %vm351_vm2, %v6709_v63 }
 0x22c   : > { %v3366_v41 = vadd.f32 %v3354_v40, %v3146_v62  ;;  %6116 = vmatpush1.bf16.msra.mxu1 %v6046_v4  ;;  %6133 = vmatprep.mubr.bf16.mxu1 %v7036_v0 }
 0x22d   : > { %v6863_v44 = vpop.f32.mrf.mxu1  ;;  %v3318_v45 = vpop.f32.mrf.mxu0  ;;  %6937 = vmatprep.subr.bf16.mxu1 %v7045_v29 }
 0x22f   : > { %v3357_v47 = vpop.f32.mrf.mxu1  ;;  %v3451_v48 = vpop.f32.mrf.mxu0  ;;  %6719 = vmatmul.mubr.msk.bf16.vlgmr.msra.gmra.mxu0 %vm351_vm2, %v6717_v42 }
 0x230   : > { %v3580_v49 = vadd.f32 %v3451_v48, %v3360_v15  ;;  %6157 = vmatpush1.bf16.msra.mxu0 %v6052_v43  ;;  %6174 = vmatprep.mubr.bf16.mxu0 %v7036_v0 }
 0x231   : > { %v6864_v51 = vpop.f32.mrf.mxu1  ;;  %v3453_v52 = vpop.f32.mrf.mxu0 }
 0x232   : > { %v3581_v53 = vadd.f32 %v3453_v52, %v3361_v19 }
 0x233   : > { %v3455_v54 = vpop.f32.mrf.mxu0  ;;  %v3492_v55 = vpop.f32.mrf.mxu1  ;;  %6721 = vmatmul.mubr.msk.bf16.vlgmr.msra.gmra.mxu1 %vm351_vm2, %v6717_v42 }
 0x234   : > { %v3582_v60 = vadd.f32 %v3492_v55, %v3362_v25  ;;  %6938 = vmatpush3.bf16.msra.mxu1 %v6058_v50  ;;  %6939 = vmatprep.mubr.msk.bf16.mxu1 %vm7046_vm3, %v7045_v29 }
 0x235   : > { %v3456_v56 = vpop.f32.mrf.mxu0  ;;  %v3494_v57 = vpop.f32.mrf.mxu1 }
 0x236   : > { %v3583_v58 = vadd.f32 %v3494_v57, %v3363_v28 }
 0x237   : > { %v3496_v59 = vpop.f32.mrf.mxu1  ;;  %v3533_v61 = vpop.f32.mrf.mxu0  ;;  %6723 = vmatmul.mubr.msk.bf16.vlgmr.msra.gmra.mxu0 %vm351_vm2, %v6717_v42 }
 0x238   : > { %v3584_v0 = vadd.f32 %v3533_v61, %v3364_v34 }
 0x239   : > { %v3497_v62 = vpop.f32.mrf.mxu1  ;;  %v3535_v63 = vpop.f32.mrf.mxu0 }
 0x23a   : > { %v3585_v5 = vadd.f32 %v3535_v63, %v3365_v12 }
 0x23b   : > { %v3537_v1 = vpop.f32.mrf.mxu0  ;;  %v3574_v2 = vpop.f32.mrf.mxu1  ;;  %6940 = vmatmul.mubr.msk.bf16.vlgmr.msra.gmra.mxu1 %vm351_vm2, %v6717_v42 }
 0x23c   : > { %v3586_v3 = vadd.f32 %v3574_v2, %v3366_v41 }
 0x23d   : > { %v3538_v7 = vpop.f32.mrf.mxu0  ;;  %v6869_v10 = vpop.f32.mrf.mxu1 }
 0x23f   : > { %v3577_v13 = vpop.f32.mrf.mxu1  ;;  %v3671_v29 = vpop.f32.mrf.mxu0 }
 0x240   : > { %v3800_v14 = vadd.f32 %v3671_v29, %v3580_v49 }
 0x241   : > { %v6870_v6 = vpop.f32.mrf.mxu1  ;;  %v3673_v15 = vpop.f32.mrf.mxu0 }
 0x242   : > { %v3801_v16 = vadd.f32 %v3673_v15, %v3581_v53 }
 0x243   : > { %v3675_v17 = vpop.f32.mrf.mxu0  ;;  %v3712_v18 = vpop.f32.mrf.mxu1 }
 0x244   : > { %v3802_v9 = vadd.f32 %v3712_v18, %v3582_v60 }
 0x245   : > { %v3676_v19 = vpop.f32.mrf.mxu0  ;;  %v3714_v20 = vpop.f32.mrf.mxu1 }
 0x246   : > { %v3803_v21 = vadd.f32 %v3714_v20, %v3583_v58 }
 0x247   : > { %v3716_v22 = vpop.f32.mrf.mxu1  ;;  %v3753_v23 = vpop.f32.mrf.mxu0 }
 0x248   : > { %v3804_v24 = vadd.f32 %v3753_v23, %v3584_v0 }
 0x249   : > { %v3717_v25 = vpop.f32.mrf.mxu1  ;;  %v3755_v8 = vpop.f32.mrf.mxu0 }
 0x24a   : > { %v3805_v26 = vadd.f32 %v3755_v8, %v3585_v5 }
 0x24b   : > { %v3757_v27 = vpop.f32.mrf.mxu0  ;;  %v3794_v11 = vpop.f32.mrf.mxu1 }
 0x24c   : > { %v3806_v28 = vadd.f32 %v3794_v11, %v3586_v3 }
 0x24d   : > { %v3758_v30 = vpop.f32.mrf.mxu0  ;;  %v6875_v31 = vpop.f32.mrf.mxu1 }
 0x24f   : > { %v3797_v32 = vpop.f32.mrf.mxu1  ;;  %v3891_v33 = vpop.f32.mrf.mxu0 }
 0x250   : > { %v4020_v34 = vadd.f32 %v3891_v33, %v3800_v14 }
 0x251   : > { %v6876_v4 = vpop.f32.mrf.mxu1  ;;  %v3893_v35 = vpop.f32.mrf.mxu0 }
 0x252   : > { %v4021_v36 = vadd.f32 %v3893_v35, %v3801_v16 }
 0x253   : > { %v3895_v12 = vpop.f32.mrf.mxu0  ;;  %v3932_v37 = vpop.f32.mrf.mxu1 }
 0x254   : > { %v4022_v38 = vadd.f32 %v3932_v37, %v3802_v9 }
 0x255   : > { %v3896_v39 = vpop.f32.mrf.mxu0  ;;  %v3934_v40 = vpop.f32.mrf.mxu1 }
 0x256   : > { %v4023_v41 = vadd.f32 %v3934_v40, %v3803_v21 }
 0x257   : > { %v3936_v42 = vpop.f32.mrf.mxu1  ;;  %v3973_v43 = vpop.f32.mrf.mxu0 }
 0x258   : > { %v4024_v44 = vadd.f32 %v3973_v43, %v3804_v24 }
 0x259   : > { %v3937_v45 = vpop.f32.mrf.mxu1  ;;  %v3975_v46 = vpop.f32.mrf.mxu0 }
 0x25a   : > { %v4025_v47 = vadd.f32 %v3975_v46, %v3805_v26 }
 0x25b   : > { %v3977_v48 = vpop.f32.mrf.mxu0  ;;  %v4014_v49 = vpop.f32.mrf.mxu1 }
 0x25c   : > { %v4026_v50 = vadd.f32 %v4014_v49, %v3806_v28 }
 0x25d   : > { %v3978_v51 = vpop.f32.mrf.mxu0  ;;  %v6881_v52 = vpop.f32.mrf.mxu1 }
 0x25f   : > { %v4017_v53 = vpop.f32.mrf.mxu1  ;;  %v4111_v54 = vpop.f32.mrf.mxu0 }
 0x260   : > { %v4240_v55 = vadd.f32 %v4111_v54, %v4020_v34 }
 0x261   : > { %v6882_v60 = vpop.f32.mrf.mxu1  ;;  %v4113_v56 = vpop.f32.mrf.mxu0 }
 0x262   : > { %v4241_v57 = vadd.f32 %v4113_v56, %v4021_v36 }
 0x263   : > { %v4115_v58 = vpop.f32.mrf.mxu0  ;;  %v4152_v59 = vpop.f32.mrf.mxu1 }
 0x264   : > { %v4242_v61 = vadd.f32 %v4152_v59, %v4022_v38 }
 0x265   : > { %v4116_v0 = vpop.f32.mrf.mxu0  ;;  %v4154_v62 = vpop.f32.mrf.mxu1 }
 0x266   : > { %v4243_v63 = vadd.f32 %v4154_v62, %v4023_v41 }
 0x267   : > { %v4156_v5 = vpop.f32.mrf.mxu1  ;;  %v4193_v1 = vpop.f32.mrf.mxu0 }
 0x268   : > { %v4244_v2 = vadd.f32 %v4193_v1, %v4024_v44 }
 0x269   : > { %v4157_v3 = vpop.f32.mrf.mxu1  ;;  %v4195_v7 = vpop.f32.mrf.mxu0 }
 0x26a   : > { %v4245_v10 = vadd.f32 %v4195_v7, %v4025_v47 }
 0x26b   : > { %v4197_v13 = vpop.f32.mrf.mxu0  ;;  %v4234_v29 = vpop.f32.mrf.mxu1 }
 0x26c   : > { %v4246_v14 = vadd.f32 %v4234_v29, %v4026_v50 }
 0x26d   : > { %v4198_v6 = vpop.f32.mrf.mxu0  ;;  %v6887_v15 = vpop.f32.mrf.mxu1 }
 0x26f   : > { %v4237_v16 = vpop.f32.mrf.mxu1  ;;  %v4334_v17 = vpop.f32.mrf.mxu0 }
 0x270   : > { %v4463_v18 = vadd.f32 %v4334_v17, %v4240_v55 }
 0x271   : > { %v6888_v9 = vpop.f32.mrf.mxu1  ;;  %v4336_v19 = vpop.f32.mrf.mxu0 }
 0x272   : > { %v4464_v20 = vadd.f32 %v4336_v19, %v4241_v57 }
 0x273   : > { %v4338_v21 = vpop.f32.mrf.mxu0  ;;  %v4375_v22 = vpop.f32.mrf.mxu1 }
 0x274   : > { %v4465_v23 = vadd.f32 %v4375_v22, %v4242_v61 }
 0x275   : > { %v4339_v24 = vpop.f32.mrf.mxu0  ;;  %v4377_v25 = vpop.f32.mrf.mxu1 }
 0x276   : > { %v4466_v8 = vadd.f32 %v4377_v25, %v4243_v63 }
 0x277   : > { %v4379_v26 = vpop.f32.mrf.mxu1  ;;  %v4416_v27 = vpop.f32.mrf.mxu0 }
 0x278   : > { %v4467_v11 = vadd.f32 %v4416_v27, %v4244_v2 }
 0x279   : > { %v4380_v28 = vpop.f32.mrf.mxu1  ;;  %v4418_v30 = vpop.f32.mrf.mxu0 }
 0x27a   : > { %v4468_v31 = vadd.f32 %v4418_v30, %v4245_v10 }
 0x27b   : > { %v4420_v32 = vpop.f32.mrf.mxu0  ;;  %v4457_v33 = vpop.f32.mrf.mxu1 }
 0x27c   : > { %v4469_v34 = vadd.f32 %v4457_v33, %v4246_v14 }
 0x27d   : > { %v4421_v4 = vpop.f32.mrf.mxu0  ;;  %v6893_v35 = vpop.f32.mrf.mxu1 }
 0x27f   : > { %v4460_v36 = vpop.f32.mrf.mxu1  ;;  %v4554_v12 = vpop.f32.mrf.mxu0 }
 0x280   : > { %v4683_v37 = vadd.f32 %v4554_v12, %v4463_v18 }
 0x281   : > { %v6894_v38 = vpop.f32.mrf.mxu1  ;;  %v4556_v39 = vpop.f32.mrf.mxu0 }
 0x282   : > { %v4684_v40 = vadd.f32 %v4556_v39, %v4464_v20 }
 0x283   : > { %v4558_v41 = vpop.f32.mrf.mxu0  ;;  %v4595_v42 = vpop.f32.mrf.mxu1 }
 0x284   : > { %v4685_v43 = vadd.f32 %v4595_v42, %v4465_v23 }
 0x285   : > { %v4559_v44 = vpop.f32.mrf.mxu0  ;;  %v4597_v45 = vpop.f32.mrf.mxu1 }
 0x286   : > { %v4686_v46 = vadd.f32 %v4597_v45, %v4466_v8 }
 0x287   : > { %v4599_v47 = vpop.f32.mrf.mxu1  ;;  %v4636_v48 = vpop.f32.mrf.mxu0 }
 0x288   : > { %v4687_v49 = vadd.f32 %v4636_v48, %v4467_v11 }
 0x289   : > { %v4600_v50 = vpop.f32.mrf.mxu1  ;;  %v4638_v51 = vpop.f32.mrf.mxu0 }
 0x28a   : > { %v4688_v52 = vadd.f32 %v4638_v51, %v4468_v31 }
 0x28b   : > { %v4640_v53 = vpop.f32.mrf.mxu0  ;;  %v4677_v54 = vpop.f32.mrf.mxu1 }
 0x28c   : > { %v4689_v55 = vadd.f32 %v4677_v54, %v4469_v34 }
 0x28d   : > { %v4641_v60 = vpop.f32.mrf.mxu0  ;;  %v6899_v56 = vpop.f32.mrf.mxu1 }
 0x28f   : > { %v4680_v57 = vpop.f32.mrf.mxu1  ;;  %v4774_v58 = vpop.f32.mrf.mxu0 }
 0x290   : > { %v4903_v59 = vadd.f32 %v4774_v58, %v4683_v37 }
 0x291   : > { %v6900_v61 = vpop.f32.mrf.mxu1  ;;  %v4776_v0 = vpop.f32.mrf.mxu0 }
 0x292   : > { %v4904_v62 = vadd.f32 %v4776_v0, %v4684_v40 }
 0x293   : > { %v4778_v63 = vpop.f32.mrf.mxu0  ;;  %v4815_v5 = vpop.f32.mrf.mxu1 }
 0x294   : > { %v4905_v1 = vadd.f32 %v4815_v5, %v4685_v43 }
 0x295   : > { %v4779_v2 = vpop.f32.mrf.mxu0  ;;  %v4817_v3 = vpop.f32.mrf.mxu1 }
 0x296   : > { %v4906_v7 = vadd.f32 %v4817_v3, %v4686_v46 }
 0x297   : > { %v4819_v10 = vpop.f32.mrf.mxu1  ;;  %v4856_v13 = vpop.f32.mrf.mxu0 }
 0x298   : > { %v4907_v29 = vadd.f32 %v4856_v13, %v4687_v49 }
 0x299   : > { %v4820_v14 = vpop.f32.mrf.mxu1  ;;  %v4858_v6 = vpop.f32.mrf.mxu0 }
 0x29a   : > { %v4908_v15 = vadd.f32 %v4858_v6, %v4688_v52 }
 0x29b   : > { %v4860_v16 = vpop.f32.mrf.mxu0  ;;  %v4897_v17 = vpop.f32.mrf.mxu1 }
 0x29c   : > { %v4909_v18 = vadd.f32 %v4897_v17, %v4689_v55 }
 0x29d   : > { %v4861_v9 = vpop.f32.mrf.mxu0  ;;  %v6905_v19 = vpop.f32.mrf.mxu1 }
 0x29f   : > { %v4900_v20 = vpop.f32.mrf.mxu1  ;;  %v4994_v21 = vpop.f32.mrf.mxu0 }
 0x2a0   : > { %v8397_v22 = vadd.f32 %v4994_v21, %v4903_v59 }
 0x2a1   : > { %v6906_v23 = vpop.f32.mrf.mxu1  ;;  %v4996_v24 = vpop.f32.mrf.mxu0 }
 0x2a2   : > { %v8399_v25 = vadd.f32 %v4996_v24, %v4904_v62 }
 0x2a3   : > { %v4998_v8 = vpop.f32.mrf.mxu0  ;;  %v5035_v26 = vpop.f32.mrf.mxu1 }
 0x2a4   : > { %v8401_v27 = vadd.f32 %v5035_v26, %v4905_v1 }
 0x2a5   : > { %v4999_v11 = vpop.f32.mrf.mxu0  ;;  %v5037_v28 = vpop.f32.mrf.mxu1 }
 0x2a6   : > { %v8403_v30 = vadd.f32 %v5037_v28, %v4906_v7 }
 0x2a7   : > { %v5039_v31 = vpop.f32.mrf.mxu1  ;;  %v5076_v32 = vpop.f32.mrf.mxu0 }
 0x2a8   : > { %v8405_v33 = vadd.f32 %v5076_v32, %v4907_v29 }
 0x2a9   : > { %v5040_v34 = vpop.f32.mrf.mxu1  ;;  %v5078_v4 = vpop.f32.mrf.mxu0 }
 0x2aa   : > { %v8407_v35 = vadd.f32 %v5078_v4, %v4908_v15 }
 0x2ab   : > { %v5080_v36 = vpop.f32.mrf.mxu0  ;;  %v5117_v12 = vpop.f32.mrf.mxu1 }
 0x2ac   : > { %v8409_v37 = vadd.f32 %v5117_v12, %v4909_v18  ;;  %v6232_v12 = vlaneseq }
 0x2ad   : > { %v5081_v38 = vpop.f32.mrf.mxu0  ;;  %v6911_v39 = vpop.f32.mrf.mxu1 }
 0x2af   : > { %v5120_v40 = vpop.f32.mrf.mxu1  ;;  %v5214_v41 = vpop.f32.mrf.mxu0 }
 0x2b1   : > { %v6912_v42 = vpop.f32.mrf.mxu1  ;;  %v5216_v43 = vpop.f32.mrf.mxu0 }
 0x2b3   : > { %v5218_v44 = vpop.f32.mrf.mxu0  ;;  %v8411_v45 = vpop.f32.mrf.mxu1 }
 0x2b4   : > { %v8433_v44 = vshrl.u32 %v6232_v12, 7 }
 0x2b5   : > { %v5219_v46 = vpop.f32.mrf.mxu0  ;;  %v8413_v47 = vpop.f32.mrf.mxu1 }
 0x2b6   : > { %v5343_v46 = vadd.f32 %v5214_v41, %v8397_v22  ;;  %v6230_v22 = vld [vmem:[%s8509_s4] sm:$0xff] }
 0x2b7   : > { %v5259_v48 = vpop.f32.mrf.mxu1  ;;  %v8415_v49 = vpop.f32.mrf.mxu0 }
 0x2b9   : > { %v5260_v50 = vpop.f32.mrf.mxu1  ;;  %v8417_v51 = vpop.f32.mrf.mxu0 }
 0x2bb   : > { %v5300_v52 = vpop.f32.mrf.mxu0  ;;  %v8419_v53 = vpop.f32.mrf.mxu1 }
 0x2bc   : > { %v5344_v52 = vadd.f32 %v5216_v43, %v8399_v25  ;;  %v6242_v25 = vsub.s32 2, %v8433_v44  ;;  %v6246_v43 = vsub.s32 3, %v8433_v44 }
 0x2bd   : > { %v5301_v54 = vpop.f32.mrf.mxu0  ;;  %v6917_v55 = vpop.f32.mrf.mxu1 }
 0x2bf   : > { %v5340_v60 = vpop.f32.mrf.mxu1  ;;  %v5434_v56 = vpop.f32.mrf.mxu0 }
 0x2c0   : > { %v5563_v54 = vadd.f32 %v5434_v56, %v5343_v46  ;;  %v5346_v56 = vadd.f32 %v8413_v47, %v8403_v30  ;;  %v5348_v30 = vadd.f32 %v8417_v51, %v8407_v35 }
 0x2c1   : > { %v6918_v57 = vpop.f32.mrf.mxu1  ;;  %v5436_v58 = vpop.f32.mrf.mxu0 }
 0x2c2   : > { %v6234_v57 = vsub.s32 0, %v8433_v44 }
 0x2c3   : > { %v5438_v59 = vpop.f32.mrf.mxu0  ;;  %v5475_v61 = vpop.f32.mrf.mxu1 }
 0x2c4   : > { %v6238_v59 = vsub.s32 1, %v8433_v44 }
 0x2c5   : > { %v5439_v0 = vpop.f32.mrf.mxu0  ;;  %v8421_v62 = vpop.f32.mrf.mxu1 }
 0x2c6   : > { %v5345_v0 = vadd.f32 %v8411_v45, %v8401_v27  ;;  %v5347_v27 = vadd.f32 %v8415_v49, %v8405_v33  ;;  %v8462_v33 = vrot.slane %v6230_v22, %v6242_v25  ;;  %v6250_v49 = vsub.s32 4, %v8433_v44 }
 0x2c7   : > { %v5479_v63 = vpop.f32.mrf.mxu1  ;;  %v8423_v5 = vpop.f32.mrf.mxu0 }
 0x2c8   : > { %v5564_v63 = vadd.f32 %v5436_v58, %v5344_v52  ;;  %v5567_v47 = vadd.f32 %v8423_v5, %v5347_v27  ;;  %v6254_v5 = vsub.s32 5, %v8433_v44 }
 0x2c9   : > { %v5480_v1 = vpop.f32.mrf.mxu1  ;;  %v8425_v2 = vpop.f32.mrf.mxu0 }
 0x2cb   : > { %v5520_v3 = vpop.f32.mrf.mxu0  ;;  %v8427_v7 = vpop.f32.mrf.mxu1 }
 0x2cd   : > { %v5521_v10 = vpop.f32.mrf.mxu0  ;;  %v6923_v13 = vpop.f32.mrf.mxu1 }
 0x2ce   : > { %v5565_v10 = vadd.f32 %v5475_v61, %v5345_v0 }
 0x2cf   : > { %v5560_v29 = vpop.f32.mrf.mxu1  ;;  %v5654_v14 = vpop.f32.mrf.mxu0 }
 0x2d0   : > { %v5783_v1 = vadd.f32 %v5654_v14, %v5563_v54  ;;  %v8452_v14 = vrot.slane %v6230_v22, %v6234_v57 }
 0x2d1   : > { %v6924_v6 = vpop.f32.mrf.mxu1  ;;  %v5656_v15 = vpop.f32.mrf.mxu0 }
 0x2d2   : > { %v5784_v13 = vadd.f32 %v5656_v15, %v5564_v63  ;;  %v8454_v6 = vrot.slane %v6230_v22, %v6238_v59 }
 0x2d3   : > { %v5658_v16 = vpop.f32.mrf.mxu0  ;;  %v5695_v17 = vpop.f32.mrf.mxu1 }
 0x2d4   : > { %v5566_v16 = vadd.f32 %v8421_v62, %v5346_v56  ;;  %v5349_v62 = vadd.f32 %v8419_v53, %v8409_v37  ;;  %v6251_v53 = vrot.slane %v6230_v22, %v6250_v49 }
 0x2d5   : > { %v5659_v18 = vpop.f32.mrf.mxu0  ;;  %v5697_v9 = vpop.f32.mrf.mxu1 }
 0x2d6   : > { %v5785_v18 = vadd.f32 %v5695_v17, %v5565_v10  ;;  %v5568_v17 = vadd.f32 %v8425_v2, %v5348_v30  ;;  %v6258_v2 = vsub.s32 6, %v8433_v44 }
 0x2d7   : > { %v5699_v19 = vpop.f32.mrf.mxu1  ;;  %v5736_v20 = vpop.f32.mrf.mxu0 }
 0x2d9   : > { %v5700_v21 = vpop.f32.mrf.mxu1  ;;  %v8429_v23 = vpop.f32.mrf.mxu0 }
 0x2da   : > { %v5788_v12 = vadd.f32 %v8429_v23, %v5568_v17 }
 0x2db   : > { %v5740_v24 = vpop.f32.mrf.mxu0  ;;  %v8431_v8 = vpop.f32.mrf.mxu1 }
 0x2dc   : > { %v5786_v24 = vadd.f32 %v5697_v9, %v5566_v16 }
 0x2dd   : > { %v5741_v26 = vpop.f32.mrf.mxu0  ;;  %v6929_v11 = vpop.f32.mrf.mxu1 }
 0x2df   : > { %v5780_v28 = vpop.f32.mrf.mxu1  ;;  %v5874_v31 = vpop.f32.mrf.mxu0 }
 0x2e0   : > { %v6003_v29 = vadd.f32 %v5874_v31, %v5783_v1  ;;  %v8465_v28 = vrot.slane %v6230_v22, %v6246_v43  ;;  %v5787_v31 = vadd.f32 %v5736_v20, %v5567_v47  ;;  %v6259_v1 = vrot.slane %v6230_v22, %v6258_v2 }
 0x2e1   : > { %v6930_v32 = vpop.f32.mrf.mxu1  ;;  %v5876_v34 = vpop.f32.mrf.mxu0 }
 0x2e2   : > { %v6004_v19 = vadd.f32 %v5876_v34, %v5784_v13 }
 0x2e3   : > { %v5878_v4 = vpop.f32.mrf.mxu0  ;;  %v5915_v36 = vpop.f32.mrf.mxu1 }
 0x2e4   : > { %v6005_v26 = vadd.f32 %v5915_v36, %v5785_v18  ;;  %v5569_v36 = vadd.f32 %v8427_v7, %v5349_v62 }
 0x2e5   : > { %v5879_v38 = vpop.f32.mrf.mxu0  ;;  %v5917_v39 = vpop.f32.mrf.mxu1 }
 0x2e6   : > { %v6006_v32 = vadd.f32 %v5917_v39, %v5786_v24 }
 0x2e7   : > { %v5919_v40 = vpop.f32.mrf.mxu1  ;;  %v5956_v42 = vpop.f32.mrf.mxu0 }
 0x2e8   : > { %v6007_v20 = vadd.f32 %v5956_v42, %v5787_v31 }
 0x2e9   : > { %v5920_v48 = vpop.f32.mrf.mxu1  ;;  %v5958_v50 = vpop.f32.mrf.mxu0 }
 0x2ea   : > { %v5789_v48 = vadd.f32 %v8431_v8, %v5569_v36  ;;  %v6008_v57 = vadd.f32 %v5958_v50, %v5788_v12 }
 0x2eb   : > { %v5960_v55 = vpop.f32.mrf.mxu0  ;;  %v8437_v60 = vpop.f32.mrf.mxu1 }
 0x2ec   : > { %v6255_v55 = vrot.slane %v6230_v22, %v6254_v5  ;;  %v6009_v44 = vadd.f32 %v8437_v60, %v5789_v48  ;;  %v6322_v60 = vld [vmem:[%s8507_s2] sm:$0xff] }
 0x2ed   : > { %v5961_v41 = vpop.f32.mrf.mxu0  ;;  %v6935_v3 = vpop.f32.mrf.mxu1 }
 0x2ef   : > { %v6000_v45 = vpop.f32.mrf.mxu1  ;;  %v6094_v58 = vpop.f32.mrf.mxu0 }
 0x2f0   : > { %v8457_v21 = vadd.f32 %v6094_v58, %v6003_v29 }
 0x2f1   : > { %v6936_v61 = vpop.f32.mrf.mxu1  ;;  %v6096_v15 = vpop.f32.mrf.mxu0 }
 0x2f2   : > { %v6224_v11 = vadd.f32 %v6096_v15, %v6004_v19  ;;  %v6267_v34 = vmul.f32 %v8452_v14, %v8457_v21 }
 0x2f3   : > { %v6098_v35 = vpop.f32.mrf.mxu0  ;;  %v6135_v51 = vpop.f32.mrf.mxu1 }
 0x2f4   : > { %v6268_v9 = vmul.f32 %v8454_v6, %v6224_v11  ;;  %v6225_v4 = vadd.f32 %v6135_v51, %v6005_v26 }
 0x2f5   : > { %v6099_v38 = vpop.f32.mrf.mxu0  ;;  %v6137_v37 = vpop.f32.mrf.mxu1 }
 0x2f6   : > { %v6274_v40 = vadd.f32 %v6268_v9, %v6267_v34  ;;  %v6269_v46 = vmul.f32 %v8462_v33, %v6225_v4  ;;  %v6226_v39 = vadd.f32 %v6137_v37, %v6006_v32 }
 0x2f7   : > { %v6139_v52 = vpop.f32.mrf.mxu1  ;;  %v6176_v54 = vpop.f32.mrf.mxu0 }
 0x2f8   : > { %v6275_v59 = vadd.f32 %v6274_v40, %v6269_v46  ;;  %v6270_v7 = vmul.f32 %v8465_v28, %v6226_v39  ;;  %v6227_v23 = vadd.f32 %v6176_v54, %v6007_v20 }
 0x2f9   : > { %v6140_v0 = vpop.f32.mrf.mxu1  ;;  %v6178_v63 = vpop.f32.mrf.mxu0 }
 0x2fa   : > { %v6276_v42 = vadd.f32 %v6275_v59, %v6270_v7  ;;  %v6271_v41 = vmul.f32 %v6251_v53, %v6227_v23  ;;  %v6228_v3 = vadd.f32 %v6178_v63, %v6008_v57 }
 0x2fb   : > { %v6180_v25 = vpop.f32.mrf.mxu0  ;;  %v6217_v43 = vpop.f32.mrf.mxu1 }
 0x2fc   : > { %v6277_v56 = vadd.f32 %v6276_v42, %v6271_v41  ;;  %v6272_v8 = vmul.f32 %v6255_v55, %v6228_v3  ;;  %v6229_v10 = vadd.f32 %v6217_v43, %v6009_v44 }
 0x2fd   : > { %v6181_v13 = vpop.f32.mrf.mxu0  ;;  %v6941_v29 = vpop.f32.mrf.mxu1 }
 0x2fe   : > { %v6278_v50 = vadd.f32 %v6277_v56, %v6272_v8  ;;  %v6273_v27 = vmul.f32 %v6259_v1, %v6229_v10 }
 0x2ff   : > { %v6220_v45 = vpop.f32.mrf.mxu1 }
 0x300   : > { %v6279_v58 = vadd.f32 %v6278_v50, %v6273_v27 }
 0x301   : > { %v6942_v16 = vpop.f32.mrf.mxu1 }
 0x302   : > { %6280 = vadd.xlane.f32.xlu0 %v6279_v58 }
 0x318   : > { %6325 = vperm.xlu0 %6998, %v6322_v60  }
 0x38b   : > { %v6281_v22 = vpop.xlane.xlu0 %6280 }
 0x38c   : > { %v6282_v18 = vmul.f32 0.001953125, %v6281_v22 }
 0x38e   : > { %v6283_v19 = vsub.f32 %v8457_v21, %v6282_v18  ;;  %v6284_v30 = vsub.f32 %v6224_v11, %v6282_v18  ;;  %v6285_v47 = vsub.f32 %v6225_v4, %v6282_v18  ;;  %v6286_v61 = vsub.f32 %v6226_v39, %v6282_v18 }
 0x38f   : > { %v6287_v15 = vsub.f32 %v6227_v23, %v6282_v18  ;;  %v6288_v62 = vsub.f32 %v6228_v3, %v6282_v18  ;;  %v6289_v51 = vsub.f32 %v6229_v10, %v6282_v18 }
 0x390   : > { %v6290_v49 = vmul.f32 %v6283_v19, %v6283_v19  ;;  %v6291_v24 = vmul.f32 %v6284_v30, %v6284_v30  ;;  %v6292_v26 = vmul.f32 %v6285_v47, %v6285_v47  ;;  %v6293_v17 = vmul.f32 %v6286_v61, %v6286_v61 }
 0x391   : > { %v6294_v5 = vmul.f32 %v6287_v15, %v6287_v15  ;;  %v6295_v9 = vmul.f32 %v6288_v62, %v6288_v62  ;;  %v6296_v4 = vmul.f32 %v6289_v51, %v6289_v51 }
 0x392   : > { %v6297_v31 = vmul.f32 %v6290_v49, %v8452_v14  ;;  %v6298_v35 = vmul.f32 %v6291_v24, %v8454_v6  ;;  %v6299_v32 = vmul.f32 %v6292_v26, %v8462_v33  ;;  %v6300_v21 = vmul.f32 %v6293_v17, %v8465_v28  ;;  %v6335_v14 = vld [vmem:[%s8508_s3] sm:$0xff] }
 0x393   : > { %v6301_v36 = vmul.f32 %v6294_v5, %v6251_v53  ;;  %v6302_v38 = vmul.f32 %v6295_v9, %v6255_v55  ;;  %v6303_v2 = vmul.f32 %v6296_v4, %v6259_v1  ;;  %v6326_v39 = vpop.permute.xlu0 %6325 }
 0x394   : > { %v6304_v34 = vadd.f32 %v6298_v35, %v6297_v31 }
 0x396   : > { %v6305_v11 = vadd.f32 %v6304_v34, %v6299_v32 }
 0x398   : > { %v6306_v12 = vadd.f32 %v6305_v11, %v6300_v21 }
 0x39a   : > { %v6307_v37 = vadd.f32 %v6306_v12, %v6301_v36 }
 0x39c   : > { %v6308_v20 = vadd.f32 %v6307_v37, %v6302_v38 }
 0x39e   : > { %v6309_v40 = vadd.f32 %v6308_v20, %v6303_v2 }
 0x3a0   : > { %6310 = vadd.xlane.f32.xlu1 %v6309_v40 }
 0x3b1   : > { %6338 = vperm.xlu1 %6999, %v6335_v14  }
 0x429   : > { %v6311_v6 = vpop.xlane.xlu1 %6310 }
 0x42a   : > { %v6312_v33 = vmul.f32 0.001953125, %v6311_v6 }
 0x42c   : > { %v6313_v46 = vadd.f32 1e-05, %v6312_v33 }
 0x42d   : > { %v6339_v7 = vpop.permute.xlu1 %6338 }
 0x42e   : > { %7009 = vrsqrt.f32 %v6313_v46 }
 0x43b   : > { %v7010_v28 = vpop.eup %7009 }
 0x43c   : > { %v6315_v53 = vmul.f32 %v7010_v28, %v6283_v19  ;;  %v6316_v48 = vmul.f32 %v7010_v28, %v6284_v30  ;;  %v6317_v52 = vmul.f32 %v7010_v28, %v6285_v47  ;;  %v6318_v54 = vmul.f32 %v7010_v28, %v6286_v61 }
 0x43d   : > { %v6319_v55 = vmul.f32 %v7010_v28, %v6287_v15  ;;  %v6320_v57 = vmul.f32 %v7010_v28, %v6288_v62  ;;  %v6321_v59 = vmul.f32 %v7010_v28, %v6289_v51 }
 0x43e   : > { %v6328_v23 = vmul.f32 %v6326_v39, %v6315_v53  ;;  %v6329_v0 = vmul.f32 %v6326_v39, %v6316_v48  ;;  %v6330_v63 = vmul.f32 %v6326_v39, %v6317_v52  ;;  %v6331_v1 = vmul.f32 %v6326_v39, %v6318_v54 }
 0x43f   : > { %v6332_v44 = vmul.f32 %v6326_v39, %v6319_v55  ;;  %v6333_v42 = vmul.f32 %v6326_v39, %v6320_v57  ;;  %v6334_v41 = vmul.f32 %v6326_v39, %v6321_v59 }
 0x440   : > { %v6341_v3 = vadd.f32 %v6339_v7, %v6328_v23  ;;  %v6342_v25 = vadd.f32 %v6339_v7, %v6329_v0  ;;  %v6343_v43 = vadd.f32 %v6339_v7, %v6330_v63  ;;  %v6344_v56 = vadd.f32 %v6339_v7, %v6331_v1 }
 0x441   : > { %v6345_v8 = vadd.f32 %v6339_v7, %v6332_v44  ;;  %v6346_v10 = vadd.f32 %v6339_v7, %v6333_v42  ;;  %v6347_v13 = vadd.f32 %v6339_v7, %v6334_v41 }
 0x442   : > { %v6348_v29 = vmax.f32 %v6341_v3, 0.0  ;;  %v6349_v50 = vmax.f32 %v6342_v25, 0.0  ;;  %v6350_v27 = vmax.f32 %v6343_v43, 0.0  ;;  %v6351_v45 = vmax.f32 %v6344_v56, 0.0 }
 0x443   : > { %v6352_v58 = vmax.f32 %v6345_v8, 0.0  ;;  %v6353_v16 = vmax.f32 %v6346_v10, 0.0  ;;  %v6354_v60 = vmax.f32 %v6347_v13, 0.0 }
 0x444   : > { %6355 = vst [vmem:[%s297_s8] sm:$0xff] %v6348_v29  ;;  %6356 = vst [vmem:[%s297_s8 + $0x8] sm:$0xff] %v6349_v50 }
 0x445   : > { %6357 = vst [vmem:[%s297_s8 + $0x10] sm:$0xff] %v6350_v27  ;;  %6358 = vst [vmem:[%s297_s8 + $0x18] sm:$0xff] %v6351_v45 }
 0x446   : > { %6359 = vst [vmem:[%s297_s8 + $0x20] sm:$0xff] %v6352_v58  ;;  %6360 = vst [vmem:[%s297_s8 + $0x28] sm:$0xff] %v6353_v16 }
 0x447   : > { %6361 = vst [vmem:[%s297_s8 + $0x30] sm:$0xff] %v6354_v60 }
 0x448 PF: > { %s15_s20 = sadd.s32 1, %s7034_s20   ;;  %s8511_s18 = smov %s7030_s19 }
 0x449   : > { %p12_p5 = scmp.ge.s32.totalorder %s15_s20, 4   ;;  %s8512_s19 = smov %s8514_s21 }
 0x44b   :  { %14 = sbr.rel (!%p12_p5) target bundleno = 2 (0x2), region = 105 }

</bundles_post_ra>
